<compile_context>
chip_gen: v6e
topology: v6e:2x2x1
jax: 0.10.0
libtpu: 0.0.40
codegen_flags: <defaults>
</compile_context>

<pallas_src>
import functools
import math

import jax
import jax.numpy as jnp
from jax import lax
from jax.experimental import pallas as pl
from jax.experimental.pallas import tpu as pltpu


def _round_up(x, m):
    return (x + m - 1) // m * m


def _head_transform_kernel(x_ref, w_ref, b_ref, gamma_ref, beta_ref, o_ref, *, eps):
    # Dense: x @ W^T + b. w_ref keeps the PyTorch (out_features, in_features)
    # layout; contract x's last dim with w's last dim (MXU handles the
    # transposed RHS natively, so no host-side transpose is needed).
    x = x_ref[...]
    w = w_ref[...]
    y = lax.dot_general(
        x, w,
        dimension_numbers=(((1,), (1,)), ((), ())),
        preferred_element_type=jnp.float32,
    )
    y = y + b_ref[...].astype(jnp.float32)          # (1, H) broadcast over rows

    # GELU (exact, erf-based — matches transformers ACT2FN["gelu"]).
    g = 0.5 * y * (1.0 + lax.erf(y * (1.0 / math.sqrt(2.0))))

    # LayerNorm over the hidden (lane) axis in f32, eps = config.layer_norm_eps.
    # Single-pass stats (sum / sum-of-squares): one fewer XLU reduction over g.
    h = jnp.float32(g.shape[-1])
    s1 = jnp.sum(g, axis=-1, keepdims=True)
    s2 = jnp.sum(g * g, axis=-1, keepdims=True)
    mean = s1 / h
    var = jnp.maximum(s2 / h - mean * mean, 0.0)    # clamp guards fp cancellation
    inv_std = lax.rsqrt(var + eps)
    out = (g - mean) * inv_std
    out = out * gamma_ref[...].astype(jnp.float32) + beta_ref[...].astype(jnp.float32)

    o_ref[...] = out.astype(o_ref.dtype)


def _vmem_limit_bytes(tile_m, H, x_dtype, w_dtype, out_dtype):
    nbytes = lambda dt: jnp.dtype(dt).itemsize
    est = (
        2 * H * H * nbytes(w_dtype)            # weight (assume double-buffered)
        + 2 * tile_m * H * nbytes(x_dtype)     # x tile, double-buffered
        + 2 * tile_m * H * nbytes(out_dtype)   # out tile, double-buffered
        + 6 * tile_m * H * 4                   # f32 intermediates headroom
        + 6 * H * 4                            # bias / gamma / beta
    )
    # Never below the v6e/v7x scoped default (32 MiB); stay comfortably under
    # v7x's 64 MiB physical VMEM.
    return int(min(max(2 * est, 32 * 2**20), 56 * 2**20))


def bert_prediction_head_transform(hidden_states, weight, bias, gamma, beta,
                                   eps=1e-12, tile_m=None, mxu_dtype=None):
    """Fused dense -> gelu -> LayerNorm.

    hidden_states: (B, S, H); weight: (H, H) in PyTorch Linear (out, in) layout;
    bias / gamma / beta: (H,). Returns (B, S, H) in hidden_states.dtype.

    mxu_dtype: optional dtype (e.g. jnp.bfloat16) for the matmul operands.
      Accumulation and the GELU / LayerNorm chain stay in f32.
    """
    B, S, H = hidden_states.shape
    M = B * S
    out_dtype = hidden_states.dtype

    x2d = hidden_states.reshape(M, H)
    if mxu_dtype is not None:
        # bf16 MXU operands with f32 accumulation: ~2-3x matmul throughput and
        # half the HBM traffic for x / W when the inputs are f32.
        x2d = x2d.astype(mxu_dtype)
        weight = weight.astype(mxu_dtype)
    b2d = bias.reshape(1, H)
    g2d = gamma.reshape(1, H)
    be2d = beta.reshape(1, H)

    if tile_m is None:
        # Bounded, MXU-aligned row tile: lets Pallas double-buffer x/out and,
        # for real BERT shapes, gives >= 2 grid steps (both v7x TCs get work).
        tile_m = 256 if M > 256 else _round_up(M, 8)

    M_pad = _round_up(M, tile_m)
    if M_pad != M:                       # ragged batch*seq: pad, slice after
        x2d = jnp.pad(x2d, ((0, M_pad - M), (0, 0)))

    kernel = functools.partial(_head_transform_kernel, eps=float(eps))
    vmem_limit = _vmem_limit_bytes(tile_m, H, x2d.dtype, weight.dtype, out_dtype)

    def run(single_buffer_consts):
        # Constant-index operands never re-DMA; single-buffering them reclaims
        # the unused second weight buffer (matters most on v7x's 64 MiB VMEM).
        ck = dict(pipeline_mode=pl.Buffered(1)) if single_buffer_consts else {}
        return pl.pallas_call(
            kernel,
            out_shape=jax.ShapeDtypeStruct((M_pad, H), out_dtype),
            grid_spec=pltpu.PrefetchScalarGridSpec(
                num_scalar_prefetch=0,
                grid=(M_pad // tile_m,),
                in_specs=[
                    pl.BlockSpec((tile_m, H), lambda i: (i, 0)),      # x rows
                    pl.BlockSpec((H, H), lambda i: (0, 0), **ck),     # W (out,in)
                    pl.BlockSpec((1, H), lambda i: (0, 0), **ck),     # bias
                    pl.BlockSpec((1, H), lambda i: (0, 0), **ck),     # LN gamma
                    pl.BlockSpec((1, H), lambda i: (0, 0), **ck),     # LN beta
                ],
                out_specs=pl.BlockSpec((tile_m, H), lambda i: (i, 0)),
            ),
            compiler_params=pltpu.CompilerParams(
                dimension_semantics=("parallel",),
                vmem_limit_bytes=vmem_limit,
            ),
        )(x2d, weight, b2d, g2d, be2d)

    try:
        out2d = run(single_buffer_consts=True)
    except Exception:
        # Fallback if this JAX build rejects pipeline_mode=pl.Buffered(1).
        out2d = run(single_buffer_consts=False)

    if M_pad != M:
        out2d = out2d[:M]
    return out2d.reshape(B, S, H)


if __name__ == "__main__":
    # Small shapes consistent with the module's forward (batch, seq, hidden);
    # M = B*S = 512 so the default 256-row tile yields a 2-step pipelined grid.
    B, S, H = 2, 256, 128
    key = jax.random.PRNGKey(0)
    k_x, k_w, k_b, k_g, k_be = jax.random.split(key, 5)

    x = jax.random.normal(k_x, (B, S, H), dtype=jnp.float32)
    # Deterministic synthetic parameters (nn.Linear(H, H) and nn.LayerNorm(H)).
    weight = jax.random.normal(k_w, (H, H), dtype=jnp.float32) * (1.0 / math.sqrt(H))
    bias = 0.02 * jax.random.normal(k_b, (H,), dtype=jnp.float32)
    gamma = 1.0 + 0.01 * jax.random.normal(k_g, (H,), dtype=jnp.float32)
    beta = 0.01 * jax.random.normal(k_be, (H,), dtype=jnp.float32)

    # Reference in plain JAX (same math path as the PyTorch module, f32).
    y_ref = x @ weight.T + bias
    g_ref = 0.5 * y_ref * (1.0 + lax.erf(y_ref / math.sqrt(2.0)))
    mu = g_ref.mean(-1, keepdims=True)
    var = ((g_ref - mu) ** 2).mean(-1, keepdims=True)
    ref = (g_ref - mu) * lax.rsqrt(var + 1e-12) * gamma + beta

    # f32 end-to-end path (tight check).
    out = bert_prediction_head_transform(x, weight, bias, gamma, beta, eps=1e-12)
    out = jax.block_until_ready(out)
    assert out.shape == (B, S, H)
    assert jnp.allclose(out, ref, atol=5e-4, rtol=5e-4)

    # bf16-MXU-operand path (f32 accumulation; looser check vs f32 reference).
    out_bf16 = bert_prediction_head_transform(
        x, weight, bias, gamma, beta, eps=1e-12, mxu_dtype=jnp.bfloat16)
    out_bf16 = jax.block_until_ready(out_bf16)
    assert out_bf16.shape == (B, S, H)
    assert bool(jnp.all(jnp.isfinite(out_bf16)))
    assert jnp.allclose(out_bf16, ref, atol=2e-1, rtol=2e-1)

    print("KERNEL_OK")
</pallas_src>

<mosaic_0001>
module attributes {stable_mosaic.version = 11 : i64} {
  func.func @_head_transform_kernel(%arg0: i32, %arg1: memref<256x128xf32, #tpu.memory_space<vmem>>, %arg2: memref<128x128xf32, #tpu.memory_space<vmem>>, %arg3: memref<1x128xf32, #tpu.memory_space<vmem>>, %arg4: memref<1x128xf32, #tpu.memory_space<vmem>>, %arg5: memref<1x128xf32, #tpu.memory_space<vmem>>, %arg6: memref<256x128xf32, #tpu.memory_space<vmem>>) attributes {dimension_semantics = [#tpu.dimension_semantics<parallel>], iteration_bounds = array<i64: 2>, scalar_prefetch = 0 : i64, scratch_operands = 0 : i64, tpu.core_type = #tpu.core_type<tc>, window_params = [{transform_indices = @transform_0, window_bounds = array<i64: 256, 128>}, {pipeline_mode = #tpu.pipeline_mode<synchronous>, transform_indices = @transform_1, window_bounds = array<i64: 128, 128>}, {pipeline_mode = #tpu.pipeline_mode<synchronous>, transform_indices = @transform_2, window_bounds = array<i64: 1, 128>}, {pipeline_mode = #tpu.pipeline_mode<synchronous>, transform_indices = @transform_3, window_bounds = array<i64: 1, 128>}, {pipeline_mode = #tpu.pipeline_mode<synchronous>, transform_indices = @transform_4, window_bounds = array<i64: 1, 128>}, {transform_indices = @transform_5, window_bounds = array<i64: 256, 128>}]} {
    %c0 = arith.constant 0 : index
    %c0_0 = arith.constant 0 : index
    %0 = vector.load %arg1[%c0, %c0_0] : memref<256x128xf32, #tpu.memory_space<vmem>>, vector<256x128xf32>
    %c0_1 = arith.constant 0 : index
    %c0_2 = arith.constant 0 : index
    %1 = vector.load %arg2[%c0_1, %c0_2] : memref<128x128xf32, #tpu.memory_space<vmem>>, vector<128x128xf32>
    %cst = arith.constant dense<0.000000e+00> : vector<256x128xf32>
    %2 = tpu.matmul %0, %1, %cst {dimension_numbers = #tpu.dot_dimension_numbers<[1], [1], [0], [0], [0, 0, 1, 0], [], []>} : vector<256x128xf32>, vector<128x128xf32>, vector<256x128xf32> -> vector<256x128xf32>
    %c0_3 = arith.constant 0 : index
    %c0_4 = arith.constant 0 : index
    %3 = vector.load %arg3[%c0_3, %c0_4] : memref<1x128xf32, #tpu.memory_space<vmem>>, vector<1x128xf32>
    %4 = vector.broadcast %3 : vector<1x128xf32> to vector<256x128xf32>
    %5 = arith.addf %2, %4 : vector<256x128xf32>
    %cst_5 = arith.constant 5.000000e-01 : f32
    %6 = vector.broadcast %cst_5 : f32 to vector<256x128xf32>
    %7 = arith.mulf %6, %5 : vector<256x128xf32>
    %cst_6 = arith.constant 0.707106769 : f32
    %8 = vector.broadcast %cst_6 : f32 to vector<256x128xf32>
    %9 = arith.mulf %5, %8 : vector<256x128xf32>
    %10 = math.erf %9 : vector<256x128xf32>
    %cst_7 = arith.constant 1.000000e+00 : f32
    %11 = vector.broadcast %cst_7 : f32 to vector<256x128xf32>
    %12 = arith.addf %11, %10 : vector<256x128xf32>
    %13 = arith.mulf %7, %12 : vector<256x128xf32>
    %cst_8 = arith.constant dense<0.000000e+00> : vector<256xf32>
    %14 = vector.multi_reduction <add>, %13, %cst_8 [1] : vector<256x128xf32> to vector<256xf32>
    %15 = vector.shape_cast %14 : vector<256xf32> to vector<256x1xf32>
    %16 = arith.mulf %13, %13 : vector<256x128xf32>
    %cst_9 = arith.constant dense<0.000000e+00> : vector<256xf32>
    %17 = vector.multi_reduction <add>, %16, %cst_9 [1] : vector<256x128xf32> to vector<256xf32>
    %18 = vector.shape_cast %17 : vector<256xf32> to vector<256x1xf32>
    %cst_10 = arith.constant 1.280000e+02 : f32
    %19 = vector.broadcast %cst_10 : f32 to vector<256x1xf32>
    %20 = arith.divf %15, %19 : vector<256x1xf32>
    %cst_11 = arith.constant 1.280000e+02 : f32
    %21 = vector.broadcast %cst_11 : f32 to vector<256x1xf32>
    %22 = arith.divf %18, %21 : vector<256x1xf32>
    %23 = arith.mulf %20, %20 : vector<256x1xf32>
    %24 = arith.subf %22, %23 : vector<256x1xf32>
    %cst_12 = arith.constant 0.000000e+00 : f32
    %25 = vector.broadcast %cst_12 : f32 to vector<256x1xf32>
    %26 = arith.maximumf %24, %25 : vector<256x1xf32>
    %cst_13 = arith.constant 9.99999996E-13 : f32
    %27 = vector.broadcast %cst_13 : f32 to vector<256x1xf32>
    %28 = arith.addf %26, %27 : vector<256x1xf32>
    %29 = math.rsqrt %28 : vector<256x1xf32>
    %30 = vector.broadcast %20 : vector<256x1xf32> to vector<256x128xf32>
    %31 = arith.subf %13, %30 : vector<256x128xf32>
    %32 = vector.broadcast %29 : vector<256x1xf32> to vector<256x128xf32>
    %33 = arith.mulf %31, %32 : vector<256x128xf32>
    %c0_14 = arith.constant 0 : index
    %c0_15 = arith.constant 0 : index
    %34 = vector.load %arg4[%c0_14, %c0_15] : memref<1x128xf32, #tpu.memory_space<vmem>>, vector<1x128xf32>
    %35 = vector.broadcast %34 : vector<1x128xf32> to vector<256x128xf32>
    %36 = arith.mulf %33, %35 : vector<256x128xf32>
    %c0_16 = arith.constant 0 : index
    %c0_17 = arith.constant 0 : index
    %37 = vector.load %arg5[%c0_16, %c0_17] : memref<1x128xf32, #tpu.memory_space<vmem>>, vector<1x128xf32>
    %38 = vector.broadcast %37 : vector<1x128xf32> to vector<256x128xf32>
    %39 = arith.addf %36, %38 : vector<256x128xf32>
    %c0_18 = arith.constant 0 : index
    %c0_19 = arith.constant 0 : index
    %40 = vector.load %arg6[%c0_18, %c0_19] : memref<256x128xf32, #tpu.memory_space<vmem>>, vector<256x128xf32>
    tpu.vector_store %arg6[%c0_18, %c0_19], %39 {strides = array<i32>} : memref<256x128xf32, #tpu.memory_space<vmem>>, vector<256x128xf32>,
    return
  }
  func.func @transform_0(%arg0: i32) -> (i32, i32) {
    %c0_i32 = arith.constant 0 : i32
    %c0_i32_0 = arith.constant 0 : i32
    return %arg0, %c0_i32 : i32, i32
  }
  func.func @transform_1(%arg0: i32) -> (i32, i32) {
    %c0_i32 = arith.constant 0 : i32
    %c0_i32_0 = arith.constant 0 : i32
    %c0_i32_1 = arith.constant 0 : i32
    return %c0_i32, %c0_i32_0 : i32, i32
  }
  func.func @transform_2(%arg0: i32) -> (i32, i32) {
    %c0_i32 = arith.constant 0 : i32
    %c0_i32_0 = arith.constant 0 : i32
    %c0_i32_1 = arith.constant 0 : i32
    return %c0_i32, %c0_i32_0 : i32, i32
  }
  func.func @transform_3(%arg0: i32) -> (i32, i32) {
    %c0_i32 = arith.constant 0 : i32
    %c0_i32_0 = arith.constant 0 : i32
    %c0_i32_1 = arith.constant 0 : i32
    return %c0_i32, %c0_i32_0 : i32, i32
  }
  func.func @transform_4(%arg0: i32) -> (i32, i32) {
    %c0_i32 = arith.constant 0 : i32
    %c0_i32_0 = arith.constant 0 : i32
    %c0_i32_1 = arith.constant 0 : i32
    return %c0_i32, %c0_i32_0 : i32, i32
  }
  func.func @transform_5(%arg0: i32) -> (i32, i32) {
    %c0_i32 = arith.constant 0 : i32
    %c0_i32_0 = arith.constant 0 : i32
    return %arg0, %c0_i32 : i32, i32
  }
}

module attributes {stable_mosaic.version = 11 : i64} {
  func.func @_head_transform_kernel(%arg0: i32, %arg1: memref<256x128xf32, #tpu.memory_space<vmem>>, %arg2: memref<128x128xf32, #tpu.memory_space<vmem>>, %arg3: memref<1x128xf32, #tpu.memory_space<vmem>>, %arg4: memref<1x128xf32, #tpu.memory_space<vmem>>, %arg5: memref<1x128xf32, #tpu.memory_space<vmem>>, %arg6: memref<256x128xf32, #tpu.memory_space<vmem>>) attributes {dimension_semantics = [#tpu.dimension_semantics<parallel>], iteration_bounds = array<i64: 2>, scalar_prefetch = 0 : i64, scratch_operands = 0 : i64, tpu.core_type = #tpu.core_type<tc>, window_params = [{transform_indices = @transform_0, window_bounds = array<i64: 256, 128>}, {pipeline_mode = #tpu.pipeline_mode<synchronous>, transform_indices = @transform_1, window_bounds = array<i64: 128, 128>}, {pipeline_mode = #tpu.pipeline_mode<synchronous>, transform_indices = @transform_2, window_bounds = array<i64: 1, 128>}, {pipeline_mode = #tpu.pipeline_mode<synchronous>, transform_indices = @transform_3, window_bounds = array<i64: 1, 128>}, {pipeline_mode = #tpu.pipeline_mode<synchronous>, transform_indices = @transform_4, window_bounds = array<i64: 1, 128>}, {transform_indices = @transform_5, window_bounds = array<i64: 256, 128>}]} {
    %c0 = arith.constant 0 : index
    %c0_0 = arith.constant 0 : index
    %0 = vector.load %arg1[%c0, %c0_0] : memref<256x128xf32, #tpu.memory_space<vmem>>, vector<256x128xf32>
    %c0_1 = arith.constant 0 : index
    %c0_2 = arith.constant 0 : index
    %1 = vector.load %arg2[%c0_1, %c0_2] : memref<128x128xf32, #tpu.memory_space<vmem>>, vector<128x128xf32>
    %cst = arith.constant dense<0.000000e+00> : vector<256x128xf32>
    %2 = tpu.matmul %0, %1, %cst {dimension_numbers = #tpu.dot_dimension_numbers<[1], [1], [0], [0], [0, 0, 1, 0], [], []>} : vector<256x128xf32>, vector<128x128xf32>, vector<256x128xf32> -> vector<256x128xf32>
    %c0_3 = arith.constant 0 : index
    %c0_4 = arith.constant 0 : index
    %3 = vector.load %arg3[%c0_3, %c0_4] : memref<1x128xf32, #tpu.memory_space<vmem>>, vector<1x128xf32>
    %4 = vector.broadcast %3 : vector<1x128xf32> to vector<256x128xf32>
    %5 = arith.addf %2, %4 : vector<256x128xf32>
    %cst_5 = arith.constant 5.000000e-01 : f32
    %6 = vector.broadcast %cst_5 : f32 to vector<256x128xf32>
    %7 = arith.mulf %6, %5 : vector<256x128xf32>
    %cst_6 = arith.constant 0.707106769 : f32
    %8 = vector.broadcast %cst_6 : f32 to vector<256x128xf32>
    %9 = arith.mulf %5, %8 : vector<256x128xf32>
    %10 = math.erf %9 : vector<256x128xf32>
    %cst_7 = arith.constant 1.000000e+00 : f32
    %11 = vector.broadcast %cst_7 : f32 to vector<256x128xf32>
    %12 = arith.addf %11, %10 : vector<256x128xf32>
    %13 = arith.mulf %7, %12 : vector<256x128xf32>
    %cst_8 = arith.constant dense<0.000000e+00> : vector<256xf32>
    %14 = vector.multi_reduction <add>, %13, %cst_8 [1] : vector<256x128xf32> to vector<256xf32>
    %15 = vector.shape_cast %14 : vector<256xf32> to vector<256x1xf32>
    %16 = arith.mulf %13, %13 : vector<256x128xf32>
    %cst_9 = arith.constant dense<0.000000e+00> : vector<256xf32>
    %17 = vector.multi_reduction <add>, %16, %cst_9 [1] : vector<256x128xf32> to vector<256xf32>
    %18 = vector.shape_cast %17 : vector<256xf32> to vector<256x1xf32>
    %cst_10 = arith.constant 1.280000e+02 : f32
    %19 = vector.broadcast %cst_10 : f32 to vector<256x1xf32>
    %20 = arith.divf %15, %19 : vector<256x1xf32>
    %cst_11 = arith.constant 1.280000e+02 : f32
    %21 = vector.broadcast %cst_11 : f32 to vector<256x1xf32>
    %22 = arith.divf %18, %21 : vector<256x1xf32>
    %23 = arith.mulf %20, %20 : vector<256x1xf32>
    %24 = arith.subf %22, %23 : vector<256x1xf32>
    %cst_12 = arith.constant 0.000000e+00 : f32
    %25 = vector.broadcast %cst_12 : f32 to vector<256x1xf32>
    %26 = arith.maximumf %24, %25 : vector<256x1xf32>
    %cst_13 = arith.constant 9.99999996E-13 : f32
    %27 = vector.broadcast %cst_13 : f32 to vector<256x1xf32>
    %28 = arith.addf %26, %27 : vector<256x1xf32>
    %29 = math.rsqrt %28 : vector<256x1xf32>
    %30 = vector.broadcast %20 : vector<256x1xf32> to vector<256x128xf32>
    %31 = arith.subf %13, %30 : vector<256x128xf32>
    %32 = vector.broadcast %29 : vector<256x1xf32> to vector<256x128xf32>
    %33 = arith.mulf %31, %32 : vector<256x128xf32>
    %c0_14 = arith.constant 0 : index
    %c0_15 = arith.constant 0 : index
    %34 = vector.load %arg4[%c0_14, %c0_15] : memref<1x128xf32, #tpu.memory_space<vmem>>, vector<1x128xf32>
    %35 = vector.broadcast %34 : vector<1x128xf32> to vector<256x128xf32>
    %36 = arith.mulf %33, %35 : vector<256x128xf32>
    %c0_16 = arith.constant 0 : index
    %c0_17 = arith.constant 0 : index
    %37 = vector.load %arg5[%c0_16, %c0_17] : memref<1x128xf32, #tpu.memory_space<vmem>>, vector<1x128xf32>
    %38 = vector.broadcast %37 : vector<1x128xf32> to vector<256x128xf32>
    %39 = arith.addf %36, %38 : vector<256x128xf32>
    %c0_18 = arith.constant 0 : index
    %c0_19 = arith.constant 0 : index
    %40 = vector.load %arg6[%c0_18, %c0_19] : memref<256x128xf32, #tpu.memory_space<vmem>>, vector<256x128xf32>
    tpu.vector_store %arg6[%c0_18, %c0_19], %39 {strides = array<i32>} : memref<256x128xf32, #tpu.memory_space<vmem>>, vector<256x128xf32>,
    return
  }
  func.func @transform_0(%arg0: i32) -> (i32, i32) {
    %c0_i32 = arith.constant 0 : i32
    %c0_i32_0 = arith.constant 0 : i32
    return %arg0, %c0_i32 : i32, i32
  }
  func.func @transform_1(%arg0: i32) -> (i32, i32) {
    %c0_i32 = arith.constant 0 : i32
    %c0_i32_0 = arith.constant 0 : i32
    %c0_i32_1 = arith.constant 0 : i32
    return %c0_i32, %c0_i32_0 : i32, i32
  }
  func.func @transform_2(%arg0: i32) -> (i32, i32) {
    %c0_i32 = arith.constant 0 : i32
    %c0_i32_0 = arith.constant 0 : i32
    %c0_i32_1 = arith.constant 0 : i32
    return %c0_i32, %c0_i32_0 : i32, i32
  }
  func.func @transform_3(%arg0: i32) -> (i32, i32) {
    %c0_i32 = arith.constant 0 : i32
    %c0_i32_0 = arith.constant 0 : i32
    %c0_i32_1 = arith.constant 0 : i32
    return %c0_i32, %c0_i32_0 : i32, i32
  }
  func.func @transform_4(%arg0: i32) -> (i32, i32) {
    %c0_i32 = arith.constant 0 : i32
    %c0_i32_0 = arith.constant 0 : i32
    %c0_i32_1 = arith.constant 0 : i32
    return %c0_i32, %c0_i32_0 : i32, i32
  }
  func.func @transform_5(%arg0: i32) -> (i32, i32) {
    %c0_i32 = arith.constant 0 : i32
    %c0_i32_0 = arith.constant 0 : i32
    return %arg0, %c0_i32 : i32, i32
  }
}

</mosaic_0001>

<bundles_post_ra>
// kernel: tpu_custom_call.1
= control target key start
LH: loop header
LB: loop body
LE: loop exit
PB: predicated region body
PF: predicated region fallthrough
CT: control target
= control target key end

     0   :  { %10 = vsyncpa [#allocation3], 0  ;;  %s2649_s0 = inlined_call_operand.hbm [shape: f32[512,128], index: 0, kind: input, shape index: {}]   ;;  %s2650_s1 = inlined_call_operand.hbm [shape: f32[128,128], index: 1, kind: input, shape index: {}]   ;;  %s2651_s2 = inlined_call_operand.vmem [shape: f32[1,128], index: 2, kind: input, shape index: {}]   ;;  %s2652_s3 = inlined_call_operand.vmem [shape: f32[1,128], index: 3, kind: input, shape index: {}]   ;;  %s2653_s4 = inlined_call_operand.vmem [shape: f32[1,128], index: 4, kind: input, shape index: {}]   ;;  %s2654_s5 = inlined_call_operand.hbm [shape: f32[512,128], index: 5, kind: output, shape index: {}]  }
   0x1   :  { %12 = vsyncpa [#allocation3 + $0x1], 0 }
   0x2   :  { %13 = vsyncpa [#allocation6], 0 }
   0x3   :  { %14 = vsyncpa [#allocation4], 0 }
   0x4   :  { %16 = vsyncpa [#allocation4 + $0x1], 0  ;;  %s1887_s18 = smov 0   ;;  %s1889_s19 = smov 0  }
   0x5   :  { %s1891_s20 = smov 0   ;;  %s1893_s21 = smov 0  }
   0x6 LB: > { %s1908_s22 = sadd.s32 4294967295, %s1848_s21   ;;  %s1356_s23 = sadd.s32 4294967294, %s1848_s21   ;;  %s1848_s21 = sphi %s1893_s21, %s2678_s21   ;;  %s1844_s20 = sphi %s1891_s20, %s2677_s20   ;;  %s1840_s19 = sphi %s1889_s19, %s2676_s19   ;;  %s1836_s18 = sphi %s1887_s18, %s2675_s18  }
   0x7   : > { %p42_p0 = scmp.ne.s32.totalorder %s1840_s19, %s1836_s18  ;;  %p2655_p1 = scmp.eq.s32.totalorder %s1908_s22, 0 }
   0x8   : > { %p156_p3 = scmp.eq.s32.totalorder %s1356_s23, 1  ;;  %p1357_p5 = scmp.ge.s32.totalorder %s1848_s21, 1 }
   0x9   : > { %p1917_p4 = por %p2655_p1, %p42_p0  ;;  %p163_p7 = scmp.lt.s32.totalorder %s1848_s21, 3 }
   0xa   : > { %p1922_p6 = por %p156_p3, %p42_p0  ;;  %s1850_s27 = smov [#allocation5]  }
   0xb   : > { %s2660_s24 = scalar_select %p1917_p4, 1, 0 }
   0xc   : > { %s2661_s25 = scalar_select %p1922_p6, 1, 0 }
   0xd   : > { %p1927_p8 = pnand %p1357_p5, %p163_p7  ;;  %s175_s28 = sshll.u32 %s1850_s27, 4  ;;  %s176_s28 = int_to_ptr.vmem [resolvable:$true] %s175_s28 }
   0xe   : > { %s1941_s30 = sadd.s32 1, %s1848_s21   ;;  %s29_s6 = sadd.s32 1, %s1844_s20 }
   0xf   : > { %s2662_s26 = scalar_select %p1927_p8, 1, 0 }
  0x10   : > { %p1545_p9 = pneg %p1927_p8  ;;  %s26_s7 = ssub.s32 %s1848_s21, %s1941_s30 }
  0x11   : > { %s1737_s8 = scalar_lea.vmem %s176_s28, 2048  ;;  %p1745_p5 = scmp.lt.s32.totalorder %s176_s28, %s176_s28 }
  0x12   : > { %p1936_p11 = pnand %p1545_p9, %p2655_p1  ;;  %p1738_p13 = scmp.ne.s32.totalorder %s176_s28, %s1737_s8 }
  0x13   : > { %p1746_p7 = scmp.lt.s32.totalorder %s1737_s8, %s1737_s8 }
  0x14   : > { %p1728_p12 = pneg %p1936_p11 }
  0x15   : > { %p1747_p10 = por %p1746_p7, %p1745_p5 }
  0x16   : > { %p1740_p0 = pnand %p1738_p13, %p1728_p12 }
  0x18   : > { %p1741_p3 = pneg %p1740_p0 }
  0x1a   : > { %p1748_p2 = pnand %p1747_p10, %p1741_p3 }
  0x1c   : > { %1751 = shalt.err (!%p1748_p2)
}
  0x1d   : > { %s2656_s9 = smov 128   ;;  %s1852_s10 = smov 8  }
  0x1e   : > { %1548 = dma.hbm_to_vmem [thread:$0]  (!%p1936_p11), %s2650_s1, 2048, %s176_s28, [#allocation6], %s2656_s9, %s2656_s9, %s1852_s10  }
  0x1f   : > { %p27_p2 = scmp.eq.s32.totalorder %s26_s7, 0  ;;  %p36_p9 = scmp.ne.s32.totalorder %s1844_s20, %s1840_s19 }
  0x20   : > { %p37_p10 = scmp.eq.s32.totalorder %s1848_s21, 0  ;;  %p1558_p12 = scmp.lt.s32.totalorder %s1848_s21, 2 }
  0x21   : > { %s1961_s13 = scalar_select %p27_p2, %s1844_s20, %s29_s6  }
  0x22   : > { %p38_p13 = por %p37_p10, %p36_p9  ;;  %p2664_p0 = scmp.eq.s32.totalorder %s1908_s22, 1 }
  0x23   : > { %s198_s15 = sand.u32 1, %s1844_s20   ;;  %s1375_s16 = sshll.u32 %s1848_s21, 12 }
  0x24   : > { %p1965_p3 = por %p2664_p0, %p36_p9  ;;  %s1360_s17 = sshll.u32 %s198_s15, 8 }
  0x25   : > { %s1974_s29 = scalar_lea.hbm %s2649_s0, %s1375_s16  ;;  %s202_s28 = scalar_lea.vmem [#allocation2], %s1360_s17 }
  0x26   : > { %s2665_s14 = scalar_select %p1965_p3, 1, 0 }
  0x27   : > { %s209_s6 = sshll.u32 %s202_s28, 4  ;;  %p1976_p11 = pnand %p1558_p12, %p38_p13  ;;  %s1980_s6 = int_to_ptr.vmem [resolvable:$true] %s209_s6 }
  0x28   : > { %s1982_s8 = scalar_lea.sflag [#allocation3], %s198_s15  ;;  %s1752_s11 = scalar_lea.hbm %s1974_s29, 4096 }
  0x29   : > { %p1753_p5 = scmp.ne.s32.totalorder %s1974_s29, %s1752_s11  ;;  %p1754_p7 = pneg %p1976_p11 }
  0x2a   : > { %s1757_s17 = scalar_lea.hbm %s2649_s0, 8192  ;;  %p1758_p10 = scmp.lt.s32.totalorder %s1974_s29, %s2649_s0 }
  0x2b   : > { %p1755_p2 = pnand %p1754_p7, %p1753_p5  ;;  %p1759_p12 = scmp.lt.s32.totalorder %s1757_s17, %s1752_s11 }
  0x2d   : > { %p1756_p9 = pneg %p1755_p2  ;;  %p1760_p13 = por %p1759_p12, %p1758_p10 }
  0x2f   : > { %p1761_p0 = pnand %p1760_p13, %p1756_p9 }
  0x31   : > { %1764 = shalt.err (!%p1761_p0)
}
  0x32   : > { %s1765_s15 = scalar_lea.vmem %s1980_s6, 4096  ;;  %s1853_s28 = smov [#allocation2]  }
  0x33   : > { %p1766_p1 = scmp.ne.s32.totalorder %s1980_s6, %s1765_s15  ;;  %s1770_s9 = sshll.u32 %s1853_s28, 4  ;;  %s1771_s9 = int_to_ptr.vmem [resolvable:$false] %s1770_s9 }
  0x34   : > { %s1772_s12 = scalar_lea.vmem %s1771_s9, 8192  ;;  %p1773_p2 = scmp.lt.s32.totalorder %s1980_s6, %s1771_s9 }
  0x35   : > { %p1768_p6 = pnand %p1766_p1, %p1754_p7  ;;  %p1774_p3 = scmp.lt.s32.totalorder %s1772_s12, %s1765_s15 }
  0x37   : > { %p1769_p5 = pneg %p1768_p6  ;;  %p1775_p4 = por %p1774_p3, %p1773_p2 }
  0x39   : > { %p1776_p8 = pnand %p1775_p4, %p1769_p5 }
  0x3b   : > { %1779 = shalt.err (!%p1776_p8)
}
  0x3c   : > { %s2667_s11 = smov 128   ;;  %p2668_p1 = scmp.ne.s32.totalorder %s2662_s26, 0 }
  0x3d   : > { %1552 = dma.hbm_to_vmem [thread:$0]  (!%p1976_p11), %s1974_s29, 4096, %s1980_s6, %s1982_s8, %s2667_s11, %s2667_s11, %s1852_s10  }
  0x3e   : > { %221 = sbr.rel (%p2668_p1) target bundleno = 656 (0x290), region = 40  ;;  %s2009_s16 = sand.u32 (!%p2668_p1), 1, %s1840_s19  }
  0x3f   : > { %s1364_s9 = sshll.u32 (!%p2668_p1), %s2009_s16, 8  ;;  %s224_s17 = scalar_lea.sflag (!%p2668_p1), [#allocation3], %s2009_s16 }
  0x40   : > { %s2015_s7 = scalar_lea.vmem (!%p2668_p1), [#allocation2], %s1364_s9  ;;  %p2669_p4 = scmp.ne.s32.totalorder (!%p2668_p1), %s2660_s24, 0 }
  0x43   : > { %1823 = dma.done.wait (%p2669_p4), %s224_s17, 4096  }
  0x44   : > { %1825 = vsyncadd (%p2669_p4), %s224_s17, 4294963200  ;;  %p2670_p6 = scmp.eq.s32.totalorder %s1908_s22, 0 }
  0x46   : > { %1827 = dma.done.wait (%p2670_p6), [#allocation6], 2048   ;;  %p2671_p8 = pmov %p2670_p6 }
  0x47   : > { %v307_v0 = vld [vmem:[#allocation5 + $0x78] sm:$0xff]  ;;  %v306_v1 = vld [vmem:[#allocation5 + $0x70] sm:$0xff]  ;;  %v305_v2 = vld [vmem:[#allocation5 + $0x68] sm:$0xff]  ;;  %s2349_s23 = scalar_lea.vmem [#allocation7], %s1364_s9  ;;  %s1376_s27 = sshll.u32 %s1908_s22, 12 }
  0x48   : > { %1829 = vsyncadd (%p2671_p8), [#allocation6], 4294965248  ;;  %1425 = vmatprep.subr.mxu0 %v307_v0  ;;  %1505 = vmatprep.subr.mxu1 %v307_v0  ;;  %v260_v3 = vld [vmem:[%s2015_s7] sm:$0xff]  ;;  %v303_v6 = vld [vmem:[#allocation5 + $0x58] sm:$0xff]  ;;  %s1273_s15 = sshll.u32 %s2349_s23, 4  ;;  %s2601_s11 = scalar_lea.hbm %s2654_s5, %s1376_s27  ;;  %s2603_s15 = int_to_ptr.vmem [resolvable:$true] %s1273_s15 }
  0x49   : > { %1426 = vmatpush3.xpose.msra.mxu0 %v307_v0  ;;  %1521 = vmatpush3.xpose.msra.mxu1 %v307_v0  ;;  %v276_v4 = vld [vmem:[%s2015_s7 + $0x80] sm:$0xff]  ;;  %v302_v7 = vld [vmem:[#allocation5 + $0x50] sm:$0xff]  ;;  %v301_v8 = vld [vmem:[#allocation5 + $0x48] sm:$0xff]  ;;  %s1260_s22 = scalar_lea.sflag [#allocation4], %s2009_s16  ;;  %s1780_s9 = scalar_lea.vmem %s2603_s15, 4096 }
  0x4a   : > { %1427 = vmatprep.subr.mxu0 %v306_v1  ;;  %1506 = vmatprep.subr.mxu1 %v306_v1  ;;  %v304_v5 = vld [vmem:[#allocation5 + $0x60] sm:$0xff]  ;;  %v299_v10 = vld [vmem:[#allocation5 + $0x38] sm:$0xff]  ;;  %v298_v11 = vld [vmem:[#allocation5 + $0x30] sm:$0xff]  ;;  %p1781_p3 = scmp.ne.s32.totalorder %s2603_s15, %s1780_s9  ;;  %p2672_p11 = scmp.ne.s32.totalorder %s2665_s14, 0 }
  0x4b   : > { %1457 = vmatprep.mubr.f32.mxu0 %v260_v3  ;;  %1481 = vmatprep.mubr.f32.mxu1 %v276_v4  ;;  %v300_v9 = vld [vmem:[#allocation5 + $0x40] sm:$0xff]  ;;  %v297_v12 = vld [vmem:[#allocation5 + $0x28] sm:$0xff]  ;;  %v295_v14 = vld [vmem:[#allocation5 + $0x18] sm:$0xff]  ;;  %s1854_s17 = smov [#allocation7]  }
  0x4c   : > { %v296_v13 = vld [vmem:[#allocation5 + $0x20] sm:$0xff]  ;;  %v294_v15 = vld [vmem:[#allocation5 + $0x10] sm:$0xff]  ;;  %v293_v16 = vld [vmem:[#allocation5 + $0x8] sm:$0xff]  ;;  %p1782_p7 = pnand %p1781_p3, %p2672_p11 }
  0x4d   : > { %1428 = vmatpush3.xpose.msra.mxu0 %v306_v1  ;;  %1522 = vmatpush3.xpose.msra.mxu1 %v306_v1  ;;  %v292_v17 = vld [vmem:[#allocation5] sm:$0xff]  ;;  %v261_v18 = vld [vmem:[%s2015_s7 + $0x8] sm:$0xff]  ;;  %v262_v20 = vld [vmem:[%s2015_s7 + $0x10] sm:$0xff] }
  0x4e   : > { %1429 = vmatprep.subr.mxu0 %v305_v2  ;;  %1507 = vmatprep.subr.mxu1 %v305_v2  ;;  %v277_v19 = vld [vmem:[%s2015_s7 + $0x88] sm:$0xff]  ;;  %v278_v21 = vld [vmem:[%s2015_s7 + $0x90] sm:$0xff]  ;;  %v263_v22 = vld [vmem:[%s2015_s7 + $0x18] sm:$0xff]  ;;  %p1783_p9 = pneg %p1782_p7 }
  0x4f   : > { %v279_v23 = vld [vmem:[%s2015_s7 + $0x98] sm:$0xff]  ;;  %v264_v24 = vld [vmem:[%s2015_s7 + $0x20] sm:$0xff]  ;;  %v265_v26 = vld [vmem:[%s2015_s7 + $0x28] sm:$0xff] }
  0x50   : > { %v280_v25 = vld [vmem:[%s2015_s7 + $0xa0] sm:$0xff]  ;;  %v281_v27 = vld [vmem:[%s2015_s7 + $0xa8] sm:$0xff]  ;;  %v266_v28 = vld [vmem:[%s2015_s7 + $0x30] sm:$0xff] }
  0x51   : > { %1430 = vmatpush3.xpose.msra.mxu0 %v305_v2  ;;  %1523 = vmatpush3.xpose.msra.mxu1 %v305_v2  ;;  %v282_v29 = vld [vmem:[%s2015_s7 + $0xb0] sm:$0xff]  ;;  %v267_v30 = vld [vmem:[%s2015_s7 + $0x38] sm:$0xff]  ;;  %v268_v32 = vld [vmem:[%s2015_s7 + $0x40] sm:$0xff] }
  0x52   : > { %1431 = vmatprep.subr.mxu0 %v304_v5  ;;  %1508 = vmatprep.subr.mxu1 %v304_v5  ;;  %v283_v31 = vld [vmem:[%s2015_s7 + $0xb8] sm:$0xff]  ;;  %v284_v33 = vld [vmem:[%s2015_s7 + $0xc0] sm:$0xff]  ;;  %v269_v34 = vld [vmem:[%s2015_s7 + $0x48] sm:$0xff] }
  0x53   : > { %v285_v35 = vld [vmem:[%s2015_s7 + $0xc8] sm:$0xff]  ;;  %v270_v36 = vld [vmem:[%s2015_s7 + $0x50] sm:$0xff]  ;;  %v271_v38 = vld [vmem:[%s2015_s7 + $0x58] sm:$0xff] }
  0x54   : > { %v286_v37 = vld [vmem:[%s2015_s7 + $0xd0] sm:$0xff]  ;;  %v287_v39 = vld [vmem:[%s2015_s7 + $0xd8] sm:$0xff]  ;;  %v272_v40 = vld [vmem:[%s2015_s7 + $0x60] sm:$0xff] }
  0x55   : > { %1432 = vmatpush3.xpose.msra.mxu0 %v304_v5  ;;  %1524 = vmatpush3.xpose.msra.mxu1 %v304_v5  ;;  %v288_v41 = vld [vmem:[%s2015_s7 + $0xe0] sm:$0xff]  ;;  %v273_v42 = vld [vmem:[%s2015_s7 + $0x68] sm:$0xff]  ;;  %v274_v44 = vld [vmem:[%s2015_s7 + $0x70] sm:$0xff] }
  0x56   : > { %1433 = vmatprep.subr.mxu0 %v303_v6  ;;  %1509 = vmatprep.subr.mxu1 %v303_v6  ;;  %v289_v43 = vld [vmem:[%s2015_s7 + $0xe8] sm:$0xff]  ;;  %v290_v45 = vld [vmem:[%s2015_s7 + $0xf0] sm:$0xff]  ;;  %v275_v46 = vld [vmem:[%s2015_s7 + $0x78] sm:$0xff] }
  0x57   : > { %v291_v47 = vld [vmem:[%s2015_s7 + $0xf8] sm:$0xff]  ;;  %v2060_v48 = vld [vmem:[%s2651_s2] ss:$0 sm:$0xff]  ;;  %s1784_s7 = sshll.u32 %s1854_s17, 4  ;;  %s1785_s7 = int_to_ptr.vmem [resolvable:$false] %s1784_s7 }
  0x58   : > { %s1786_s24 = scalar_lea.vmem %s1785_s7, 8192  ;;  %p1787_p10 = scmp.lt.s32.totalorder %s2603_s15, %s1785_s7 }
  0x59   : > { %1434 = vmatpush3.xpose.msra.mxu0 %v303_v6  ;;  %1525 = vmatpush3.xpose.msra.mxu1 %v303_v6  ;;  %p1788_p12 = scmp.lt.s32.totalorder %s1786_s24, %s1780_s9 }
  0x5a   : > { %1435 = vmatprep.subr.mxu0 %v302_v7  ;;  %1510 = vmatprep.subr.mxu1 %v302_v7 }
  0x5b   : > { %p1789_p13 = por %p1788_p12, %p1787_p10 }
  0x5d   : > { %1436 = vmatpush3.xpose.msra.mxu0 %v302_v7  ;;  %1526 = vmatpush3.xpose.msra.mxu1 %v302_v7  ;;  %p1790_p0 = pnand %p1789_p13, %p1783_p9 }
  0x5e   : > { %1437 = vmatprep.subr.mxu0 %v301_v8  ;;  %1511 = vmatprep.subr.mxu1 %v301_v8 }
  0x61   : > { %1438 = vmatpush3.xpose.msra.mxu0 %v301_v8  ;;  %1527 = vmatpush3.xpose.msra.mxu1 %v301_v8 }
  0x62   : > { %1439 = vmatprep.subr.mxu0 %v300_v9  ;;  %1512 = vmatprep.subr.mxu1 %v300_v9 }
  0x65   : > { %1440 = vmatpush3.xpose.msra.mxu0 %v300_v9  ;;  %1528 = vmatpush3.xpose.msra.mxu1 %v300_v9 }
  0x66   : > { %1441 = vmatprep.subr.mxu0 %v299_v10  ;;  %1513 = vmatprep.subr.mxu1 %v299_v10 }
  0x69   : > { %1442 = vmatpush3.xpose.msra.mxu0 %v299_v10  ;;  %1529 = vmatpush3.xpose.msra.mxu1 %v299_v10 }
  0x6a   : > { %1443 = vmatprep.subr.mxu0 %v298_v11  ;;  %1514 = vmatprep.subr.mxu1 %v298_v11 }
  0x6d   : > { %1444 = vmatpush3.xpose.msra.mxu0 %v298_v11  ;;  %1530 = vmatpush3.xpose.msra.mxu1 %v298_v11 }
  0x6e   : > { %1445 = vmatprep.subr.mxu0 %v297_v12  ;;  %1515 = vmatprep.subr.mxu1 %v297_v12 }
  0x71   : > { %1446 = vmatpush3.xpose.msra.mxu0 %v297_v12  ;;  %1531 = vmatpush3.xpose.msra.mxu1 %v297_v12 }
  0x72   : > { %1447 = vmatprep.subr.mxu0 %v296_v13  ;;  %1516 = vmatprep.subr.mxu1 %v296_v13 }
  0x75   : > { %1448 = vmatpush3.xpose.msra.mxu0 %v296_v13  ;;  %1532 = vmatpush3.xpose.msra.mxu1 %v296_v13 }
  0x76   : > { %1449 = vmatprep.subr.mxu0 %v295_v14  ;;  %1517 = vmatprep.subr.mxu1 %v295_v14 }
  0x79   : > { %1450 = vmatpush3.xpose.msra.mxu0 %v295_v14  ;;  %1533 = vmatpush3.xpose.msra.mxu1 %v295_v14 }
  0x7a   : > { %1451 = vmatprep.subr.mxu0 %v294_v15  ;;  %1518 = vmatprep.subr.mxu1 %v294_v15 }
  0x7d   : > { %1452 = vmatpush3.xpose.msra.mxu0 %v294_v15  ;;  %1534 = vmatpush3.xpose.msra.mxu1 %v294_v15 }
  0x7e   : > { %1453 = vmatprep.subr.mxu0 %v293_v16  ;;  %1519 = vmatprep.subr.mxu1 %v293_v16 }
  0x81   : > { %1454 = vmatpush3.xpose.msra.mxu0 %v293_v16  ;;  %1535 = vmatpush3.xpose.msra.mxu1 %v293_v16 }
  0x82   : > { %1455 = vmatprep.subr.mxu0 %v292_v17  ;;  %1520 = vmatprep.subr.mxu1 %v292_v17 }
  0x85   : > { %1456 = vmatpush3.xpose.msra.mxu0 %v292_v17  ;;  %1536 = vmatpush3.xpose.msra.mxu1 %v292_v17 }
  0x88   : > { %1458 = vmatmul.mubr.f32.vlgmr.msra.gmra.mxu0 %v261_v18  ;;  %1482 = vmatmul.mubr.f32.vlgmr.msra.gmra.mxu1 %v277_v19 }
  0x89   : > { %1460 = vmatprep.mubr.f32.mxu0 %v262_v20  ;;  %1484 = vmatprep.mubr.f32.mxu1 %v278_v21 }
  0x8c   : > { %1461 = vmatmul.mubr.f32.gmra.mxu0 %v263_v22  ;;  %1485 = vmatmul.mubr.f32.gmra.mxu1 %v279_v23 }
  0x8d   : > { %1463 = vmatprep.mubr.f32.mxu0 %v264_v24  ;;  %1487 = vmatprep.mubr.f32.mxu1 %v280_v25 }
  0x90   : > { %1464 = vmatmul.mubr.f32.gmra.mxu0 %v265_v26  ;;  %1488 = vmatmul.mubr.f32.gmra.mxu1 %v281_v27 }
  0x91   : > { %1466 = vmatprep.mubr.f32.mxu0 %v266_v28  ;;  %1490 = vmatprep.mubr.f32.mxu1 %v282_v29 }
  0x94   : > { %1467 = vmatmul.mubr.f32.gmra.mxu0 %v267_v30  ;;  %1491 = vmatmul.mubr.f32.gmra.mxu1 %v283_v31 }
  0x95   : > { %1469 = vmatprep.mubr.f32.mxu0 %v268_v32  ;;  %1493 = vmatprep.mubr.f32.mxu1 %v284_v33 }
  0x98   : > { %1470 = vmatmul.mubr.f32.gmra.mxu0 %v269_v34  ;;  %1494 = vmatmul.mubr.f32.gmra.mxu1 %v285_v35 }
  0x99   : > { %1472 = vmatprep.mubr.f32.mxu0 %v270_v36  ;;  %1496 = vmatprep.mubr.f32.mxu1 %v286_v37 }
  0x9c   : > { %1473 = vmatmul.mubr.f32.gmra.mxu0 %v271_v38  ;;  %1497 = vmatmul.mubr.f32.gmra.mxu1 %v287_v39 }
  0x9d   : > { %1475 = vmatprep.mubr.f32.mxu0 %v272_v40  ;;  %1499 = vmatprep.mubr.f32.mxu1 %v288_v41 }
  0xa0   : > { %1476 = vmatmul.mubr.f32.gmra.mxu0 %v273_v42  ;;  %1500 = vmatmul.mubr.f32.gmra.mxu1 %v289_v43 }
  0xa1   : > { %1478 = vmatprep.mubr.f32.mxu0 %v274_v44  ;;  %1502 = vmatprep.mubr.f32.mxu1 %v290_v45 }
  0xa4   : > { %1479 = vmatmul.mubr.f32.gmra.mxu0 %v275_v46  ;;  %1503 = vmatmul.mubr.f32.gmra.mxu1 %v291_v47 }
 0x148   : > { %v1459_v49 = vpop.f32.mrf.mxu0  ;;  %v1483_v50 = vpop.f32.mrf.mxu1 }
 0x149   : > { %v387_v51 = vadd.f32 %v1459_v49, %v2060_v48  ;;  %v467_v52 = vadd.f32 %v1483_v50, %v2060_v48 }
 0x14a   : > { %v381_v53 = vpop.f32.mrf.mxu0  ;;  %v461_v54 = vpop.f32.mrf.mxu1 }
 0x14b   : > { %v573_v55 = vmul.f32 0.70710677, %v387_v51  ;;  %v589_v56 = vmul.f32 0.70710677, %v467_v52  ;;  %v382_v57 = vadd.f32 %v2060_v48, %v381_v53  ;;  %v462_v58 = vadd.f32 %v2060_v48, %v461_v54 }
 0x14c   : > { %v1462_v59 = vpop.f32.mrf.mxu0  ;;  %v1486_v62 = vpop.f32.mrf.mxu1  ;;  %v541_v12 = vmul.f32 0.5, %v387_v51  ;;  %v557_v14 = vmul.f32 0.5, %v467_v52 }
 0x14d   : > { %1598 = verf.f32 %v573_v55  ;;  %v572_v60 = vmul.f32 0.70710677, %v382_v57  ;;  %v397_v61 = vadd.f32 %v1462_v59, %v2060_v48  ;;  %v588_v63 = vmul.f32 0.70710677, %v462_v58 }
 0x14e   : > { %1600 = verf.f32 %v589_v56  ;;  %v391_v0 = vpop.f32.mrf.mxu0  ;;  %v477_v2 = vadd.f32 %v1486_v62, %v2060_v48  ;;  %v471_v3 = vpop.f32.mrf.mxu1  ;;  %v540_v23 = vmul.f32 0.5, %v382_v57  ;;  %v556_v31 = vmul.f32 0.5, %v462_v58 }
 0x14f   : > { %1602 = verf.f32 %v572_v60  ;;  %v575_v1 = vmul.f32 0.70710677, %v397_v61  ;;  %v2069_v4 = vadd.f32 %v2060_v48, %v391_v0  ;;  %v2072_v5 = vadd.f32 %v2060_v48, %v471_v3 }
 0x150   : > { %1604 = verf.f32 %v588_v63  ;;  %v591_v6 = vmul.f32 0.70710677, %v477_v2  ;;  %v1465_v10 = vpop.f32.mrf.mxu0  ;;  %v1489_v20 = vpop.f32.mrf.mxu1  ;;  %v543_v40 = vmul.f32 0.5, %v397_v61  ;;  %v559_v50 = vmul.f32 0.5, %v477_v2 }
 0x151   : > { %1606 = verf.f32 %v575_v1  ;;  %v574_v7 = vmul.f32 0.70710677, %v2069_v4  ;;  %v590_v8 = vmul.f32 0.70710677, %v2072_v5  ;;  %v407_v27 = vadd.f32 %v1465_v10, %v2060_v48 }
 0x152   : > { %1608 = verf.f32 %v591_v6  ;;  %v401_v19 = vpop.f32.mrf.mxu0  ;;  %v481_v28 = vpop.f32.mrf.mxu1  ;;  %v2095_v36 = vadd.f32 %v1489_v20, %v2060_v48  ;;  %v542_v57 = vmul.f32 0.5, %v2069_v4  ;;  %v558_v58 = vmul.f32 0.5, %v2072_v5 }
 0x153   : > { %1610 = verf.f32 %v574_v7  ;;  %v402_v24 = vadd.f32 %v2060_v48, %v401_v19  ;;  %v2090_v33 = vadd.f32 %v2060_v48, %v481_v28  ;;  %v577_v35 = vmul.f32 0.70710677, %v407_v27 }
 0x154   : > { %1612 = verf.f32 %v590_v8  ;;  %v593_v45 = vmul.f32 0.70710677, %v2095_v36  ;;  %v1468_v46 = vpop.f32.mrf.mxu0  ;;  %v1492_v55 = vpop.f32.mrf.mxu1  ;;  %v545_v8 = vmul.f32 0.5, %v407_v27 }
 0x155   : > { %v576_v32 = vmul.f32 0.70710677, %v402_v24  ;;  %v592_v42 = vmul.f32 0.70710677, %v2090_v33  ;;  %v417_v62 = vadd.f32 %v1468_v46, %v2060_v48  ;;  %v2128_v5 = vadd.f32 %v1492_v55, %v2060_v48 }
 0x156   : > { %v411_v54 = vpop.f32.mrf.mxu0  ;;  %v491_v63 = vpop.f32.mrf.mxu1  ;;  %v560_v20 = vmul.f32 0.5, %v2090_v33 }
 0x157   : > { %1614 = verf.f32 %v576_v32  ;;  %v412_v59 = vadd.f32 %v2060_v48, %v411_v54  ;;  %v2123_v1 = vadd.f32 %v2060_v48, %v491_v63  ;;  %v579_v4 = vmul.f32 0.70710677, %v417_v62 }
 0x158   : > { %1616 = verf.f32 %v577_v35  ;;  %v1495_v27 = vpop.f32.mrf.mxu1  ;;  %v563_v63 = vmul.f32 0.5, %v2128_v5 }
 0x159   : > { %1618 = verf.f32 %v592_v42  ;;  %v578_v0 = vmul.f32 0.70710677, %v412_v59  ;;  %v594_v10 = vmul.f32 0.70710677, %v2123_v1 }
 0x15a   : > { %v1599_v9 = vpop.eup %1598  ;;  %1620 = verf.f32 %v593_v45  ;;  %v501_v33 = vpop.f32.mrf.mxu1  ;;  %v546_v45 = vmul.f32 0.5, %v412_v59 }
 0x15b   : > { %v1601_v11 = vpop.eup %1600  ;;  %v637_v13 = vadd.f32 1.0, %v1599_v9  ;;  %v544_v9 = vmul.f32 0.5, %v402_v24  ;;  %1622 = verf.f32 %v578_v0  ;;  %v561_v24 = vmul.f32 0.5, %v2095_v36 }
 0x15c   : > { %v653_v15 = vadd.f32 1.0, %v1601_v11  ;;  %v1603_v16 = vpop.eup %1602  ;;  %1624 = verf.f32 %v579_v4 }
 0x15d   : > { %v2076_v17 = vmul.f32 %v637_v13, %v541_v12  ;;  %v1605_v18 = vpop.eup %1604  ;;  %v636_v22 = vadd.f32 1.0, %v1603_v16  ;;  %1626 = verf.f32 %v594_v10 }
 0x15e   : > { %v2078_v21 = vmul.f32 %v653_v15, %v557_v14  ;;  %v652_v26 = vadd.f32 1.0, %v1605_v18  ;;  %v1607_v30 = vpop.eup %1606  ;;  %v595_v14 = vmul.f32 0.70710677, %v2128_v5  ;;  %v1471_v15 = vpop.f32.mrf.mxu0 }
 0x15f   : > { %702 = vadd.xlane.f32.xlu0 %v2076_v17  ;;  %v2083_v25 = vmul.f32 %v636_v22, %v540_v23  ;;  %v765_v29 = vmul.f32 %v2076_v17, %v2076_v17  ;;  %v639_v38 = vadd.f32 1.0, %v1607_v30  ;;  %v1609_v39 = vpop.eup %1608  ;;  %v427_v32 = vadd.f32 %v1471_v15, %v2060_v48 }
 0x160   : > { %734 = vadd.xlane.f32.xlu1 %v2078_v21  ;;  %v2092_v34 = vmul.f32 %v652_v26, %v556_v31  ;;  %v781_v37 = vmul.f32 %v2078_v21, %v2078_v21  ;;  %v1611_v41 = vpop.eup %1610  ;;  %v655_v49 = vadd.f32 1.0, %v1609_v39  ;;  %1628 = verf.f32 %v595_v14  ;;  %v421_v26 = vpop.f32.mrf.mxu0 }
 0x161   : > { %v764_v43 = vmul.f32 %v2083_v25, %v2083_v25  ;;  %v1613_v44 = vpop.eup %1612  ;;  %v2104_v47 = vmul.f32 %v639_v38, %v543_v40  ;;  %v638_v52 = vadd.f32 1.0, %v1611_v41  ;;  %v422_v30 = vadd.f32 %v2060_v48, %v421_v26 }
 0x162   : > { %v780_v51 = vmul.f32 %v2092_v34, %v2092_v34  ;;  %v654_v53 = vadd.f32 1.0, %v1613_v44  ;;  %v2109_v56 = vmul.f32 %v655_v49, %v559_v50  ;;  %v581_v40 = vmul.f32 0.70710677, %v427_v32 }
 0x163   : > { %700 = vadd.xlane.f32.xlu0 %v2083_v25  ;;  %v2115_v60 = vmul.f32 %v638_v52, %v542_v57  ;;  %v767_v6 = vmul.f32 %v2104_v47, %v2104_v47  ;;  %v580_v36 = vmul.f32 0.70710677, %v422_v30  ;;  %v2160_v41 = vadd.f32 %v1495_v27, %v2060_v48 }
 0x164   : > { %798 = vadd.xlane.f32.xlu1 %v765_v29  ;;  %v2117_v61 = vmul.f32 %v654_v53, %v558_v58  ;;  %v1615_v3 = vpop.eup %1614  ;;  %v783_v16 = vmul.f32 %v2109_v56, %v2109_v56  ;;  %v547_v44 = vmul.f32 0.5, %v417_v62  ;;  %v1474_v53 = vpop.f32.mrf.mxu0  ;;  %v562_v58 = vmul.f32 0.5, %v2123_v1 }
 0x165   : > { %v766_v2 = vmul.f32 %v2115_v60, %v2115_v60  ;;  %v1617_v7 = vpop.eup %1616  ;;  %v640_v12 = vadd.f32 1.0, %v1615_v3  ;;  %1630 = verf.f32 %v580_v36  ;;  %v597_v52 = vmul.f32 0.70710677, %v2160_v41 }
 0x166   : > { %v782_v11 = vmul.f32 %v2117_v61, %v2117_v61  ;;  %v1619_v13 = vpop.eup %1618  ;;  %v641_v18 = vadd.f32 1.0, %v1617_v7  ;;  %1632 = verf.f32 %v581_v40  ;;  %v431_v0 = vpop.f32.mrf.mxu0  ;;  %v437_v1 = vadd.f32 %v1474_v53, %v2060_v48 }
 0x167   : > { %732 = vadd.xlane.f32.xlu0 %v2092_v34  ;;  %v1621_v19 = vpop.eup %1620  ;;  %v2139_v22 = vmul.f32 %v640_v12, %v544_v9  ;;  %v656_v23 = vadd.f32 1.0, %v1619_v13  ;;  %v565_v40 = vmul.f32 0.5, %v2160_v41 }
 0x168   : > { %830 = vadd.xlane.f32.xlu1 %v781_v37  ;;  %v2142_v28 = vmul.f32 %v641_v18, %v545_v8  ;;  %v657_v29 = vadd.f32 1.0, %v1621_v19  ;;  %v2155_v37 = vadd.f32 %v2060_v48, %v501_v33  ;;  %v1623_v39 = vpop.eup %1622  ;;  %v583_v13 = vmul.f32 0.70710677, %v437_v1 }
 0x169   : > { %v2147_v31 = vmul.f32 %v656_v23, %v560_v20  ;;  %v768_v38 = vmul.f32 %v2139_v22, %v2139_v22  ;;  %v642_v50 = vadd.f32 1.0, %v1623_v39  ;;  %v549_v18 = vmul.f32 0.5, %v427_v32 }
 0x16a   : > { %v2150_v35 = vmul.f32 %v657_v29, %v561_v24  ;;  %v769_v42 = vmul.f32 %v2142_v28, %v2142_v28  ;;  %v596_v46 = vmul.f32 0.70710677, %v2155_v37  ;;  %v548_v19 = vmul.f32 0.5, %v422_v30  ;;  %v1477_v29 = vpop.f32.mrf.mxu0 }
 0x16b   : > { %796 = vadd.xlane.f32.xlu0 %v764_v43  ;;  %v1625_v43 = vpop.eup %1624  ;;  %v784_v49 = vmul.f32 %v2147_v31, %v2147_v31  ;;  %v2171_v59 = vmul.f32 %v642_v50, %v546_v45  ;;  %v564_v30 = vmul.f32 0.5, %v2155_v37  ;;  %v447_v37 = vadd.f32 %v1477_v29, %v2060_v48 }
 0x16c   : > { %706 = vadd.xlane.f32.xlu1 %v2104_v47  ;;  %v785_v54 = vmul.f32 %v2150_v35, %v2150_v35  ;;  %v643_v55 = vadd.f32 1.0, %v1625_v43  ;;  %1634 = verf.f32 %v596_v46 }
 0x16d   : > { %1636 = verf.f32 %v597_v52 }
 0x16e   : > { %v2174_v3 = vmul.f32 %v643_v55, %v547_v44  ;;  %v585_v55 = vmul.f32 0.70710677, %v447_v37 }
 0x16f   : > { %828 = vadd.xlane.f32.xlu0 %v780_v51  ;;  %v1627_v51 = vpop.eup %1626 }
 0x170   : > { %738 = vadd.xlane.f32.xlu1 %v2109_v56  ;;  %v1629_v57 = vpop.eup %1628  ;;  %v658_v62 = vadd.f32 1.0, %v1627_v51  ;;  %v771_v15 = vmul.f32 %v2174_v3, %v2174_v3 }
 0x171   : > { %v659_v4 = vadd.f32 1.0, %v1629_v57 }
 0x172   : > { %v2179_v7 = vmul.f32 %v658_v62, %v562_v58  ;;  %v1631_v12 = vpop.eup %1630 }
 0x173   : > { %736 = vadd.xlane.f32.xlu0 %v2117_v61  ;;  %v2182_v9 = vmul.f32 %v659_v4, %v563_v63  ;;  %v644_v24 = vadd.f32 1.0, %v1631_v12  ;;  %v551_v63 = vmul.f32 0.5, %v437_v1 }
 0x174   : > { %704 = vadd.xlane.f32.xlu1 %v2115_v60  ;;  %v786_v23 = vmul.f32 %v2179_v7, %v2179_v7 }
 0x175   : > { %v787_v33 = vmul.f32 %v2182_v9, %v2182_v9  ;;  %v2203_v32 = vmul.f32 %v644_v24, %v548_v19 }
 0x177   : > { %800 = vadd.xlane.f32.xlu0 %v766_v2  ;;  %v1498_v2 = vpop.f32.mrf.mxu1  ;;  %v772_v53 = vmul.f32 %v2203_v32, %v2203_v32 }
 0x178   : > { %802 = vadd.xlane.f32.xlu1 %v767_v6  ;;  %v432_v6 = vadd.f32 %v2060_v48, %v431_v0  ;;  %v2192_v14 = vadd.f32 %v1498_v2, %v2060_v48 }
 0x179   : > { %v511_v8 = vpop.f32.mrf.mxu1 }
 0x17a   : > { %v582_v5 = vmul.f32 0.70710677, %v432_v6  ;;  %v2187_v10 = vadd.f32 %v2060_v48, %v511_v8  ;;  %v599_v27 = vmul.f32 0.70710677, %v2192_v14  ;;  %v550_v0 = vmul.f32 0.5, %v432_v6 }
 0x17b   : > { %832 = vadd.xlane.f32.xlu0 %v782_v11  ;;  %v770_v11 = vmul.f32 %v2171_v59, %v2171_v59  ;;  %v1501_v43 = vpop.f32.mrf.mxu1  ;;  %v567_v19 = vmul.f32 0.5, %v2192_v14 }
 0x17c   : > { %834 = vadd.xlane.f32.xlu1 %v783_v16  ;;  %v1633_v16 = vpop.eup %1632  ;;  %1638 = verf.f32 %v582_v5  ;;  %v598_v20 = vmul.f32 0.70710677, %v2187_v10  ;;  %v2224_v57 = vadd.f32 %v1501_v43, %v2060_v48  ;;  %v566_v6 = vmul.f32 0.5, %v2187_v10 }
 0x17d   : > { %v1635_v26 = vpop.eup %1634  ;;  %1640 = verf.f32 %v583_v13  ;;  %v645_v36 = vadd.f32 1.0, %v1633_v16  ;;  %v521_v50 = vpop.f32.mrf.mxu1 }
 0x17e   : > { %1642 = verf.f32 %v598_v20  ;;  %v660_v39 = vadd.f32 1.0, %v1635_v26  ;;  %v2219_v52 = vadd.f32 %v2060_v48, %v521_v50  ;;  %v553_v50 = vmul.f32 0.5, %v447_v37 }
 0x17f   : > { %708 = vadd.xlane.f32.xlu0 %v2139_v22  ;;  %1644 = verf.f32 %v599_v27  ;;  %v2206_v44 = vmul.f32 %v645_v36, %v549_v18 }
 0x180   : > { %710 = vadd.xlane.f32.xlu1 %v2142_v28  ;;  %v600_v2 = vmul.f32 0.70710677, %v2219_v52  ;;  %v568_v37 = vmul.f32 0.5, %v2219_v52 }
 0x181   : > { %v773_v58 = vmul.f32 %v2206_v44, %v2206_v44 }
 0x183   : > { %740 = vadd.xlane.f32.xlu0 %v2147_v31 }
 0x184   : > { %742 = vadd.xlane.f32.xlu1 %v2150_v35 }
 0x187   : > { %804 = vadd.xlane.f32.xlu0 %v768_v38  ;;  %v1637_v38 = vpop.eup %1636 }
 0x188   : > { %806 = vadd.xlane.f32.xlu1 %v769_v42  ;;  %v441_v42 = vpop.f32.mrf.mxu0  ;;  %v661_v45 = vadd.f32 1.0, %v1637_v38 }
 0x189   : > { %v442_v46 = vadd.f32 %v2060_v48, %v441_v42 }
 0x18a   : > { %v2214_v51 = vmul.f32 %v661_v45, %v565_v40  ;;  %v1480_v12 = vpop.f32.mrf.mxu0 }
 0x18b   : > { %836 = vadd.xlane.f32.xlu0 %v784_v49  ;;  %v2211_v49 = vmul.f32 %v660_v39, %v564_v30  ;;  %v584_v41 = vmul.f32 0.70710677, %v442_v46  ;;  %v457_v10 = vadd.f32 %v1480_v12, %v2060_v48 }
 0x18c   : > { %838 = vadd.xlane.f32.xlu1 %v785_v54  ;;  %v1639_v54 = vpop.eup %1638  ;;  %v789_v13 = vmul.f32 %v2214_v51, %v2214_v51  ;;  %v451_v20 = vpop.f32.mrf.mxu0 }
 0x18d   : > { %v1641_v62 = vpop.eup %1640  ;;  %1646 = verf.f32 %v584_v41  ;;  %v788_v4 = vmul.f32 %v2211_v49, %v2211_v49  ;;  %v646_v8 = vadd.f32 1.0, %v1639_v54  ;;  %v452_v27 = vadd.f32 %v2060_v48, %v451_v20 }
 0x18e   : > { %v1643_v5 = vpop.eup %1642  ;;  %1648 = verf.f32 %v585_v55  ;;  %v587_v40 = vmul.f32 0.70710677, %v457_v10  ;;  %v552_v41 = vmul.f32 0.5, %v442_v46  ;;  %v555_v20 = vmul.f32 0.5, %v457_v10 }
 0x18f   : > { %712 = vadd.xlane.f32.xlu0 %v2171_v59  ;;  %v1645_v16 = vpop.eup %1644  ;;  %1650 = verf.f32 %v600_v2  ;;  %v2235_v1 = vmul.f32 %v646_v8, %v550_v0  ;;  %v662_v18 = vadd.f32 1.0, %v1643_v5  ;;  %v586_v14 = vmul.f32 0.70710677, %v452_v27 }
 0x190   : > { %714 = vadd.xlane.f32.xlu1 %v2174_v3  ;;  %v663_v26 = vadd.f32 1.0, %v1645_v16  ;;  %v554_v16 = vmul.f32 0.5, %v452_v27 }
 0x191   : > { %v2243_v29 = vmul.f32 %v662_v18, %v566_v6  ;;  %v774_v30 = vmul.f32 %v2235_v1, %v2235_v1 }
 0x192   : > { %v2246_v36 = vmul.f32 %v663_v26, %v567_v19 }
 0x193   : > { %744 = vadd.xlane.f32.xlu0 %v2179_v7  ;;  %v790_v54 = vmul.f32 %v2243_v29, %v2243_v29 }
 0x194   : > { %746 = vadd.xlane.f32.xlu1 %v2182_v9 }
 0x197   : > { %808 = vadd.xlane.f32.xlu0 %v770_v11  ;;  %v601_v11 = vmul.f32 0.70710677, %v2224_v57 }
 0x198   : > { %810 = vadd.xlane.f32.xlu1 %v771_v15  ;;  %v647_v15 = vadd.f32 1.0, %v1641_v62 }
 0x199   : > { %1652 = verf.f32 %v601_v11 }
 0x19a   : > { %v2238_v24 = vmul.f32 %v647_v15, %v551_v63  ;;  %v1647_v39 = vpop.eup %1646  ;;  %1654 = verf.f32 %v586_v14 }
 0x19b   : > { %840 = vadd.xlane.f32.xlu0 %v786_v23  ;;  %v1504_v23 = vpop.f32.mrf.mxu1  ;;  %v1649_v45 = vpop.eup %1648  ;;  %v648_v55 = vadd.f32 1.0, %v1647_v39  ;;  %1656 = verf.f32 %v587_v40 }
 0x19c   : > { %842 = vadd.xlane.f32.xlu1 %v787_v33  ;;  %v537_v42 = vadd.f32 %v1504_v23, %v2060_v48  ;;  %v775_v43 = vmul.f32 %v2238_v24, %v2238_v24  ;;  %v649_v63 = vadd.f32 1.0, %v1649_v45 }
 0x19d   : > { %v531_v33 = vpop.f32.mrf.mxu1  ;;  %v2261_v46 = vmul.f32 %v648_v55, %v552_v41 }
 0x19e   : > { %v532_v38 = vadd.f32 %v2060_v48, %v531_v33  ;;  %v603_v62 = vmul.f32 0.70710677, %v537_v42  ;;  %v791_v48 = vmul.f32 %v2246_v36, %v2246_v36  ;;  %v2264_v8 = vmul.f32 %v649_v63, %v553_v50 }
 0x19f   : > { %716 = vadd.xlane.f32.xlu0 %v2203_v32  ;;  %v776_v52 = vmul.f32 %v2261_v46, %v2261_v46  ;;  %v571_v40 = vmul.f32 0.5, %v537_v42 }
 0x1a0   : > { %718 = vadd.xlane.f32.xlu1 %v2206_v44  ;;  %v570_v14 = vmul.f32 0.5, %v532_v38 }
 0x1a3   : > { %748 = vadd.xlane.f32.xlu0 %v2211_v49 }
 0x1a4   : > { %750 = vadd.xlane.f32.xlu1 %v2214_v51 }
 0x1a7   : > { %812 = vadd.xlane.f32.xlu0 %v772_v53  ;;  %v602_v53 = vmul.f32 0.70710677, %v532_v38 }
 0x1a8   : > { %814 = vadd.xlane.f32.xlu1 %v773_v58  ;;  %v1651_v58 = vpop.eup %1650 }
 0x1a9   : > { %v1653_v0 = vpop.eup %1652  ;;  %1658 = verf.f32 %v602_v53  ;;  %v664_v2 = vadd.f32 1.0, %v1651_v58 }
 0x1aa   : > { %1660 = verf.f32 %v603_v62  ;;  %v665_v5 = vadd.f32 1.0, %v1653_v0 }
 0x1ab   : > { %844 = vadd.xlane.f32.xlu0 %v788_v4  ;;  %v569_v4 = vmul.f32 0.5, %v2224_v57  ;;  %v2268_v11 = vmul.f32 %v664_v2, %v568_v37  ;;  %v1655_v57 = vpop.eup %1654 }
 0x1ac   : > { %846 = vadd.xlane.f32.xlu1 %v789_v13  ;;  %v777_v13 = vmul.f32 %v2264_v8, %v2264_v8  ;;  %v1657_v15 = vpop.eup %1656  ;;  %v650_v18 = vadd.f32 1.0, %v1655_v57 }
 0x1ad   : > { %v2270_v12 = vmul.f32 %v665_v5, %v569_v4  ;;  %v792_v6 = vmul.f32 %v2268_v11, %v2268_v11  ;;  %v651_v26 = vadd.f32 1.0, %v1657_v15 }
 0x1af   : > { %720 = vadd.xlane.f32.xlu0 %v2235_v1  ;;  %v793_v23 = vmul.f32 %v2270_v12, %v2270_v12 }
 0x1b0   : > { %722 = vadd.xlane.f32.xlu1 %v2238_v24 }
 0x1b3   : > { %752 = vadd.xlane.f32.xlu0 %v2243_v29 }
 0x1b4   : > { %754 = vadd.xlane.f32.xlu1 %v2246_v36 }
 0x1b6   : > { %v1659_v19 = vpop.eup %1658 }
 0x1b7   : > { %816 = vadd.xlane.f32.xlu0 %v774_v30  ;;  %v1661_v33 = vpop.eup %1660  ;;  %v2282_v30 = vmul.f32 %v650_v18, %v554_v16  ;;  %v666_v39 = vadd.f32 1.0, %v1659_v19 }
 0x1b8   : > { %818 = vadd.xlane.f32.xlu1 %v775_v43  ;;  %v2284_v43 = vmul.f32 %v651_v26, %v555_v20  ;;  %v667_v27 = vadd.f32 1.0, %v1661_v33 }
 0x1b9   : > { %v2288_v10 = vmul.f32 %v666_v39, %v570_v14  ;;  %v778_v38 = vmul.f32 %v2282_v30, %v2282_v30 }
 0x1ba   : > { %v2290_v45 = vmul.f32 %v667_v27, %v571_v40  ;;  %v779_v42 = vmul.f32 %v2284_v43, %v2284_v43 }
 0x1bb   : > { %848 = vadd.xlane.f32.xlu0 %v790_v54  ;;  %v794_v50 = vmul.f32 %v2288_v10, %v2288_v10 }
 0x1bc   : > { %850 = vadd.xlane.f32.xlu1 %v791_v48  ;;  %v795_v41 = vmul.f32 %v2290_v45, %v2290_v45 }
 0x1bf   : > { %724 = vadd.xlane.f32.xlu0 %v2261_v46 }
 0x1c0   : > { %726 = vadd.xlane.f32.xlu1 %v2264_v8 }
 0x1c3   : > { %756 = vadd.xlane.f32.xlu0 %v2268_v11 }
 0x1c4   : > { %758 = vadd.xlane.f32.xlu1 %v2270_v12 }
 0x1c7   : > { %820 = vadd.xlane.f32.xlu0 %v776_v52 }
 0x1c8   : > { %822 = vadd.xlane.f32.xlu1 %v777_v13 }
 0x1cb   : > { %852 = vadd.xlane.f32.xlu0 %v792_v6 }
 0x1cc   : > { %854 = vadd.xlane.f32.xlu1 %v793_v23 }
 0x1cf   : > { %728 = vadd.xlane.f32.xlu0 %v2282_v30 }
 0x1d0   : > { %730 = vadd.xlane.f32.xlu1 %v2284_v43 }
 0x1d3   : > { %760 = vadd.xlane.f32.xlu0 %v2288_v10 }
 0x1d4   : > { %762 = vadd.xlane.f32.xlu1 %v2290_v45 }
 0x1d7   : > { %824 = vadd.xlane.f32.xlu0 %v778_v38 }
 0x1d8   : > { %826 = vadd.xlane.f32.xlu1 %v779_v42 }
 0x1db   : > { %856 = vadd.xlane.f32.xlu0 %v794_v50 }
 0x1dc   : > { %858 = vadd.xlane.f32.xlu1 %v795_v41 }
 0x1e8   : > { %v703_v53 = vpop.xlane.xlu0 %702 }
 0x1e9   : > { %v735_v54 = vpop.xlane.xlu1 %734  ;;  %v862_v55 = vmul.f32 0.0078125, %v703_v53 }
 0x1ea   : > { %v2302_v48 = vmul.f32 0.0078125, %v735_v54 }
 0x1eb   : > { %v926_v63 = vmul.f32 %v862_v55, %v862_v55 }
 0x1ec   : > { %v701_v58 = vpop.xlane.xlu0 %700  ;;  %v942_v52 = vmul.f32 %v2302_v48, %v2302_v48 }
 0x1ed   : > { %v799_v62 = vpop.xlane.xlu1 %798  ;;  %v2304_v4 = vmul.f32 0.0078125, %v701_v58 }
 0x1ee   : > { %v894_v0 = vmul.f32 0.0078125, %v799_v62 }
 0x1ef   : > { %v925_v18 = vmul.f32 %v2304_v4, %v2304_v4 }
 0x1f0   : > { %v958_v37 = vsub.f32 %v894_v0, %v926_v63  ;;  %v733_v2 = vpop.xlane.xlu0 %732 }
 0x1f1   : > { %v831_v5 = vpop.xlane.xlu1 %830  ;;  %v2310_v19 = vmul.f32 0.0078125, %v733_v2 }
 0x1f2   : > { %v990_v57 = vmax.f32 %v958_v37, 0.0  ;;  %v910_v13 = vmul.f32 0.0078125, %v831_v5 }
 0x1f3   : > { %v941_v40 = vmul.f32 %v2310_v19, %v2310_v19 }
 0x1f4   : > { %v1022_v15 = vadd.f32 1e-12, %v990_v57  ;;  %v974_v16 = vsub.f32 %v910_v13, %v942_v52  ;;  %v797_v6 = vpop.xlane.xlu0 %796  ;;  %v1086_v13 = vsub.f32 %v2076_v17, %v862_v55  ;;  %v2337_v17 = vld [vmem:[%s2653_s4] ss:$0 sm:$0xff] }
 0x1f5   : > { %v707_v20 = vpop.xlane.xlu1 %706  ;;  %v893_v23 = vmul.f32 0.0078125, %v797_v6 }
 0x1f6   : > { %1662 = vrsqrt.f32 %v1022_v15  ;;  %v1006_v26 = vmax.f32 %v974_v16, 0.0  ;;  %v2314_v62 = vmul.f32 0.0078125, %v707_v20  ;;  %v2330_v20 = vld [vmem:[%s2652_s3] ss:$0 sm:$0xff] }
 0x1f7   : > { %v957_v33 = vsub.f32 %v893_v23, %v925_v18 }
 0x1f8   : > { %v1038_v14 = vadd.f32 1e-12, %v1006_v26  ;;  %v829_v39 = vpop.xlane.xlu0 %828  ;;  %v928_v15 = vmul.f32 %v2314_v62, %v2314_v62 }
 0x1f9   : > { %v989_v27 = vmax.f32 %v957_v33, 0.0  ;;  %v739_v38 = vpop.xlane.xlu1 %738  ;;  %v909_v42 = vmul.f32 0.0078125, %v829_v39  ;;  %v1102_v39 = vsub.f32 %v2078_v21, %v2302_v48 }
 0x1fa   : > { %1664 = vrsqrt.f32 %v1038_v14  ;;  %v2325_v16 = vmul.f32 0.0078125, %v739_v38 }
 0x1fb   : > { %v1021_v50 = vadd.f32 1e-12, %v989_v27  ;;  %v973_v41 = vsub.f32 %v909_v42, %v941_v40 }
 0x1fc   : > { %v737_v53 = vpop.xlane.xlu0 %736 }
 0x1fd   : > { %1666 = vrsqrt.f32 %v1021_v50  ;;  %v1005_v54 = vmax.f32 %v973_v41, 0.0  ;;  %v705_v58 = vpop.xlane.xlu1 %704  ;;  %v2320_v5 = vmul.f32 0.0078125, %v737_v53  ;;  %v944_v50 = vmul.f32 %v2325_v16, %v2325_v16 }
 0x1fe   : > { %v2316_v63 = vmul.f32 0.0078125, %v705_v58 }
 0x1ff   : > { %v1037_v0 = vadd.f32 1e-12, %v1005_v54  ;;  %v943_v55 = vmul.f32 %v2320_v5, %v2320_v5 }
 0x200   : > { %v801_v37 = vpop.xlane.xlu0 %800  ;;  %v927_v2 = vmul.f32 %v2316_v63, %v2316_v63 }
 0x201   : > { %1668 = vrsqrt.f32 %v1037_v0  ;;  %v803_v52 = vpop.xlane.xlu1 %802  ;;  %v895_v57 = vmul.f32 0.0078125, %v801_v37 }
 0x202   : > { %v896_v6 = vmul.f32 0.0078125, %v803_v52 }
 0x203   : > { %v1663_v18 = vpop.eup %1662  ;;  %v959_v23 = vsub.f32 %v895_v57, %v927_v2  ;;  %v1085_v57 = vsub.f32 %v2083_v25, %v2304_v4 }
 0x204   : > { %v1118_v26 = vmul.f32 %v1663_v18, %v1086_v13  ;;  %v960_v33 = vsub.f32 %v896_v6, %v928_v15  ;;  %v833_v14 = vpop.xlane.xlu0 %832 }
 0x205   : > { %v991_v40 = vmax.f32 %v959_v23, 0.0  ;;  %v835_v27 = vpop.xlane.xlu1 %834  ;;  %v911_v38 = vmul.f32 0.0078125, %v833_v14 }
 0x206   : > { %v1157_v42 = vmul.f32 %v2330_v20, %v1118_v26  ;;  %v992_v41 = vmax.f32 %v960_v33, 0.0  ;;  %v912_v53 = vmul.f32 0.0078125, %v835_v27 }
 0x207   : > { %v1665_v21 = vpop.eup %1664  ;;  %v1023_v48 = vadd.f32 1e-12, %v991_v40  ;;  %v975_v54 = vsub.f32 %v911_v38, %v943_v55 }
 0x208   : > { %v1196_v58 = vadd.f32 %v2337_v17, %v1157_v42  ;;  %v1134_v0 = vmul.f32 %v1665_v21, %v1102_v39  ;;  %v1024_v37 = vadd.f32 1e-12, %v992_v41  ;;  %v976_v2 = vsub.f32 %v912_v53, %v944_v50  ;;  %v709_v52 = vpop.xlane.xlu0 %708 }
 0x209   : > { %1670 = vrsqrt.f32 %v1023_v48  ;;  %v1007_v13 = vmax.f32 %v975_v54, 0.0  ;;  %v711_v15 = vpop.xlane.xlu1 %710  ;;  %v1101_v39 = vsub.f32 %v2092_v34, %v2310_v19  ;;  %v2357_v40 = vmul.f32 0.0078125, %v709_v52 }
 0x20a   : > { %v1667_v6 = vpop.eup %1666  ;;  %1228 = vst [vmem:[%s2349_s23 + $0x8] sm:$0xff] %v1196_v58  ;;  %v1173_v18 = vmul.f32 %v2330_v20, %v1134_v0  ;;  %1672 = vrsqrt.f32 %v1024_v37  ;;  %v1008_v23 = vmax.f32 %v976_v2, 0.0  ;;  %v2360_v42 = vmul.f32 0.0078125, %v711_v15 }
 0x20b   : > { %v1117_v26 = vmul.f32 %v1667_v6, %v1085_v57  ;;  %v1039_v33 = vadd.f32 1e-12, %v1007_v13  ;;  %v929_v34 = vmul.f32 %v2357_v40, %v2357_v40  ;;  %v1087_v15 = vsub.f32 %v2115_v60, %v2316_v63 }
 0x20c   : > { %v1212_v14 = vadd.f32 %v2337_v17, %v1173_v18  ;;  %v1040_v25 = vadd.f32 1e-12, %v1008_v23  ;;  %v741_v4 = vpop.xlane.xlu0 %740  ;;  %v930_v58 = vmul.f32 %v2360_v42, %v2360_v42 }
 0x20d   : > { %v1156_v55 = vmul.f32 %v2330_v20, %v1117_v26  ;;  %1674 = vrsqrt.f32 %v1039_v33  ;;  %v743_v27 = vpop.xlane.xlu1 %742  ;;  %v2367_v19 = vmul.f32 0.0078125, %v741_v4 }
 0x20e   : > { %v1669_v38 = vpop.eup %1668  ;;  %1244 = vst [vmem:[%s2349_s23 + $0x88] sm:$0xff] %v1212_v14  ;;  %1676 = vrsqrt.f32 %v1040_v25  ;;  %v2371_v0 = vmul.f32 0.0078125, %v743_v27  ;;  %v1088_v14 = vsub.f32 %v2104_v47, %v2314_v62 }
 0x20f   : > { %v1195_v50 = vadd.f32 %v2337_v17, %v1156_v55  ;;  %v1133_v41 = vmul.f32 %v1669_v38, %v1101_v39  ;;  %v945_v6 = vmul.f32 %v2367_v19, %v2367_v19 }
 0x210   : > { %v805_v53 = vpop.xlane.xlu0 %804  ;;  %v946_v25 = vmul.f32 %v2371_v0, %v2371_v0 }
 0x211   : > { %1227 = vst [vmem:[%s2349_s23] sm:$0xff] %v1195_v50  ;;  %v1172_v21 = vmul.f32 %v2330_v20, %v1133_v41  ;;  %v807_v48 = vpop.xlane.xlu1 %806  ;;  %v897_v54 = vmul.f32 0.0078125, %v805_v53 }
 0x212   : > { %v898_v37 = vmul.f32 0.0078125, %v807_v48 }
 0x213   : > { %v1211_v2 = vadd.f32 %v2337_v17, %v1172_v21  ;;  %v961_v52 = vsub.f32 %v897_v54, %v929_v34  ;;  %v1103_v21 = vsub.f32 %v2117_v61, %v2320_v5  ;;  %v1104_v54 = vsub.f32 %v2109_v56, %v2325_v16 }
 0x214   : > { %v962_v57 = vsub.f32 %v898_v37, %v930_v58  ;;  %v837_v13 = vpop.xlane.xlu0 %836 }
 0x215   : > { %1243 = vst [vmem:[%s2349_s23 + $0x80] sm:$0xff] %v1211_v2  ;;  %v993_v18 = vmax.f32 %v961_v52, 0.0  ;;  %v839_v23 = vpop.xlane.xlu1 %838  ;;  %v913_v26 = vmul.f32 0.0078125, %v837_v13 }
 0x216   : > { %v1671_v33 = vpop.eup %1670  ;;  %v994_v4 = vmax.f32 %v962_v57, 0.0  ;;  %v914_v39 = vmul.f32 0.0078125, %v839_v23 }
 0x217   : > { %v1673_v55 = vpop.eup %1672  ;;  %v1119_v27 = vmul.f32 %v1671_v33, %v1087_v15  ;;  %v1025_v38 = vadd.f32 1e-12, %v993_v18  ;;  %v977_v50 = vsub.f32 %v913_v26, %v945_v6 }
 0x218   : > { %v1120_v60 = vmul.f32 %v1673_v55, %v1088_v14  ;;  %v1026_v63 = vadd.f32 1e-12, %v994_v4  ;;  %v978_v41 = vsub.f32 %v914_v39, %v946_v25  ;;  %v713_v53 = vpop.xlane.xlu0 %712 }
 0x219   : > { %v1158_v34 = vmul.f32 %v2330_v20, %v1119_v27  ;;  %1678 = vrsqrt.f32 %v1025_v38  ;;  %v1009_v47 = vmax.f32 %v977_v50, 0.0  ;;  %v715_v62 = vpop.xlane.xlu1 %714  ;;  %v2393_v56 = vmul.f32 0.0078125, %v713_v53 }
 0x21a   : > { %v1675_v48 = vpop.eup %1674  ;;  %v1159_v58 = vmul.f32 %v2330_v20, %v1120_v60  ;;  %1680 = vrsqrt.f32 %v1026_v63  ;;  %v1010_v37 = vmax.f32 %v978_v41, 0.0  ;;  %v2397_v26 = vmul.f32 0.0078125, %v715_v62 }
 0x21b   : > { %v1677_v2 = vpop.eup %1676  ;;  %v1197_v52 = vadd.f32 %v2337_v17, %v1158_v34  ;;  %v1135_v57 = vmul.f32 %v1675_v48, %v1103_v21  ;;  %v1041_v61 = vadd.f32 1e-12, %v1009_v47  ;;  %v931_v4 = vmul.f32 %v2393_v56, %v2393_v56 }
 0x21c   : > { %v1198_v5 = vadd.f32 %v2337_v17, %v1159_v58  ;;  %v1136_v13 = vmul.f32 %v1677_v2, %v1104_v54  ;;  %v1042_v15 = vadd.f32 1e-12, %v1010_v37  ;;  %v745_v6 = vpop.xlane.xlu0 %744  ;;  %v932_v38 = vmul.f32 %v2397_v26, %v2397_v26 }
 0x21d   : > { %1229 = vst [vmem:[%s2349_s23 + $0x10] sm:$0xff] %v1197_v52  ;;  %v1174_v18 = vmul.f32 %v2330_v20, %v1135_v57  ;;  %1682 = vrsqrt.f32 %v1041_v61  ;;  %v747_v16 = vpop.xlane.xlu1 %746  ;;  %v2404_v39 = vmul.f32 0.0078125, %v745_v6  ;;  %v1089_v21 = vsub.f32 %v2139_v22, %v2357_v40 }
 0x21e   : > { %1230 = vst [vmem:[%s2349_s23 + $0x18] sm:$0xff] %v1198_v5  ;;  %v1175_v23 = vmul.f32 %v2330_v20, %v1136_v13  ;;  %1684 = vrsqrt.f32 %v1042_v15  ;;  %v2409_v50 = vmul.f32 0.0078125, %v747_v16  ;;  %v1090_v58 = vsub.f32 %v2142_v28, %v2360_v42 }
 0x21f   : > { %v1213_v33 = vadd.f32 %v2337_v17, %v1174_v18  ;;  %v947_v34 = vmul.f32 %v2404_v39, %v2404_v39  ;;  %v1105_v18 = vsub.f32 %v2147_v31, %v2367_v19 }
 0x220   : > { %v1214_v14 = vadd.f32 %v2337_v17, %v1175_v23  ;;  %v809_v25 = vpop.xlane.xlu0 %808  ;;  %v948_v37 = vmul.f32 %v2409_v50, %v2409_v50 }
 0x221   : > { %1245 = vst [vmem:[%s2349_s23 + $0x90] sm:$0xff] %v1213_v33  ;;  %v811_v55 = vpop.xlane.xlu1 %810  ;;  %v899_v27 = vmul.f32 0.0078125, %v809_v25  ;;  %v1106_v33 = vsub.f32 %v2150_v35, %v2371_v0 }
 0x222   : > { %1246 = vst [vmem:[%s2349_s23 + $0x98] sm:$0xff] %v1214_v14  ;;  %v900_v60 = vmul.f32 0.0078125, %v811_v55 }
 0x223   : > { %v963_v63 = vsub.f32 %v899_v27, %v931_v4 }
 0x224   : > { %v964_v41 = vsub.f32 %v900_v60, %v932_v38  ;;  %v841_v53 = vpop.xlane.xlu0 %840 }
 0x225   : > { %v995_v47 = vmax.f32 %v963_v63, 0.0  ;;  %v843_v62 = vpop.xlane.xlu1 %842  ;;  %v915_v48 = vmul.f32 0.0078125, %v841_v53 }
 0x226   : > { %v1679_v54 = vpop.eup %1678  ;;  %v996_v2 = vmax.f32 %v964_v41, 0.0  ;;  %v916_v52 = vmul.f32 0.0078125, %v843_v62 }
 0x227   : > { %v1681_v57 = vpop.eup %1680  ;;  %v1121_v61 = vmul.f32 %v1679_v54, %v1089_v21  ;;  %v1027_v5 = vadd.f32 1e-12, %v995_v47  ;;  %v979_v13 = vsub.f32 %v915_v48, %v947_v34 }
 0x228   : > { %v1122_v22 = vmul.f32 %v1681_v57, %v1090_v58  ;;  %v1028_v40 = vadd.f32 1e-12, %v996_v2  ;;  %v980_v15 = vsub.f32 %v916_v52, %v948_v37  ;;  %v717_v6 = vpop.xlane.xlu0 %716 }
 0x229   : > { %v1160_v16 = vmul.f32 %v2330_v20, %v1121_v61  ;;  %1686 = vrsqrt.f32 %v1027_v5  ;;  %v1011_v28 = vmax.f32 %v979_v13, 0.0  ;;  %v719_v42 = vpop.xlane.xlu1 %718  ;;  %v2429_v35 = vmul.f32 0.0078125, %v717_v6 }
 0x22a   : > { %v1683_v23 = vpop.eup %1682  ;;  %v1161_v14 = vmul.f32 %v2330_v20, %v1122_v22  ;;  %1688 = vrsqrt.f32 %v1028_v40  ;;  %v1012_v25 = vmax.f32 %v980_v15, 0.0  ;;  %v2433_v21 = vmul.f32 0.0078125, %v719_v42 }
 0x22b   : > { %v1685_v4 = vpop.eup %1684  ;;  %v1199_v55 = vadd.f32 %v2337_v17, %v1160_v16  ;;  %v1137_v27 = vmul.f32 %v1683_v23, %v1105_v18  ;;  %v1043_v31 = vadd.f32 1e-12, %v1011_v28  ;;  %v933_v48 = vmul.f32 %v2429_v35, %v2429_v35 }
 0x22c   : > { %v1200_v19 = vadd.f32 %v2337_v17, %v1161_v14  ;;  %v1138_v38 = vmul.f32 %v1685_v4, %v1106_v33  ;;  %v1044_v60 = vadd.f32 1e-12, %v1012_v25  ;;  %v749_v63 = vpop.xlane.xlu0 %748  ;;  %v934_v2 = vmul.f32 %v2433_v21, %v2433_v21 }
 0x22d   : > { %1231 = vst [vmem:[%s2349_s23 + $0x20] sm:$0xff] %v1199_v55  ;;  %v1176_v41 = vmul.f32 %v2330_v20, %v1137_v27  ;;  %1690 = vrsqrt.f32 %v1043_v31  ;;  %v751_v0 = vpop.xlane.xlu1 %750  ;;  %v2440_v54 = vmul.f32 0.0078125, %v749_v63  ;;  %v1091_v22 = vsub.f32 %v2171_v59, %v2393_v56 }
 0x22e   : > { %1232 = vst [vmem:[%s2349_s23 + $0x28] sm:$0xff] %v1200_v19  ;;  %v1177_v53 = vmul.f32 %v2330_v20, %v1138_v38  ;;  %1692 = vrsqrt.f32 %v1044_v60  ;;  %v2445_v52 = vmul.f32 0.0078125, %v751_v0  ;;  %v1092_v28 = vsub.f32 %v2174_v3, %v2397_v26 }
 0x22f   : > { %v1215_v34 = vadd.f32 %v2337_v17, %v1176_v41  ;;  %v949_v40 = vmul.f32 %v2440_v54, %v2440_v54  ;;  %v1107_v19 = vsub.f32 %v2179_v7, %v2404_v39  ;;  %v1108_v63 = vsub.f32 %v2182_v9, %v2409_v50 }
 0x230   : > { %v1216_v47 = vadd.f32 %v2337_v17, %v1177_v53  ;;  %v813_v62 = vpop.xlane.xlu0 %812  ;;  %v950_v42 = vmul.f32 %v2445_v52, %v2445_v52 }
 0x231   : > { %1247 = vst [vmem:[%s2349_s23 + $0xa0] sm:$0xff] %v1215_v34  ;;  %v815_v58 = vpop.xlane.xlu1 %814  ;;  %v901_v37 = vmul.f32 0.0078125, %v813_v62 }
 0x232   : > { %1248 = vst [vmem:[%s2349_s23 + $0xa8] sm:$0xff] %v1216_v47  ;;  %v902_v57 = vmul.f32 0.0078125, %v815_v58 }
 0x233   : > { %v965_v61 = vsub.f32 %v901_v37, %v933_v48 }
 0x234   : > { %v966_v5 = vsub.f32 %v902_v57, %v934_v2  ;;  %v845_v13 = vpop.xlane.xlu0 %844 }
 0x235   : > { %v997_v15 = vmax.f32 %v965_v61, 0.0  ;;  %v847_v6 = vpop.xlane.xlu1 %846  ;;  %v917_v18 = vmul.f32 0.0078125, %v845_v13 }
 0x236   : > { %v1687_v16 = vpop.eup %1686  ;;  %v998_v23 = vmax.f32 %v966_v5, 0.0  ;;  %v918_v33 = vmul.f32 0.0078125, %v847_v6 }
 0x237   : > { %v1689_v14 = vpop.eup %1688  ;;  %v1123_v25 = vmul.f32 %v1687_v16, %v1091_v22  ;;  %v1029_v4 = vadd.f32 1e-12, %v997_v15  ;;  %v981_v55 = vsub.f32 %v917_v18, %v949_v40 }
 0x238   : > { %v1124_v59 = vmul.f32 %v1689_v14, %v1092_v28  ;;  %v1030_v56 = vadd.f32 1e-12, %v998_v23  ;;  %v982_v27 = vsub.f32 %v918_v33, %v950_v42  ;;  %v721_v31 = vpop.xlane.xlu0 %720  ;;  %v1093_v14 = vsub.f32 %v2203_v32, %v2429_v35 }
 0x239   : > { %v1162_v38 = vmul.f32 %v2330_v20, %v1123_v25  ;;  %1694 = vrsqrt.f32 %v1029_v4  ;;  %v1013_v3 = vmax.f32 %v981_v55, 0.0  ;;  %v723_v26 = vpop.xlane.xlu1 %722  ;;  %v2465_v9 = vmul.f32 0.0078125, %v721_v31 }
 0x23a   : > { %v1691_v60 = vpop.eup %1690  ;;  %v1163_v41 = vmul.f32 %v2330_v20, %v1124_v59  ;;  %1696 = vrsqrt.f32 %v1030_v56  ;;  %v1014_v0 = vmax.f32 %v982_v27, 0.0  ;;  %v2469_v57 = vmul.f32 0.0078125, %v723_v26 }
 0x23b   : > { %v1693_v53 = vpop.eup %1692  ;;  %v1201_v34 = vadd.f32 %v2337_v17, %v1162_v38  ;;  %v1139_v47 = vmul.f32 %v1691_v60, %v1107_v19  ;;  %v1045_v7 = vadd.f32 1e-12, %v1013_v3  ;;  %v935_v22 = vmul.f32 %v2465_v9, %v2465_v9 }
 0x23c   : > { %v1202_v39 = vadd.f32 %v2337_v17, %v1163_v41  ;;  %v1140_v62 = vmul.f32 %v1693_v53, %v1108_v63  ;;  %v1046_v48 = vadd.f32 1e-12, %v1014_v0  ;;  %v753_v58 = vpop.xlane.xlu0 %752  ;;  %v936_v18 = vmul.f32 %v2469_v57, %v2469_v57 }
 0x23d   : > { %1233 = vst [vmem:[%s2349_s23 + $0x30] sm:$0xff] %v1201_v34  ;;  %v1178_v37 = vmul.f32 %v2330_v20, %v1139_v47  ;;  %1698 = vrsqrt.f32 %v1045_v7  ;;  %v755_v50 = vpop.xlane.xlu1 %754  ;;  %v2476_v40 = vmul.f32 0.0078125, %v753_v58  ;;  %v1094_v27 = vsub.f32 %v2206_v44, %v2433_v21 }
 0x23e   : > { %1234 = vst [vmem:[%s2349_s23 + $0x38] sm:$0xff] %v1202_v39  ;;  %v1179_v2 = vmul.f32 %v2330_v20, %v1140_v62  ;;  %1700 = vrsqrt.f32 %v1046_v48  ;;  %v2481_v16 = vmul.f32 0.0078125, %v755_v50  ;;  %v1109_v53 = vsub.f32 %v2211_v49, %v2440_v54 }
 0x23f   : > { %v1217_v61 = vadd.f32 %v2337_v17, %v1178_v37  ;;  %v951_v25 = vmul.f32 %v2476_v40, %v2476_v40  ;;  %v1110_v7 = vsub.f32 %v2214_v51, %v2445_v52 }
 0x240   : > { %v1218_v5 = vadd.f32 %v2337_v17, %v1179_v2  ;;  %v817_v13 = vpop.xlane.xlu0 %816  ;;  %v952_v31 = vmul.f32 %v2481_v16, %v2481_v16 }
 0x241   : > { %1249 = vst [vmem:[%s2349_s23 + $0xb0] sm:$0xff] %v1217_v61  ;;  %v819_v15 = vpop.xlane.xlu1 %818  ;;  %v903_v6 = vmul.f32 0.0078125, %v817_v13 }
 0x242   : > { %1250 = vst [vmem:[%s2349_s23 + $0xb8] sm:$0xff] %v1218_v5  ;;  %v904_v28 = vmul.f32 0.0078125, %v819_v15 }
 0x243   : > { %v967_v42 = vsub.f32 %v903_v6, %v935_v22 }
 0x244   : > { %v968_v23 = vsub.f32 %v904_v28, %v936_v18  ;;  %v849_v33 = vpop.xlane.xlu0 %848 }
 0x245   : > { %v999_v4 = vmax.f32 %v967_v42, 0.0  ;;  %v851_v55 = vpop.xlane.xlu1 %850  ;;  %v919_v59 = vmul.f32 0.0078125, %v849_v33 }
 0x246   : > { %v1695_v56 = vpop.eup %1694  ;;  %v1000_v19 = vmax.f32 %v968_v23, 0.0  ;;  %v920_v38 = vmul.f32 0.0078125, %v851_v55 }
 0x247   : > { %v1697_v3 = vpop.eup %1696  ;;  %v1125_v26 = vmul.f32 %v1695_v56, %v1093_v14  ;;  %v1031_v60 = vadd.f32 1e-12, %v999_v4  ;;  %v983_v63 = vsub.f32 %v919_v59, %v951_v25 }
 0x248   : > { %v1126_v32 = vmul.f32 %v1697_v3, %v1094_v27  ;;  %v1032_v35 = vadd.f32 1e-12, %v1000_v19  ;;  %v984_v41 = vsub.f32 %v920_v38, %v952_v31  ;;  %v725_v0 = vpop.xlane.xlu0 %724  ;;  %v1095_v27 = vsub.f32 %v2235_v1, %v2465_v9 }
 0x249   : > { %v1164_v34 = vmul.f32 %v2330_v20, %v1125_v26  ;;  %1702 = vrsqrt.f32 %v1031_v60  ;;  %v1015_v44 = vmax.f32 %v983_v63, 0.0  ;;  %v727_v21 = vpop.xlane.xlu1 %726  ;;  %v2501_v51 = vmul.f32 0.0078125, %v725_v0 }
 0x24a   : > { %v1699_v47 = vpop.eup %1698  ;;  %v1165_v39 = vmul.f32 %v2330_v20, %v1126_v32  ;;  %1704 = vrsqrt.f32 %v1032_v35  ;;  %v1016_v62 = vmax.f32 %v984_v41, 0.0  ;;  %v2505_v22 = vmul.f32 0.0078125, %v727_v21 }
 0x24b   : > { %v1701_v48 = vpop.eup %1700  ;;  %v1203_v58 = vadd.f32 %v2337_v17, %v1164_v34  ;;  %v1141_v37 = vmul.f32 %v1699_v47, %v1109_v53  ;;  %v1047_v49 = vadd.f32 1e-12, %v1015_v44  ;;  %v937_v28 = vmul.f32 %v2501_v51, %v2501_v51 }
 0x24c   : > { %v1204_v54 = vadd.f32 %v2337_v17, %v1165_v39  ;;  %v1142_v50 = vmul.f32 %v1701_v48, %v1110_v7  ;;  %v1048_v2 = vadd.f32 1e-12, %v1016_v62  ;;  %v757_v61 = vpop.xlane.xlu0 %756  ;;  %v938_v14 = vmul.f32 %v2505_v22, %v2505_v22 }
 0x24d   : > { %1235 = vst [vmem:[%s2349_s23 + $0x40] sm:$0xff] %v1203_v58  ;;  %v1180_v5 = vmul.f32 %v2330_v20, %v1141_v37  ;;  %1706 = vrsqrt.f32 %v1047_v49  ;;  %v759_v52 = vpop.xlane.xlu1 %758  ;;  %v2512_v42 = vmul.f32 0.0078125, %v757_v61  ;;  %v1096_v60 = vsub.f32 %v2238_v24, %v2469_v57 }
 0x24e   : > { %1236 = vst [vmem:[%s2349_s23 + $0x48] sm:$0xff] %v1204_v54  ;;  %v1181_v13 = vmul.f32 %v2330_v20, %v1142_v50  ;;  %1708 = vrsqrt.f32 %v1048_v2  ;;  %v2517_v25 = vmul.f32 0.0078125, %v759_v52  ;;  %v1111_v47 = vsub.f32 %v2243_v29, %v2476_v40 }
 0x24f   : > { %v1219_v15 = vadd.f32 %v2337_v17, %v1180_v5  ;;  %v953_v31 = vmul.f32 %v2512_v42, %v2512_v42  ;;  %v1112_v62 = vsub.f32 %v2246_v36, %v2481_v16 }
 0x250   : > { %v1220_v6 = vadd.f32 %v2337_v17, %v1181_v13  ;;  %v821_v18 = vpop.xlane.xlu0 %820  ;;  %v954_v63 = vmul.f32 %v2517_v25, %v2517_v25 }
 0x251   : > { %1251 = vst [vmem:[%s2349_s23 + $0xc0] sm:$0xff] %v1219_v15  ;;  %v823_v23 = vpop.xlane.xlu1 %822  ;;  %v905_v33 = vmul.f32 0.0078125, %v821_v18 }
 0x252   : > { %1252 = vst [vmem:[%s2349_s23 + $0xc8] sm:$0xff] %v1220_v6  ;;  %v906_v4 = vmul.f32 0.0078125, %v823_v23 }
 0x253   : > { %v969_v55 = vsub.f32 %v905_v33, %v937_v28 }
 0x254   : > { %v970_v59 = vsub.f32 %v906_v4, %v938_v14  ;;  %v853_v56 = vpop.xlane.xlu0 %852 }
 0x255   : > { %v1001_v19 = vmax.f32 %v969_v55, 0.0  ;;  %v855_v38 = vpop.xlane.xlu1 %854  ;;  %v921_v3 = vmul.f32 0.0078125, %v853_v56 }
 0x256   : > { %v1703_v26 = vpop.eup %1702  ;;  %v1002_v32 = vmax.f32 %v970_v59, 0.0  ;;  %v922_v35 = vmul.f32 0.0078125, %v855_v38 }
 0x257   : > { %v1705_v41 = vpop.eup %1704  ;;  %v1127_v0 = vmul.f32 %v1703_v26, %v1095_v27  ;;  %v1033_v53 = vadd.f32 1e-12, %v1001_v19  ;;  %v985_v34 = vsub.f32 %v921_v3, %v953_v31  ;;  %v1097_v19 = vsub.f32 %v2261_v46, %v2501_v51 }
 0x258   : > { %v1128_v1 = vmul.f32 %v1705_v41, %v1096_v60  ;;  %v1034_v9 = vadd.f32 1e-12, %v1002_v32  ;;  %v986_v44 = vsub.f32 %v922_v35, %v954_v63  ;;  %v729_v21 = vpop.xlane.xlu0 %728  ;;  %v1098_v32 = vsub.f32 %v2264_v8, %v2505_v22 }
 0x259   : > { %v1166_v7 = vmul.f32 %v2330_v20, %v1127_v0  ;;  %1710 = vrsqrt.f32 %v1033_v53  ;;  %v1017_v24 = vmax.f32 %v985_v34, 0.0  ;;  %v731_v57 = vpop.xlane.xlu1 %730  ;;  %v2537_v36 = vmul.f32 0.0078125, %v729_v21 }
 0x25a   : > { %v1707_v39 = vpop.eup %1706  ;;  %v1167_v48 = vmul.f32 %v2330_v20, %v1128_v1  ;;  %1712 = vrsqrt.f32 %v1034_v9  ;;  %v1018_v58 = vmax.f32 %v986_v44, 0.0  ;;  %v2541_v13 = vmul.f32 0.0078125, %v731_v57 }
 0x25b   : > { %v1709_v37 = vpop.eup %1708  ;;  %v1205_v49 = vadd.f32 %v2337_v17, %v1166_v7  ;;  %v1143_v54 = vmul.f32 %v1707_v39, %v1111_v47  ;;  %v1049_v29 = vadd.f32 1e-12, %v1017_v24  ;;  %v939_v28 = vmul.f32 %v2537_v36, %v2537_v36 }
 0x25c   : > { %v1206_v40 = vadd.f32 %v2337_v17, %v1167_v48  ;;  %v1144_v50 = vmul.f32 %v1709_v37, %v1112_v62  ;;  %v1050_v2 = vadd.f32 1e-12, %v1018_v58  ;;  %v761_v61 = vpop.xlane.xlu0 %760  ;;  %v940_v4 = vmul.f32 %v2541_v13, %v2541_v13 }
 0x25d   : > { %1237 = vst [vmem:[%s2349_s23 + $0x50] sm:$0xff] %v1205_v49  ;;  %v1182_v5 = vmul.f32 %v2330_v20, %v1143_v54  ;;  %1714 = vrsqrt.f32 %v1049_v29  ;;  %v763_v16 = vpop.xlane.xlu1 %762  ;;  %v2548_v23 = vmul.f32 0.0078125, %v761_v61  ;;  %v1113_v21 = vsub.f32 %v2268_v11, %v2512_v42 }
 0x25e   : > { %1238 = vst [vmem:[%s2349_s23 + $0x58] sm:$0xff] %v1206_v40  ;;  %v1183_v52 = vmul.f32 %v2330_v20, %v1144_v50  ;;  %1716 = vrsqrt.f32 %v1050_v2  ;;  %v2553_v55 = vmul.f32 0.0078125, %v763_v16  ;;  %v1114_v7 = vsub.f32 %v2270_v12, %v2517_v25 }
 0x25f   : > { %v1221_v15 = vadd.f32 %v2337_v17, %v1182_v5  ;;  %v955_v38 = vmul.f32 %v2548_v23, %v2548_v23  ;;  %v1099_v29 = vsub.f32 %v2282_v30, %v2537_v36  ;;  %v1100_v50 = vsub.f32 %v2284_v43, %v2541_v13 }
 0x260   : > { %v1222_v6 = vadd.f32 %v2337_v17, %v1183_v52  ;;  %v825_v18 = vpop.xlane.xlu0 %824  ;;  %v956_v35 = vmul.f32 %v2553_v55, %v2553_v55  ;;  %v1115_v16 = vsub.f32 %v2288_v10, %v2548_v23  ;;  %v1116_v30 = vsub.f32 %v2290_v45, %v2553_v55 }
 0x261   : > { %1253 = vst [vmem:[%s2349_s23 + $0xd0] sm:$0xff] %v1221_v15  ;;  %v827_v33 = vpop.xlane.xlu1 %826  ;;  %v907_v14 = vmul.f32 0.0078125, %v825_v18 }
 0x262   : > { %1254 = vst [vmem:[%s2349_s23 + $0xd8] sm:$0xff] %v1222_v6  ;;  %v908_v59 = vmul.f32 0.0078125, %v827_v33 }
 0x263   : > { %v971_v56 = vsub.f32 %v907_v14, %v939_v28 }
 0x264   : > { %v972_v27 = vsub.f32 %v908_v59, %v940_v4  ;;  %v857_v31 = vpop.xlane.xlu0 %856 }
 0x265   : > { %v1003_v3 = vmax.f32 %v971_v56, 0.0  ;;  %v859_v26 = vpop.xlane.xlu1 %858  ;;  %v923_v60 = vmul.f32 0.0078125, %v857_v31 }
 0x266   : > { %v1711_v63 = vpop.eup %1710  ;;  %v1004_v41 = vmax.f32 %v972_v27, 0.0  ;;  %v924_v0 = vmul.f32 0.0078125, %v859_v26 }
 0x267   : > { %v1713_v53 = vpop.eup %1712  ;;  %v1129_v34 = vmul.f32 %v1711_v63, %v1097_v19  ;;  %v1035_v1 = vadd.f32 1e-12, %v1003_v3  ;;  %v987_v9 = vsub.f32 %v923_v60, %v955_v38 }
 0x268   : > { %v1130_v46 = vmul.f32 %v1713_v53, %v1098_v32  ;;  %v1036_v51 = vadd.f32 1e-12, %v1004_v41  ;;  %v988_v44 = vsub.f32 %v924_v0, %v956_v35 }
 0x269   : > { %v1168_v47 = vmul.f32 %v2330_v20, %v1129_v34  ;;  %1718 = vrsqrt.f32 %v1035_v1  ;;  %v1019_v8 = vmax.f32 %v987_v9, 0.0 }
 0x26a   : > { %v1715_v22 = vpop.eup %1714  ;;  %v1169_v24 = vmul.f32 %v2330_v20, %v1130_v46  ;;  %1720 = vrsqrt.f32 %v1036_v51  ;;  %v1020_v57 = vmax.f32 %v988_v44, 0.0 }
 0x26b   : > { %v1717_v39 = vpop.eup %1716  ;;  %v1207_v62 = vadd.f32 %v2337_v17, %v1168_v47  ;;  %v1145_v11 = vmul.f32 %v1715_v22, %v1113_v21  ;;  %v1051_v42 = vadd.f32 1e-12, %v1019_v8 }
 0x26c   : > { %v1208_v48 = vadd.f32 %v2337_v17, %v1169_v24  ;;  %v1146_v58 = vmul.f32 %v1717_v39, %v1114_v7  ;;  %v1052_v37 = vadd.f32 1e-12, %v1020_v57 }
 0x26d   : > { %1239 = vst [vmem:[%s2349_s23 + $0x60] sm:$0xff] %v1207_v62  ;;  %v1184_v49 = vmul.f32 %v2330_v20, %v1145_v11  ;;  %1722 = vrsqrt.f32 %v1051_v42 }
 0x26e   : > { %1240 = vst [vmem:[%s2349_s23 + $0x68] sm:$0xff] %v1208_v48  ;;  %v1185_v12 = vmul.f32 %v2330_v20, %v1146_v58  ;;  %1724 = vrsqrt.f32 %v1052_v37 }
 0x26f   : > { %v1223_v25 = vadd.f32 %v2337_v17, %v1184_v49 }
 0x270   : > { %v1224_v54 = vadd.f32 %v2337_v17, %v1185_v12 }
 0x271   : > { %1255 = vst [vmem:[%s2349_s23 + $0xe0] sm:$0xff] %v1223_v25 }
 0x272   : > { %1256 = vst [vmem:[%s2349_s23 + $0xe8] sm:$0xff] %v1224_v54 }
 0x276   : > { %v1719_v40 = vpop.eup %1718 }
 0x277   : > { %v1721_v2 = vpop.eup %1720  ;;  %v1131_v61 = vmul.f32 %v1719_v40, %v1099_v29 }
 0x278   : > { %v1132_v5 = vmul.f32 %v1721_v2, %v1100_v50 }
 0x279   : > { %v1170_v52 = vmul.f32 %v2330_v20, %v1131_v61 }
 0x27a   : > { %v1723_v15 = vpop.eup %1722  ;;  %v1171_v36 = vmul.f32 %v2330_v20, %v1132_v5 }
 0x27b   : > { %v1725_v6 = vpop.eup %1724  ;;  %v1209_v43 = vadd.f32 %v2337_v17, %v1170_v52  ;;  %v1147_v13 = vmul.f32 %v1723_v15, %v1115_v16 }
 0x27c   : > { %v1210_v18 = vadd.f32 %v2337_v17, %v1171_v36  ;;  %v1148_v28 = vmul.f32 %v1725_v6, %v1116_v30 }
 0x27d   : > { %1241 = vst [vmem:[%s2349_s23 + $0x70] sm:$0xff] %v1209_v43  ;;  %v1186_v10 = vmul.f32 %v2330_v20, %v1147_v13 }
 0x27e   : > { %1242 = vst [vmem:[%s2349_s23 + $0x78] sm:$0xff] %v1210_v18  ;;  %v1187_v45 = vmul.f32 %v2330_v20, %v1148_v28 }
 0x27f   : > { %v1225_v23 = vadd.f32 %v2337_v17, %v1186_v10 }
 0x280   : > { %v1226_v33 = vadd.f32 %v2337_v17, %v1187_v45 }
 0x281   : > { %1257 = vst [vmem:[%s2349_s23 + $0xf0] sm:$0xff] %v1225_v23 }
 0x282   : > { %1258 = vst [vmem:[%s2349_s23 + $0xf8] sm:$0xff] %v1226_v33 }
 0x283   : > { %1793 = shalt.err (!%p1790_p0)
}
 0x284   : > { %s1794_s26 = scalar_lea.hbm %s2601_s11, 4096  ;;  %s1798_s6 = scalar_lea.hbm %s2654_s5, 8192 }
 0x285   : > { %p1795_p5 = scmp.ne.s32.totalorder %s2601_s11, %s1794_s26  ;;  %p1799_p4 = scmp.lt.s32.totalorder %s2601_s11, %s2654_s5 }
 0x286   : > { %p1800_p6 = scmp.lt.s32.totalorder %s1798_s6, %s1794_s26 }
 0x287   : > { %p1796_p2 = pnand %p1795_p5, %p2672_p11 }
 0x288   : > { %p1801_p8 = por %p1800_p6, %p1799_p4 }
 0x289   : > { %p1797_p1 = pneg %p1796_p2 }
 0x28b   : > { %p1802_p3 = pnand %p1801_p8, %p1797_p1 }
 0x28d   : > { %1805 = shalt.err (!%p1802_p3)
}
 0x28e   : > { %s1855_s27 = smov 128   ;;  %s1856_s28 = smov 8  }
 0x28f   : > { %1543 = dma.vmem_to_hbm [thread:$0]  (%p2672_p11), %s2603_s15, 4096, %s2601_s11, %s1260_s22, %s1855_s27, %s1855_s27, %s1856_s28  }
 0x290 PF: > { %s1288_s12 = sand.u32 1, %s1836_s18   ;;  %p2673_p7 = scmp.ne.s32.totalorder %s2661_s25, 0 }
 0x291   : > { %p2674_p9 = scmp.ge.s32.totalorder %s1848_s21, 2  ;;  %s1289_s9 = scalar_lea.sflag [#allocation4], %s1288_s12 }
 0x293   : > { %p1554_p10 = pnand %p2674_p9, %p2673_p7 }
 0x295   : > { %p1555_p12 = pneg %p1554_p10 }
 0x297   : > { %1831 = dma.done.wait (%p1555_p12), %s1289_s9, 4096  }
 0x298   : > { %1833 = vsyncadd (%p1555_p12), %s1289_s9, 4294963200  ;;  %p19_p13 = scmp.ge.s32.totalorder %s1941_s30, 4   ;;  %s2675_s18 = smov %s1840_s19 }
 0x299   : > { %s2676_s19 = smov %s1844_s20  ;;  %s2677_s20 = smov %s1961_s13 }
 0x29a   : > { %s2678_s21 = smov %s1941_s30  ;;  %21 = sbr.rel (!%p19_p13) target bundleno = 6 (0x6), region = 89 }
 0x29f   :  { %1294 = vsyncpa [#allocation3], 1 }
 0x2a0   :  { %1296 = vsyncpa [#allocation3 + $0x1], 1 }
 0x2a1   :  { %1297 = vsyncpa [#allocation6], 1 }
 0x2a2   :  { %1298 = vsyncpa [#allocation4], 1 }
 0x2a3   :  { %1300 = vsyncpa [#allocation4 + $0x1], 1 }

// kernel: tpu_custom_call.1
= control target key start
LH: loop header
LB: loop body
LE: loop exit
PB: predicated region body
PF: predicated region fallthrough
CT: control target
= control target key end

     0   :  { %10 = vsyncpa [#allocation3], 0  ;;  %s2649_s0 = inlined_call_operand.hbm [shape: f32[512,128], index: 0, kind: input, shape index: {}]   ;;  %s2650_s1 = inlined_call_operand.hbm [shape: f32[128,128], index: 1, kind: input, shape index: {}]   ;;  %s2651_s2 = inlined_call_operand.vmem [shape: f32[1,128], index: 2, kind: input, shape index: {}]   ;;  %s2652_s3 = inlined_call_operand.vmem [shape: f32[1,128], index: 3, kind: input, shape index: {}]   ;;  %s2653_s4 = inlined_call_operand.vmem [shape: f32[1,128], index: 4, kind: input, shape index: {}]   ;;  %s2654_s5 = inlined_call_operand.hbm [shape: f32[512,128], index: 5, kind: output, shape index: {}]  }
   0x1   :  { %12 = vsyncpa [#allocation3 + $0x1], 0 }
   0x2   :  { %13 = vsyncpa [#allocation6], 0 }
   0x3   :  { %14 = vsyncpa [#allocation4], 0 }
   0x4   :  { %16 = vsyncpa [#allocation4 + $0x1], 0  ;;  %s1887_s18 = smov 0   ;;  %s1889_s19 = smov 0  }
   0x5   :  { %s1891_s20 = smov 0   ;;  %s1893_s21 = smov 0  }
   0x6 LB: > { %s1908_s22 = sadd.s32 4294967295, %s1848_s21   ;;  %s1356_s23 = sadd.s32 4294967294, %s1848_s21   ;;  %s1848_s21 = sphi %s1893_s21, %s2678_s21   ;;  %s1844_s20 = sphi %s1891_s20, %s2677_s20   ;;  %s1840_s19 = sphi %s1889_s19, %s2676_s19   ;;  %s1836_s18 = sphi %s1887_s18, %s2675_s18  }
   0x7   : > { %p42_p0 = scmp.ne.s32.totalorder %s1840_s19, %s1836_s18  ;;  %p2655_p1 = scmp.eq.s32.totalorder %s1908_s22, 0 }
   0x8   : > { %p156_p3 = scmp.eq.s32.totalorder %s1356_s23, 1  ;;  %p1357_p5 = scmp.ge.s32.totalorder %s1848_s21, 1 }
   0x9   : > { %p1917_p4 = por %p2655_p1, %p42_p0  ;;  %p163_p7 = scmp.lt.s32.totalorder %s1848_s21, 3 }
   0xa   : > { %p1922_p6 = por %p156_p3, %p42_p0  ;;  %s1850_s27 = smov [#allocation5]  }
   0xb   : > { %s2660_s24 = scalar_select %p1917_p4, 1, 0 }
   0xc   : > { %s2661_s25 = scalar_select %p1922_p6, 1, 0 }
   0xd   : > { %p1927_p8 = pnand %p1357_p5, %p163_p7  ;;  %s175_s28 = sshll.u32 %s1850_s27, 4  ;;  %s176_s28 = int_to_ptr.vmem [resolvable:$true] %s175_s28 }
   0xe   : > { %s1941_s30 = sadd.s32 1, %s1848_s21   ;;  %s29_s6 = sadd.s32 1, %s1844_s20 }
   0xf   : > { %s2662_s26 = scalar_select %p1927_p8, 1, 0 }
  0x10   : > { %p1545_p9 = pneg %p1927_p8  ;;  %s26_s7 = ssub.s32 %s1848_s21, %s1941_s30 }
  0x11   : > { %s1737_s8 = scalar_lea.vmem %s176_s28, 2048  ;;  %p1745_p5 = scmp.lt.s32.totalorder %s176_s28, %s176_s28 }
  0x12   : > { %p1936_p11 = pnand %p1545_p9, %p2655_p1  ;;  %p1738_p13 = scmp.ne.s32.totalorder %s176_s28, %s1737_s8 }
  0x13   : > { %p1746_p7 = scmp.lt.s32.totalorder %s1737_s8, %s1737_s8 }
  0x14   : > { %p1728_p12 = pneg %p1936_p11 }
  0x15   : > { %p1747_p10 = por %p1746_p7, %p1745_p5 }
  0x16   : > { %p1740_p0 = pnand %p1738_p13, %p1728_p12 }
  0x18   : > { %p1741_p3 = pneg %p1740_p0 }
  0x1a   : > { %p1748_p2 = pnand %p1747_p10, %p1741_p3 }
  0x1c   : > { %1751 = shalt.err (!%p1748_p2)
}
  0x1d   : > { %s2656_s9 = smov 128   ;;  %s1852_s10 = smov 8  }
  0x1e   : > { %1548 = dma.hbm_to_vmem [thread:$0]  (!%p1936_p11), %s2650_s1, 2048, %s176_s28, [#allocation6], %s2656_s9, %s2656_s9, %s1852_s10  }
  0x1f   : > { %p27_p2 = scmp.eq.s32.totalorder %s26_s7, 0  ;;  %p36_p9 = scmp.ne.s32.totalorder %s1844_s20, %s1840_s19 }
  0x20   : > { %p37_p10 = scmp.eq.s32.totalorder %s1848_s21, 0  ;;  %p1558_p12 = scmp.lt.s32.totalorder %s1848_s21, 2 }
  0x21   : > { %s1961_s13 = scalar_select %p27_p2, %s1844_s20, %s29_s6  }
  0x22   : > { %p38_p13 = por %p37_p10, %p36_p9  ;;  %p2664_p0 = scmp.eq.s32.totalorder %s1908_s22, 1 }
  0x23   : > { %s198_s15 = sand.u32 1, %s1844_s20   ;;  %s1375_s16 = sshll.u32 %s1848_s21, 12 }
  0x24   : > { %p1965_p3 = por %p2664_p0, %p36_p9  ;;  %s1360_s17 = sshll.u32 %s198_s15, 8 }
  0x25   : > { %s1974_s29 = scalar_lea.hbm %s2649_s0, %s1375_s16  ;;  %s202_s28 = scalar_lea.vmem [#allocation2], %s1360_s17 }
  0x26   : > { %s2665_s14 = scalar_select %p1965_p3, 1, 0 }
  0x27   : > { %s209_s6 = sshll.u32 %s202_s28, 4  ;;  %p1976_p11 = pnand %p1558_p12, %p38_p13  ;;  %s1980_s6 = int_to_ptr.vmem [resolvable:$true] %s209_s6 }
  0x28   : > { %s1982_s8 = scalar_lea.sflag [#allocation3], %s198_s15  ;;  %s1752_s11 = scalar_lea.hbm %s1974_s29, 4096 }
  0x29   : > { %p1753_p5 = scmp.ne.s32.totalorder %s1974_s29, %s1752_s11  ;;  %p1754_p7 = pneg %p1976_p11 }
  0x2a   : > { %s1757_s17 = scalar_lea.hbm %s2649_s0, 8192  ;;  %p1758_p10 = scmp.lt.s32.totalorder %s1974_s29, %s2649_s0 }
  0x2b   : > { %p1755_p2 = pnand %p1754_p7, %p1753_p5  ;;  %p1759_p12 = scmp.lt.s32.totalorder %s1757_s17, %s1752_s11 }
  0x2d   : > { %p1756_p9 = pneg %p1755_p2  ;;  %p1760_p13 = por %p1759_p12, %p1758_p10 }
  0x2f   : > { %p1761_p0 = pnand %p1760_p13, %p1756_p9 }
  0x31   : > { %1764 = shalt.err (!%p1761_p0)
}
  0x32   : > { %s1765_s15 = scalar_lea.vmem %s1980_s6, 4096  ;;  %s1853_s28 = smov [#allocation2]  }
  0x33   : > { %p1766_p1 = scmp.ne.s32.totalorder %s1980_s6, %s1765_s15  ;;  %s1770_s9 = sshll.u32 %s1853_s28, 4  ;;  %s1771_s9 = int_to_ptr.vmem [resolvable:$false] %s1770_s9 }
  0x34   : > { %s1772_s12 = scalar_lea.vmem %s1771_s9, 8192  ;;  %p1773_p2 = scmp.lt.s32.totalorder %s1980_s6, %s1771_s9 }
  0x35   : > { %p1768_p6 = pnand %p1766_p1, %p1754_p7  ;;  %p1774_p3 = scmp.lt.s32.totalorder %s1772_s12, %s1765_s15 }
  0x37   : > { %p1769_p5 = pneg %p1768_p6  ;;  %p1775_p4 = por %p1774_p3, %p1773_p2 }
  0x39   : > { %p1776_p8 = pnand %p1775_p4, %p1769_p5 }
  0x3b   : > { %1779 = shalt.err (!%p1776_p8)
}
  0x3c   : > { %s2667_s11 = smov 128   ;;  %p2668_p1 = scmp.ne.s32.totalorder %s2662_s26, 0 }
  0x3d   : > { %1552 = dma.hbm_to_vmem [thread:$0]  (!%p1976_p11), %s1974_s29, 4096, %s1980_s6, %s1982_s8, %s2667_s11, %s2667_s11, %s1852_s10  }
  0x3e   : > { %221 = sbr.rel (%p2668_p1) target bundleno = 656 (0x290), region = 40  ;;  %s2009_s16 = sand.u32 (!%p2668_p1), 1, %s1840_s19  }
  0x3f   : > { %s1364_s9 = sshll.u32 (!%p2668_p1), %s2009_s16, 8  ;;  %s224_s17 = scalar_lea.sflag (!%p2668_p1), [#allocation3], %s2009_s16 }
  0x40   : > { %s2015_s7 = scalar_lea.vmem (!%p2668_p1), [#allocation2], %s1364_s9  ;;  %p2669_p4 = scmp.ne.s32.totalorder (!%p2668_p1), %s2660_s24, 0 }
  0x43   : > { %1823 = dma.done.wait (%p2669_p4), %s224_s17, 4096  }
  0x44   : > { %1825 = vsyncadd (%p2669_p4), %s224_s17, 4294963200  ;;  %p2670_p6 = scmp.eq.s32.totalorder %s1908_s22, 0 }
  0x46   : > { %1827 = dma.done.wait (%p2670_p6), [#allocation6], 2048   ;;  %p2671_p8 = pmov %p2670_p6 }
  0x47   : > { %v307_v0 = vld [vmem:[#allocation5 + $0x78] sm:$0xff]  ;;  %v306_v1 = vld [vmem:[#allocation5 + $0x70] sm:$0xff]  ;;  %v305_v2 = vld [vmem:[#allocation5 + $0x68] sm:$0xff]  ;;  %s2349_s23 = scalar_lea.vmem [#allocation7], %s1364_s9  ;;  %s1376_s27 = sshll.u32 %s1908_s22, 12 }
  0x48   : > { %1829 = vsyncadd (%p2671_p8), [#allocation6], 4294965248  ;;  %1425 = vmatprep.subr.mxu0 %v307_v0  ;;  %1505 = vmatprep.subr.mxu1 %v307_v0  ;;  %v260_v3 = vld [vmem:[%s2015_s7] sm:$0xff]  ;;  %v303_v6 = vld [vmem:[#allocation5 + $0x58] sm:$0xff]  ;;  %s1273_s15 = sshll.u32 %s2349_s23, 4  ;;  %s2601_s11 = scalar_lea.hbm %s2654_s5, %s1376_s27  ;;  %s2603_s15 = int_to_ptr.vmem [resolvable:$true] %s1273_s15 }
  0x49   : > { %1426 = vmatpush3.xpose.msra.mxu0 %v307_v0  ;;  %1521 = vmatpush3.xpose.msra.mxu1 %v307_v0  ;;  %v276_v4 = vld [vmem:[%s2015_s7 + $0x80] sm:$0xff]  ;;  %v302_v7 = vld [vmem:[#allocation5 + $0x50] sm:$0xff]  ;;  %v301_v8 = vld [vmem:[#allocation5 + $0x48] sm:$0xff]  ;;  %s1260_s22 = scalar_lea.sflag [#allocation4], %s2009_s16  ;;  %s1780_s9 = scalar_lea.vmem %s2603_s15, 4096 }
  0x4a   : > { %1427 = vmatprep.subr.mxu0 %v306_v1  ;;  %1506 = vmatprep.subr.mxu1 %v306_v1  ;;  %v304_v5 = vld [vmem:[#allocation5 + $0x60] sm:$0xff]  ;;  %v299_v10 = vld [vmem:[#allocation5 + $0x38] sm:$0xff]  ;;  %v298_v11 = vld [vmem:[#allocation5 + $0x30] sm:$0xff]  ;;  %p1781_p3 = scmp.ne.s32.totalorder %s2603_s15, %s1780_s9  ;;  %p2672_p11 = scmp.ne.s32.totalorder %s2665_s14, 0 }
  0x4b   : > { %1457 = vmatprep.mubr.f32.mxu0 %v260_v3  ;;  %1481 = vmatprep.mubr.f32.mxu1 %v276_v4  ;;  %v300_v9 = vld [vmem:[#allocation5 + $0x40] sm:$0xff]  ;;  %v297_v12 = vld [vmem:[#allocation5 + $0x28] sm:$0xff]  ;;  %v295_v14 = vld [vmem:[#allocation5 + $0x18] sm:$0xff]  ;;  %s1854_s17 = smov [#allocation7]  }
  0x4c   : > { %v296_v13 = vld [vmem:[#allocation5 + $0x20] sm:$0xff]  ;;  %v294_v15 = vld [vmem:[#allocation5 + $0x10] sm:$0xff]  ;;  %v293_v16 = vld [vmem:[#allocation5 + $0x8] sm:$0xff]  ;;  %p1782_p7 = pnand %p1781_p3, %p2672_p11 }
  0x4d   : > { %1428 = vmatpush3.xpose.msra.mxu0 %v306_v1  ;;  %1522 = vmatpush3.xpose.msra.mxu1 %v306_v1  ;;  %v292_v17 = vld [vmem:[#allocation5] sm:$0xff]  ;;  %v261_v18 = vld [vmem:[%s2015_s7 + $0x8] sm:$0xff]  ;;  %v262_v20 = vld [vmem:[%s2015_s7 + $0x10] sm:$0xff] }
  0x4e   : > { %1429 = vmatprep.subr.mxu0 %v305_v2  ;;  %1507 = vmatprep.subr.mxu1 %v305_v2  ;;  %v277_v19 = vld [vmem:[%s2015_s7 + $0x88] sm:$0xff]  ;;  %v278_v21 = vld [vmem:[%s2015_s7 + $0x90] sm:$0xff]  ;;  %v263_v22 = vld [vmem:[%s2015_s7 + $0x18] sm:$0xff]  ;;  %p1783_p9 = pneg %p1782_p7 }
  0x4f   : > { %v279_v23 = vld [vmem:[%s2015_s7 + $0x98] sm:$0xff]  ;;  %v264_v24 = vld [vmem:[%s2015_s7 + $0x20] sm:$0xff]  ;;  %v265_v26 = vld [vmem:[%s2015_s7 + $0x28] sm:$0xff] }
  0x50   : > { %v280_v25 = vld [vmem:[%s2015_s7 + $0xa0] sm:$0xff]  ;;  %v281_v27 = vld [vmem:[%s2015_s7 + $0xa8] sm:$0xff]  ;;  %v266_v28 = vld [vmem:[%s2015_s7 + $0x30] sm:$0xff] }
  0x51   : > { %1430 = vmatpush3.xpose.msra.mxu0 %v305_v2  ;;  %1523 = vmatpush3.xpose.msra.mxu1 %v305_v2  ;;  %v282_v29 = vld [vmem:[%s2015_s7 + $0xb0] sm:$0xff]  ;;  %v267_v30 = vld [vmem:[%s2015_s7 + $0x38] sm:$0xff]  ;;  %v268_v32 = vld [vmem:[%s2015_s7 + $0x40] sm:$0xff] }
  0x52   : > { %1431 = vmatprep.subr.mxu0 %v304_v5  ;;  %1508 = vmatprep.subr.mxu1 %v304_v5  ;;  %v283_v31 = vld [vmem:[%s2015_s7 + $0xb8] sm:$0xff]  ;;  %v284_v33 = vld [vmem:[%s2015_s7 + $0xc0] sm:$0xff]  ;;  %v269_v34 = vld [vmem:[%s2015_s7 + $0x48] sm:$0xff] }
  0x53   : > { %v285_v35 = vld [vmem:[%s2015_s7 + $0xc8] sm:$0xff]  ;;  %v270_v36 = vld [vmem:[%s2015_s7 + $0x50] sm:$0xff]  ;;  %v271_v38 = vld [vmem:[%s2015_s7 + $0x58] sm:$0xff] }
  0x54   : > { %v286_v37 = vld [vmem:[%s2015_s7 + $0xd0] sm:$0xff]  ;;  %v287_v39 = vld [vmem:[%s2015_s7 + $0xd8] sm:$0xff]  ;;  %v272_v40 = vld [vmem:[%s2015_s7 + $0x60] sm:$0xff] }
  0x55   : > { %1432 = vmatpush3.xpose.msra.mxu0 %v304_v5  ;;  %1524 = vmatpush3.xpose.msra.mxu1 %v304_v5  ;;  %v288_v41 = vld [vmem:[%s2015_s7 + $0xe0] sm:$0xff]  ;;  %v273_v42 = vld [vmem:[%s2015_s7 + $0x68] sm:$0xff]  ;;  %v274_v44 = vld [vmem:[%s2015_s7 + $0x70] sm:$0xff] }
  0x56   : > { %1433 = vmatprep.subr.mxu0 %v303_v6  ;;  %1509 = vmatprep.subr.mxu1 %v303_v6  ;;  %v289_v43 = vld [vmem:[%s2015_s7 + $0xe8] sm:$0xff]  ;;  %v290_v45 = vld [vmem:[%s2015_s7 + $0xf0] sm:$0xff]  ;;  %v275_v46 = vld [vmem:[%s2015_s7 + $0x78] sm:$0xff] }
  0x57   : > { %v291_v47 = vld [vmem:[%s2015_s7 + $0xf8] sm:$0xff]  ;;  %v2060_v48 = vld [vmem:[%s2651_s2] ss:$0 sm:$0xff]  ;;  %s1784_s7 = sshll.u32 %s1854_s17, 4  ;;  %s1785_s7 = int_to_ptr.vmem [resolvable:$false] %s1784_s7 }
  0x58   : > { %s1786_s24 = scalar_lea.vmem %s1785_s7, 8192  ;;  %p1787_p10 = scmp.lt.s32.totalorder %s2603_s15, %s1785_s7 }
  0x59   : > { %1434 = vmatpush3.xpose.msra.mxu0 %v303_v6  ;;  %1525 = vmatpush3.xpose.msra.mxu1 %v303_v6  ;;  %p1788_p12 = scmp.lt.s32.totalorder %s1786_s24, %s1780_s9 }
  0x5a   : > { %1435 = vmatprep.subr.mxu0 %v302_v7  ;;  %1510 = vmatprep.subr.mxu1 %v302_v7 }
  0x5b   : > { %p1789_p13 = por %p1788_p12, %p1787_p10 }
  0x5d   : > { %1436 = vmatpush3.xpose.msra.mxu0 %v302_v7  ;;  %1526 = vmatpush3.xpose.msra.mxu1 %v302_v7  ;;  %p1790_p0 = pnand %p1789_p13, %p1783_p9 }
  0x5e   : > { %1437 = vmatprep.subr.mxu0 %v301_v8  ;;  %1511 = vmatprep.subr.mxu1 %v301_v8 }
  0x61   : > { %1438 = vmatpush3.xpose.msra.mxu0 %v301_v8  ;;  %1527 = vmatpush3.xpose.msra.mxu1 %v301_v8 }
  0x62   : > { %1439 = vmatprep.subr.mxu0 %v300_v9  ;;  %1512 = vmatprep.subr.mxu1 %v300_v9 }
  0x65   : > { %1440 = vmatpush3.xpose.msra.mxu0 %v300_v9  ;;  %1528 = vmatpush3.xpose.msra.mxu1 %v300_v9 }
  0x66   : > { %1441 = vmatprep.subr.mxu0 %v299_v10  ;;  %1513 = vmatprep.subr.mxu1 %v299_v10 }
  0x69   : > { %1442 = vmatpush3.xpose.msra.mxu0 %v299_v10  ;;  %1529 = vmatpush3.xpose.msra.mxu1 %v299_v10 }
  0x6a   : > { %1443 = vmatprep.subr.mxu0 %v298_v11  ;;  %1514 = vmatprep.subr.mxu1 %v298_v11 }
  0x6d   : > { %1444 = vmatpush3.xpose.msra.mxu0 %v298_v11  ;;  %1530 = vmatpush3.xpose.msra.mxu1 %v298_v11 }
  0x6e   : > { %1445 = vmatprep.subr.mxu0 %v297_v12  ;;  %1515 = vmatprep.subr.mxu1 %v297_v12 }
  0x71   : > { %1446 = vmatpush3.xpose.msra.mxu0 %v297_v12  ;;  %1531 = vmatpush3.xpose.msra.mxu1 %v297_v12 }
  0x72   : > { %1447 = vmatprep.subr.mxu0 %v296_v13  ;;  %1516 = vmatprep.subr.mxu1 %v296_v13 }
  0x75   : > { %1448 = vmatpush3.xpose.msra.mxu0 %v296_v13  ;;  %1532 = vmatpush3.xpose.msra.mxu1 %v296_v13 }
  0x76   : > { %1449 = vmatprep.subr.mxu0 %v295_v14  ;;  %1517 = vmatprep.subr.mxu1 %v295_v14 }
  0x79   : > { %1450 = vmatpush3.xpose.msra.mxu0 %v295_v14  ;;  %1533 = vmatpush3.xpose.msra.mxu1 %v295_v14 }
  0x7a   : > { %1451 = vmatprep.subr.mxu0 %v294_v15  ;;  %1518 = vmatprep.subr.mxu1 %v294_v15 }
  0x7d   : > { %1452 = vmatpush3.xpose.msra.mxu0 %v294_v15  ;;  %1534 = vmatpush3.xpose.msra.mxu1 %v294_v15 }
  0x7e   : > { %1453 = vmatprep.subr.mxu0 %v293_v16  ;;  %1519 = vmatprep.subr.mxu1 %v293_v16 }
  0x81   : > { %1454 = vmatpush3.xpose.msra.mxu0 %v293_v16  ;;  %1535 = vmatpush3.xpose.msra.mxu1 %v293_v16 }
  0x82   : > { %1455 = vmatprep.subr.mxu0 %v292_v17  ;;  %1520 = vmatprep.subr.mxu1 %v292_v17 }
  0x85   : > { %1456 = vmatpush3.xpose.msra.mxu0 %v292_v17  ;;  %1536 = vmatpush3.xpose.msra.mxu1 %v292_v17 }
  0x88   : > { %1458 = vmatmul.mubr.f32.vlgmr.msra.gmra.mxu0 %v261_v18  ;;  %1482 = vmatmul.mubr.f32.vlgmr.msra.gmra.mxu1 %v277_v19 }
  0x89   : > { %1460 = vmatprep.mubr.f32.mxu0 %v262_v20  ;;  %1484 = vmatprep.mubr.f32.mxu1 %v278_v21 }
  0x8c   : > { %1461 = vmatmul.mubr.f32.gmra.mxu0 %v263_v22  ;;  %1485 = vmatmul.mubr.f32.gmra.mxu1 %v279_v23 }
  0x8d   : > { %1463 = vmatprep.mubr.f32.mxu0 %v264_v24  ;;  %1487 = vmatprep.mubr.f32.mxu1 %v280_v25 }
  0x90   : > { %1464 = vmatmul.mubr.f32.gmra.mxu0 %v265_v26  ;;  %1488 = vmatmul.mubr.f32.gmra.mxu1 %v281_v27 }
  0x91   : > { %1466 = vmatprep.mubr.f32.mxu0 %v266_v28  ;;  %1490 = vmatprep.mubr.f32.mxu1 %v282_v29 }
  0x94   : > { %1467 = vmatmul.mubr.f32.gmra.mxu0 %v267_v30  ;;  %1491 = vmatmul.mubr.f32.gmra.mxu1 %v283_v31 }
  0x95   : > { %1469 = vmatprep.mubr.f32.mxu0 %v268_v32  ;;  %1493 = vmatprep.mubr.f32.mxu1 %v284_v33 }
  0x98   : > { %1470 = vmatmul.mubr.f32.gmra.mxu0 %v269_v34  ;;  %1494 = vmatmul.mubr.f32.gmra.mxu1 %v285_v35 }
  0x99   : > { %1472 = vmatprep.mubr.f32.mxu0 %v270_v36  ;;  %1496 = vmatprep.mubr.f32.mxu1 %v286_v37 }
  0x9c   : > { %1473 = vmatmul.mubr.f32.gmra.mxu0 %v271_v38  ;;  %1497 = vmatmul.mubr.f32.gmra.mxu1 %v287_v39 }
  0x9d   : > { %1475 = vmatprep.mubr.f32.mxu0 %v272_v40  ;;  %1499 = vmatprep.mubr.f32.mxu1 %v288_v41 }
  0xa0   : > { %1476 = vmatmul.mubr.f32.gmra.mxu0 %v273_v42  ;;  %1500 = vmatmul.mubr.f32.gmra.mxu1 %v289_v43 }
  0xa1   : > { %1478 = vmatprep.mubr.f32.mxu0 %v274_v44  ;;  %1502 = vmatprep.mubr.f32.mxu1 %v290_v45 }
  0xa4   : > { %1479 = vmatmul.mubr.f32.gmra.mxu0 %v275_v46  ;;  %1503 = vmatmul.mubr.f32.gmra.mxu1 %v291_v47 }
 0x148   : > { %v1459_v49 = vpop.f32.mrf.mxu0  ;;  %v1483_v50 = vpop.f32.mrf.mxu1 }
 0x149   : > { %v387_v51 = vadd.f32 %v1459_v49, %v2060_v48  ;;  %v467_v52 = vadd.f32 %v1483_v50, %v2060_v48 }
 0x14a   : > { %v381_v53 = vpop.f32.mrf.mxu0  ;;  %v461_v54 = vpop.f32.mrf.mxu1 }
 0x14b   : > { %v573_v55 = vmul.f32 0.70710677, %v387_v51  ;;  %v589_v56 = vmul.f32 0.70710677, %v467_v52  ;;  %v382_v57 = vadd.f32 %v2060_v48, %v381_v53  ;;  %v462_v58 = vadd.f32 %v2060_v48, %v461_v54 }
 0x14c   : > { %v1462_v59 = vpop.f32.mrf.mxu0  ;;  %v1486_v62 = vpop.f32.mrf.mxu1  ;;  %v541_v12 = vmul.f32 0.5, %v387_v51  ;;  %v557_v14 = vmul.f32 0.5, %v467_v52 }
 0x14d   : > { %1598 = verf.f32 %v573_v55  ;;  %v572_v60 = vmul.f32 0.70710677, %v382_v57  ;;  %v397_v61 = vadd.f32 %v1462_v59, %v2060_v48  ;;  %v588_v63 = vmul.f32 0.70710677, %v462_v58 }
 0x14e   : > { %1600 = verf.f32 %v589_v56  ;;  %v391_v0 = vpop.f32.mrf.mxu0  ;;  %v477_v2 = vadd.f32 %v1486_v62, %v2060_v48  ;;  %v471_v3 = vpop.f32.mrf.mxu1  ;;  %v540_v23 = vmul.f32 0.5, %v382_v57  ;;  %v556_v31 = vmul.f32 0.5, %v462_v58 }
 0x14f   : > { %1602 = verf.f32 %v572_v60  ;;  %v575_v1 = vmul.f32 0.70710677, %v397_v61  ;;  %v2069_v4 = vadd.f32 %v2060_v48, %v391_v0  ;;  %v2072_v5 = vadd.f32 %v2060_v48, %v471_v3 }
 0x150   : > { %1604 = verf.f32 %v588_v63  ;;  %v591_v6 = vmul.f32 0.70710677, %v477_v2  ;;  %v1465_v10 = vpop.f32.mrf.mxu0  ;;  %v1489_v20 = vpop.f32.mrf.mxu1  ;;  %v543_v40 = vmul.f32 0.5, %v397_v61  ;;  %v559_v50 = vmul.f32 0.5, %v477_v2 }
 0x151   : > { %1606 = verf.f32 %v575_v1  ;;  %v574_v7 = vmul.f32 0.70710677, %v2069_v4  ;;  %v590_v8 = vmul.f32 0.70710677, %v2072_v5  ;;  %v407_v27 = vadd.f32 %v1465_v10, %v2060_v48 }
 0x152   : > { %1608 = verf.f32 %v591_v6  ;;  %v401_v19 = vpop.f32.mrf.mxu0  ;;  %v481_v28 = vpop.f32.mrf.mxu1  ;;  %v2095_v36 = vadd.f32 %v1489_v20, %v2060_v48  ;;  %v542_v57 = vmul.f32 0.5, %v2069_v4  ;;  %v558_v58 = vmul.f32 0.5, %v2072_v5 }
 0x153   : > { %1610 = verf.f32 %v574_v7  ;;  %v402_v24 = vadd.f32 %v2060_v48, %v401_v19  ;;  %v2090_v33 = vadd.f32 %v2060_v48, %v481_v28  ;;  %v577_v35 = vmul.f32 0.70710677, %v407_v27 }
 0x154   : > { %1612 = verf.f32 %v590_v8  ;;  %v593_v45 = vmul.f32 0.70710677, %v2095_v36  ;;  %v1468_v46 = vpop.f32.mrf.mxu0  ;;  %v1492_v55 = vpop.f32.mrf.mxu1  ;;  %v545_v8 = vmul.f32 0.5, %v407_v27 }
 0x155   : > { %v576_v32 = vmul.f32 0.70710677, %v402_v24  ;;  %v592_v42 = vmul.f32 0.70710677, %v2090_v33  ;;  %v417_v62 = vadd.f32 %v1468_v46, %v2060_v48  ;;  %v2128_v5 = vadd.f32 %v1492_v55, %v2060_v48 }
 0x156   : > { %v411_v54 = vpop.f32.mrf.mxu0  ;;  %v491_v63 = vpop.f32.mrf.mxu1  ;;  %v560_v20 = vmul.f32 0.5, %v2090_v33 }
 0x157   : > { %1614 = verf.f32 %v576_v32  ;;  %v412_v59 = vadd.f32 %v2060_v48, %v411_v54  ;;  %v2123_v1 = vadd.f32 %v2060_v48, %v491_v63  ;;  %v579_v4 = vmul.f32 0.70710677, %v417_v62 }
 0x158   : > { %1616 = verf.f32 %v577_v35  ;;  %v1495_v27 = vpop.f32.mrf.mxu1  ;;  %v563_v63 = vmul.f32 0.5, %v2128_v5 }
 0x159   : > { %1618 = verf.f32 %v592_v42  ;;  %v578_v0 = vmul.f32 0.70710677, %v412_v59  ;;  %v594_v10 = vmul.f32 0.70710677, %v2123_v1 }
 0x15a   : > { %v1599_v9 = vpop.eup %1598  ;;  %1620 = verf.f32 %v593_v45  ;;  %v501_v33 = vpop.f32.mrf.mxu1  ;;  %v546_v45 = vmul.f32 0.5, %v412_v59 }
 0x15b   : > { %v1601_v11 = vpop.eup %1600  ;;  %v637_v13 = vadd.f32 1.0, %v1599_v9  ;;  %v544_v9 = vmul.f32 0.5, %v402_v24  ;;  %1622 = verf.f32 %v578_v0  ;;  %v561_v24 = vmul.f32 0.5, %v2095_v36 }
 0x15c   : > { %v653_v15 = vadd.f32 1.0, %v1601_v11  ;;  %v1603_v16 = vpop.eup %1602  ;;  %1624 = verf.f32 %v579_v4 }
 0x15d   : > { %v2076_v17 = vmul.f32 %v637_v13, %v541_v12  ;;  %v1605_v18 = vpop.eup %1604  ;;  %v636_v22 = vadd.f32 1.0, %v1603_v16  ;;  %1626 = verf.f32 %v594_v10 }
 0x15e   : > { %v2078_v21 = vmul.f32 %v653_v15, %v557_v14  ;;  %v652_v26 = vadd.f32 1.0, %v1605_v18  ;;  %v1607_v30 = vpop.eup %1606  ;;  %v595_v14 = vmul.f32 0.70710677, %v2128_v5  ;;  %v1471_v15 = vpop.f32.mrf.mxu0 }
 0x15f   : > { %702 = vadd.xlane.f32.xlu0 %v2076_v17  ;;  %v2083_v25 = vmul.f32 %v636_v22, %v540_v23  ;;  %v765_v29 = vmul.f32 %v2076_v17, %v2076_v17  ;;  %v639_v38 = vadd.f32 1.0, %v1607_v30  ;;  %v1609_v39 = vpop.eup %1608  ;;  %v427_v32 = vadd.f32 %v1471_v15, %v2060_v48 }
 0x160   : > { %734 = vadd.xlane.f32.xlu1 %v2078_v21  ;;  %v2092_v34 = vmul.f32 %v652_v26, %v556_v31  ;;  %v781_v37 = vmul.f32 %v2078_v21, %v2078_v21  ;;  %v1611_v41 = vpop.eup %1610  ;;  %v655_v49 = vadd.f32 1.0, %v1609_v39  ;;  %1628 = verf.f32 %v595_v14  ;;  %v421_v26 = vpop.f32.mrf.mxu0 }
 0x161   : > { %v764_v43 = vmul.f32 %v2083_v25, %v2083_v25  ;;  %v1613_v44 = vpop.eup %1612  ;;  %v2104_v47 = vmul.f32 %v639_v38, %v543_v40  ;;  %v638_v52 = vadd.f32 1.0, %v1611_v41  ;;  %v422_v30 = vadd.f32 %v2060_v48, %v421_v26 }
 0x162   : > { %v780_v51 = vmul.f32 %v2092_v34, %v2092_v34  ;;  %v654_v53 = vadd.f32 1.0, %v1613_v44  ;;  %v2109_v56 = vmul.f32 %v655_v49, %v559_v50  ;;  %v581_v40 = vmul.f32 0.70710677, %v427_v32 }
 0x163   : > { %700 = vadd.xlane.f32.xlu0 %v2083_v25  ;;  %v2115_v60 = vmul.f32 %v638_v52, %v542_v57  ;;  %v767_v6 = vmul.f32 %v2104_v47, %v2104_v47  ;;  %v580_v36 = vmul.f32 0.70710677, %v422_v30  ;;  %v2160_v41 = vadd.f32 %v1495_v27, %v2060_v48 }
 0x164   : > { %798 = vadd.xlane.f32.xlu1 %v765_v29  ;;  %v2117_v61 = vmul.f32 %v654_v53, %v558_v58  ;;  %v1615_v3 = vpop.eup %1614  ;;  %v783_v16 = vmul.f32 %v2109_v56, %v2109_v56  ;;  %v547_v44 = vmul.f32 0.5, %v417_v62  ;;  %v1474_v53 = vpop.f32.mrf.mxu0  ;;  %v562_v58 = vmul.f32 0.5, %v2123_v1 }
 0x165   : > { %v766_v2 = vmul.f32 %v2115_v60, %v2115_v60  ;;  %v1617_v7 = vpop.eup %1616  ;;  %v640_v12 = vadd.f32 1.0, %v1615_v3  ;;  %1630 = verf.f32 %v580_v36  ;;  %v597_v52 = vmul.f32 0.70710677, %v2160_v41 }
 0x166   : > { %v782_v11 = vmul.f32 %v2117_v61, %v2117_v61  ;;  %v1619_v13 = vpop.eup %1618  ;;  %v641_v18 = vadd.f32 1.0, %v1617_v7  ;;  %1632 = verf.f32 %v581_v40  ;;  %v431_v0 = vpop.f32.mrf.mxu0  ;;  %v437_v1 = vadd.f32 %v1474_v53, %v2060_v48 }
 0x167   : > { %732 = vadd.xlane.f32.xlu0 %v2092_v34  ;;  %v1621_v19 = vpop.eup %1620  ;;  %v2139_v22 = vmul.f32 %v640_v12, %v544_v9  ;;  %v656_v23 = vadd.f32 1.0, %v1619_v13  ;;  %v565_v40 = vmul.f32 0.5, %v2160_v41 }
 0x168   : > { %830 = vadd.xlane.f32.xlu1 %v781_v37  ;;  %v2142_v28 = vmul.f32 %v641_v18, %v545_v8  ;;  %v657_v29 = vadd.f32 1.0, %v1621_v19  ;;  %v2155_v37 = vadd.f32 %v2060_v48, %v501_v33  ;;  %v1623_v39 = vpop.eup %1622  ;;  %v583_v13 = vmul.f32 0.70710677, %v437_v1 }
 0x169   : > { %v2147_v31 = vmul.f32 %v656_v23, %v560_v20  ;;  %v768_v38 = vmul.f32 %v2139_v22, %v2139_v22  ;;  %v642_v50 = vadd.f32 1.0, %v1623_v39  ;;  %v549_v18 = vmul.f32 0.5, %v427_v32 }
 0x16a   : > { %v2150_v35 = vmul.f32 %v657_v29, %v561_v24  ;;  %v769_v42 = vmul.f32 %v2142_v28, %v2142_v28  ;;  %v596_v46 = vmul.f32 0.70710677, %v2155_v37  ;;  %v548_v19 = vmul.f32 0.5, %v422_v30  ;;  %v1477_v29 = vpop.f32.mrf.mxu0 }
 0x16b   : > { %796 = vadd.xlane.f32.xlu0 %v764_v43  ;;  %v1625_v43 = vpop.eup %1624  ;;  %v784_v49 = vmul.f32 %v2147_v31, %v2147_v31  ;;  %v2171_v59 = vmul.f32 %v642_v50, %v546_v45  ;;  %v564_v30 = vmul.f32 0.5, %v2155_v37  ;;  %v447_v37 = vadd.f32 %v1477_v29, %v2060_v48 }
 0x16c   : > { %706 = vadd.xlane.f32.xlu1 %v2104_v47  ;;  %v785_v54 = vmul.f32 %v2150_v35, %v2150_v35  ;;  %v643_v55 = vadd.f32 1.0, %v1625_v43  ;;  %1634 = verf.f32 %v596_v46 }
 0x16d   : > { %1636 = verf.f32 %v597_v52 }
 0x16e   : > { %v2174_v3 = vmul.f32 %v643_v55, %v547_v44  ;;  %v585_v55 = vmul.f32 0.70710677, %v447_v37 }
 0x16f   : > { %828 = vadd.xlane.f32.xlu0 %v780_v51  ;;  %v1627_v51 = vpop.eup %1626 }
 0x170   : > { %738 = vadd.xlane.f32.xlu1 %v2109_v56  ;;  %v1629_v57 = vpop.eup %1628  ;;  %v658_v62 = vadd.f32 1.0, %v1627_v51  ;;  %v771_v15 = vmul.f32 %v2174_v3, %v2174_v3 }
 0x171   : > { %v659_v4 = vadd.f32 1.0, %v1629_v57 }
 0x172   : > { %v2179_v7 = vmul.f32 %v658_v62, %v562_v58  ;;  %v1631_v12 = vpop.eup %1630 }
 0x173   : > { %736 = vadd.xlane.f32.xlu0 %v2117_v61  ;;  %v2182_v9 = vmul.f32 %v659_v4, %v563_v63  ;;  %v644_v24 = vadd.f32 1.0, %v1631_v12  ;;  %v551_v63 = vmul.f32 0.5, %v437_v1 }
 0x174   : > { %704 = vadd.xlane.f32.xlu1 %v2115_v60  ;;  %v786_v23 = vmul.f32 %v2179_v7, %v2179_v7 }
 0x175   : > { %v787_v33 = vmul.f32 %v2182_v9, %v2182_v9  ;;  %v2203_v32 = vmul.f32 %v644_v24, %v548_v19 }
 0x177   : > { %800 = vadd.xlane.f32.xlu0 %v766_v2  ;;  %v1498_v2 = vpop.f32.mrf.mxu1  ;;  %v772_v53 = vmul.f32 %v2203_v32, %v2203_v32 }
 0x178   : > { %802 = vadd.xlane.f32.xlu1 %v767_v6  ;;  %v432_v6 = vadd.f32 %v2060_v48, %v431_v0  ;;  %v2192_v14 = vadd.f32 %v1498_v2, %v2060_v48 }
 0x179   : > { %v511_v8 = vpop.f32.mrf.mxu1 }
 0x17a   : > { %v582_v5 = vmul.f32 0.70710677, %v432_v6  ;;  %v2187_v10 = vadd.f32 %v2060_v48, %v511_v8  ;;  %v599_v27 = vmul.f32 0.70710677, %v2192_v14  ;;  %v550_v0 = vmul.f32 0.5, %v432_v6 }
 0x17b   : > { %832 = vadd.xlane.f32.xlu0 %v782_v11  ;;  %v770_v11 = vmul.f32 %v2171_v59, %v2171_v59  ;;  %v1501_v43 = vpop.f32.mrf.mxu1  ;;  %v567_v19 = vmul.f32 0.5, %v2192_v14 }
 0x17c   : > { %834 = vadd.xlane.f32.xlu1 %v783_v16  ;;  %v1633_v16 = vpop.eup %1632  ;;  %1638 = verf.f32 %v582_v5  ;;  %v598_v20 = vmul.f32 0.70710677, %v2187_v10  ;;  %v2224_v57 = vadd.f32 %v1501_v43, %v2060_v48  ;;  %v566_v6 = vmul.f32 0.5, %v2187_v10 }
 0x17d   : > { %v1635_v26 = vpop.eup %1634  ;;  %1640 = verf.f32 %v583_v13  ;;  %v645_v36 = vadd.f32 1.0, %v1633_v16  ;;  %v521_v50 = vpop.f32.mrf.mxu1 }
 0x17e   : > { %1642 = verf.f32 %v598_v20  ;;  %v660_v39 = vadd.f32 1.0, %v1635_v26  ;;  %v2219_v52 = vadd.f32 %v2060_v48, %v521_v50  ;;  %v553_v50 = vmul.f32 0.5, %v447_v37 }
 0x17f   : > { %708 = vadd.xlane.f32.xlu0 %v2139_v22  ;;  %1644 = verf.f32 %v599_v27  ;;  %v2206_v44 = vmul.f32 %v645_v36, %v549_v18 }
 0x180   : > { %710 = vadd.xlane.f32.xlu1 %v2142_v28  ;;  %v600_v2 = vmul.f32 0.70710677, %v2219_v52  ;;  %v568_v37 = vmul.f32 0.5, %v2219_v52 }
 0x181   : > { %v773_v58 = vmul.f32 %v2206_v44, %v2206_v44 }
 0x183   : > { %740 = vadd.xlane.f32.xlu0 %v2147_v31 }
 0x184   : > { %742 = vadd.xlane.f32.xlu1 %v2150_v35 }
 0x187   : > { %804 = vadd.xlane.f32.xlu0 %v768_v38  ;;  %v1637_v38 = vpop.eup %1636 }
 0x188   : > { %806 = vadd.xlane.f32.xlu1 %v769_v42  ;;  %v441_v42 = vpop.f32.mrf.mxu0  ;;  %v661_v45 = vadd.f32 1.0, %v1637_v38 }
 0x189   : > { %v442_v46 = vadd.f32 %v2060_v48, %v441_v42 }
 0x18a   : > { %v2214_v51 = vmul.f32 %v661_v45, %v565_v40  ;;  %v1480_v12 = vpop.f32.mrf.mxu0 }
 0x18b   : > { %836 = vadd.xlane.f32.xlu0 %v784_v49  ;;  %v2211_v49 = vmul.f32 %v660_v39, %v564_v30  ;;  %v584_v41 = vmul.f32 0.70710677, %v442_v46  ;;  %v457_v10 = vadd.f32 %v1480_v12, %v2060_v48 }
 0x18c   : > { %838 = vadd.xlane.f32.xlu1 %v785_v54  ;;  %v1639_v54 = vpop.eup %1638  ;;  %v789_v13 = vmul.f32 %v2214_v51, %v2214_v51  ;;  %v451_v20 = vpop.f32.mrf.mxu0 }
 0x18d   : > { %v1641_v62 = vpop.eup %1640  ;;  %1646 = verf.f32 %v584_v41  ;;  %v788_v4 = vmul.f32 %v2211_v49, %v2211_v49  ;;  %v646_v8 = vadd.f32 1.0, %v1639_v54  ;;  %v452_v27 = vadd.f32 %v2060_v48, %v451_v20 }
 0x18e   : > { %v1643_v5 = vpop.eup %1642  ;;  %1648 = verf.f32 %v585_v55  ;;  %v587_v40 = vmul.f32 0.70710677, %v457_v10  ;;  %v552_v41 = vmul.f32 0.5, %v442_v46  ;;  %v555_v20 = vmul.f32 0.5, %v457_v10 }
 0x18f   : > { %712 = vadd.xlane.f32.xlu0 %v2171_v59  ;;  %v1645_v16 = vpop.eup %1644  ;;  %1650 = verf.f32 %v600_v2  ;;  %v2235_v1 = vmul.f32 %v646_v8, %v550_v0  ;;  %v662_v18 = vadd.f32 1.0, %v1643_v5  ;;  %v586_v14 = vmul.f32 0.70710677, %v452_v27 }
 0x190   : > { %714 = vadd.xlane.f32.xlu1 %v2174_v3  ;;  %v663_v26 = vadd.f32 1.0, %v1645_v16  ;;  %v554_v16 = vmul.f32 0.5, %v452_v27 }
 0x191   : > { %v2243_v29 = vmul.f32 %v662_v18, %v566_v6  ;;  %v774_v30 = vmul.f32 %v2235_v1, %v2235_v1 }
 0x192   : > { %v2246_v36 = vmul.f32 %v663_v26, %v567_v19 }
 0x193   : > { %744 = vadd.xlane.f32.xlu0 %v2179_v7  ;;  %v790_v54 = vmul.f32 %v2243_v29, %v2243_v29 }
 0x194   : > { %746 = vadd.xlane.f32.xlu1 %v2182_v9 }
 0x197   : > { %808 = vadd.xlane.f32.xlu0 %v770_v11  ;;  %v601_v11 = vmul.f32 0.70710677, %v2224_v57 }
 0x198   : > { %810 = vadd.xlane.f32.xlu1 %v771_v15  ;;  %v647_v15 = vadd.f32 1.0, %v1641_v62 }
 0x199   : > { %1652 = verf.f32 %v601_v11 }
 0x19a   : > { %v2238_v24 = vmul.f32 %v647_v15, %v551_v63  ;;  %v1647_v39 = vpop.eup %1646  ;;  %1654 = verf.f32 %v586_v14 }
 0x19b   : > { %840 = vadd.xlane.f32.xlu0 %v786_v23  ;;  %v1504_v23 = vpop.f32.mrf.mxu1  ;;  %v1649_v45 = vpop.eup %1648  ;;  %v648_v55 = vadd.f32 1.0, %v1647_v39  ;;  %1656 = verf.f32 %v587_v40 }
 0x19c   : > { %842 = vadd.xlane.f32.xlu1 %v787_v33  ;;  %v537_v42 = vadd.f32 %v1504_v23, %v2060_v48  ;;  %v775_v43 = vmul.f32 %v2238_v24, %v2238_v24  ;;  %v649_v63 = vadd.f32 1.0, %v1649_v45 }
 0x19d   : > { %v531_v33 = vpop.f32.mrf.mxu1  ;;  %v2261_v46 = vmul.f32 %v648_v55, %v552_v41 }
 0x19e   : > { %v532_v38 = vadd.f32 %v2060_v48, %v531_v33  ;;  %v603_v62 = vmul.f32 0.70710677, %v537_v42  ;;  %v791_v48 = vmul.f32 %v2246_v36, %v2246_v36  ;;  %v2264_v8 = vmul.f32 %v649_v63, %v553_v50 }
 0x19f   : > { %716 = vadd.xlane.f32.xlu0 %v2203_v32  ;;  %v776_v52 = vmul.f32 %v2261_v46, %v2261_v46  ;;  %v571_v40 = vmul.f32 0.5, %v537_v42 }
 0x1a0   : > { %718 = vadd.xlane.f32.xlu1 %v2206_v44  ;;  %v570_v14 = vmul.f32 0.5, %v532_v38 }
 0x1a3   : > { %748 = vadd.xlane.f32.xlu0 %v2211_v49 }
 0x1a4   : > { %750 = vadd.xlane.f32.xlu1 %v2214_v51 }
 0x1a7   : > { %812 = vadd.xlane.f32.xlu0 %v772_v53  ;;  %v602_v53 = vmul.f32 0.70710677, %v532_v38 }
 0x1a8   : > { %814 = vadd.xlane.f32.xlu1 %v773_v58  ;;  %v1651_v58 = vpop.eup %1650 }
 0x1a9   : > { %v1653_v0 = vpop.eup %1652  ;;  %1658 = verf.f32 %v602_v53  ;;  %v664_v2 = vadd.f32 1.0, %v1651_v58 }
 0x1aa   : > { %1660 = verf.f32 %v603_v62  ;;  %v665_v5 = vadd.f32 1.0, %v1653_v0 }
 0x1ab   : > { %844 = vadd.xlane.f32.xlu0 %v788_v4  ;;  %v569_v4 = vmul.f32 0.5, %v2224_v57  ;;  %v2268_v11 = vmul.f32 %v664_v2, %v568_v37  ;;  %v1655_v57 = vpop.eup %1654 }
 0x1ac   : > { %846 = vadd.xlane.f32.xlu1 %v789_v13  ;;  %v777_v13 = vmul.f32 %v2264_v8, %v2264_v8  ;;  %v1657_v15 = vpop.eup %1656  ;;  %v650_v18 = vadd.f32 1.0, %v1655_v57 }
 0x1ad   : > { %v2270_v12 = vmul.f32 %v665_v5, %v569_v4  ;;  %v792_v6 = vmul.f32 %v2268_v11, %v2268_v11  ;;  %v651_v26 = vadd.f32 1.0, %v1657_v15 }
 0x1af   : > { %720 = vadd.xlane.f32.xlu0 %v2235_v1  ;;  %v793_v23 = vmul.f32 %v2270_v12, %v2270_v12 }
 0x1b0   : > { %722 = vadd.xlane.f32.xlu1 %v2238_v24 }
 0x1b3   : > { %752 = vadd.xlane.f32.xlu0 %v2243_v29 }
 0x1b4   : > { %754 = vadd.xlane.f32.xlu1 %v2246_v36 }
 0x1b6   : > { %v1659_v19 = vpop.eup %1658 }
 0x1b7   : > { %816 = vadd.xlane.f32.xlu0 %v774_v30  ;;  %v1661_v33 = vpop.eup %1660  ;;  %v2282_v30 = vmul.f32 %v650_v18, %v554_v16  ;;  %v666_v39 = vadd.f32 1.0, %v1659_v19 }
 0x1b8   : > { %818 = vadd.xlane.f32.xlu1 %v775_v43  ;;  %v2284_v43 = vmul.f32 %v651_v26, %v555_v20  ;;  %v667_v27 = vadd.f32 1.0, %v1661_v33 }
 0x1b9   : > { %v2288_v10 = vmul.f32 %v666_v39, %v570_v14  ;;  %v778_v38 = vmul.f32 %v2282_v30, %v2282_v30 }
 0x1ba   : > { %v2290_v45 = vmul.f32 %v667_v27, %v571_v40  ;;  %v779_v42 = vmul.f32 %v2284_v43, %v2284_v43 }
 0x1bb   : > { %848 = vadd.xlane.f32.xlu0 %v790_v54  ;;  %v794_v50 = vmul.f32 %v2288_v10, %v2288_v10 }
 0x1bc   : > { %850 = vadd.xlane.f32.xlu1 %v791_v48  ;;  %v795_v41 = vmul.f32 %v2290_v45, %v2290_v45 }
 0x1bf   : > { %724 = vadd.xlane.f32.xlu0 %v2261_v46 }
 0x1c0   : > { %726 = vadd.xlane.f32.xlu1 %v2264_v8 }
 0x1c3   : > { %756 = vadd.xlane.f32.xlu0 %v2268_v11 }
 0x1c4   : > { %758 = vadd.xlane.f32.xlu1 %v2270_v12 }
 0x1c7   : > { %820 = vadd.xlane.f32.xlu0 %v776_v52 }
 0x1c8   : > { %822 = vadd.xlane.f32.xlu1 %v777_v13 }
 0x1cb   : > { %852 = vadd.xlane.f32.xlu0 %v792_v6 }
 0x1cc   : > { %854 = vadd.xlane.f32.xlu1 %v793_v23 }
 0x1cf   : > { %728 = vadd.xlane.f32.xlu0 %v2282_v30 }
 0x1d0   : > { %730 = vadd.xlane.f32.xlu1 %v2284_v43 }
 0x1d3   : > { %760 = vadd.xlane.f32.xlu0 %v2288_v10 }
 0x1d4   : > { %762 = vadd.xlane.f32.xlu1 %v2290_v45 }
 0x1d7   : > { %824 = vadd.xlane.f32.xlu0 %v778_v38 }
 0x1d8   : > { %826 = vadd.xlane.f32.xlu1 %v779_v42 }
 0x1db   : > { %856 = vadd.xlane.f32.xlu0 %v794_v50 }
 0x1dc   : > { %858 = vadd.xlane.f32.xlu1 %v795_v41 }
 0x1e8   : > { %v703_v53 = vpop.xlane.xlu0 %702 }
 0x1e9   : > { %v735_v54 = vpop.xlane.xlu1 %734  ;;  %v862_v55 = vmul.f32 0.0078125, %v703_v53 }
 0x1ea   : > { %v2302_v48 = vmul.f32 0.0078125, %v735_v54 }
 0x1eb   : > { %v926_v63 = vmul.f32 %v862_v55, %v862_v55 }
 0x1ec   : > { %v701_v58 = vpop.xlane.xlu0 %700  ;;  %v942_v52 = vmul.f32 %v2302_v48, %v2302_v48 }
 0x1ed   : > { %v799_v62 = vpop.xlane.xlu1 %798  ;;  %v2304_v4 = vmul.f32 0.0078125, %v701_v58 }
 0x1ee   : > { %v894_v0 = vmul.f32 0.0078125, %v799_v62 }
 0x1ef   : > { %v925_v18 = vmul.f32 %v2304_v4, %v2304_v4 }
 0x1f0   : > { %v958_v37 = vsub.f32 %v894_v0, %v926_v63  ;;  %v733_v2 = vpop.xlane.xlu0 %732 }
 0x1f1   : > { %v831_v5 = vpop.xlane.xlu1 %830  ;;  %v2310_v19 = vmul.f32 0.0078125, %v733_v2 }
 0x1f2   : > { %v990_v57 = vmax.f32 %v958_v37, 0.0  ;;  %v910_v13 = vmul.f32 0.0078125, %v831_v5 }
 0x1f3   : > { %v941_v40 = vmul.f32 %v2310_v19, %v2310_v19 }
 0x1f4   : > { %v1022_v15 = vadd.f32 1e-12, %v990_v57  ;;  %v974_v16 = vsub.f32 %v910_v13, %v942_v52  ;;  %v797_v6 = vpop.xlane.xlu0 %796  ;;  %v1086_v13 = vsub.f32 %v2076_v17, %v862_v55  ;;  %v2337_v17 = vld [vmem:[%s2653_s4] ss:$0 sm:$0xff] }
 0x1f5   : > { %v707_v20 = vpop.xlane.xlu1 %706  ;;  %v893_v23 = vmul.f32 0.0078125, %v797_v6 }
 0x1f6   : > { %1662 = vrsqrt.f32 %v1022_v15  ;;  %v1006_v26 = vmax.f32 %v974_v16, 0.0  ;;  %v2314_v62 = vmul.f32 0.0078125, %v707_v20  ;;  %v2330_v20 = vld [vmem:[%s2652_s3] ss:$0 sm:$0xff] }
 0x1f7   : > { %v957_v33 = vsub.f32 %v893_v23, %v925_v18 }
 0x1f8   : > { %v1038_v14 = vadd.f32 1e-12, %v1006_v26  ;;  %v829_v39 = vpop.xlane.xlu0 %828  ;;  %v928_v15 = vmul.f32 %v2314_v62, %v2314_v62 }
 0x1f9   : > { %v989_v27 = vmax.f32 %v957_v33, 0.0  ;;  %v739_v38 = vpop.xlane.xlu1 %738  ;;  %v909_v42 = vmul.f32 0.0078125, %v829_v39  ;;  %v1102_v39 = vsub.f32 %v2078_v21, %v2302_v48 }
 0x1fa   : > { %1664 = vrsqrt.f32 %v1038_v14  ;;  %v2325_v16 = vmul.f32 0.0078125, %v739_v38 }
 0x1fb   : > { %v1021_v50 = vadd.f32 1e-12, %v989_v27  ;;  %v973_v41 = vsub.f32 %v909_v42, %v941_v40 }
 0x1fc   : > { %v737_v53 = vpop.xlane.xlu0 %736 }
 0x1fd   : > { %1666 = vrsqrt.f32 %v1021_v50  ;;  %v1005_v54 = vmax.f32 %v973_v41, 0.0  ;;  %v705_v58 = vpop.xlane.xlu1 %704  ;;  %v2320_v5 = vmul.f32 0.0078125, %v737_v53  ;;  %v944_v50 = vmul.f32 %v2325_v16, %v2325_v16 }
 0x1fe   : > { %v2316_v63 = vmul.f32 0.0078125, %v705_v58 }
 0x1ff   : > { %v1037_v0 = vadd.f32 1e-12, %v1005_v54  ;;  %v943_v55 = vmul.f32 %v2320_v5, %v2320_v5 }
 0x200   : > { %v801_v37 = vpop.xlane.xlu0 %800  ;;  %v927_v2 = vmul.f32 %v2316_v63, %v2316_v63 }
 0x201   : > { %1668 = vrsqrt.f32 %v1037_v0  ;;  %v803_v52 = vpop.xlane.xlu1 %802  ;;  %v895_v57 = vmul.f32 0.0078125, %v801_v37 }
 0x202   : > { %v896_v6 = vmul.f32 0.0078125, %v803_v52 }
 0x203   : > { %v1663_v18 = vpop.eup %1662  ;;  %v959_v23 = vsub.f32 %v895_v57, %v927_v2  ;;  %v1085_v57 = vsub.f32 %v2083_v25, %v2304_v4 }
 0x204   : > { %v1118_v26 = vmul.f32 %v1663_v18, %v1086_v13  ;;  %v960_v33 = vsub.f32 %v896_v6, %v928_v15  ;;  %v833_v14 = vpop.xlane.xlu0 %832 }
 0x205   : > { %v991_v40 = vmax.f32 %v959_v23, 0.0  ;;  %v835_v27 = vpop.xlane.xlu1 %834  ;;  %v911_v38 = vmul.f32 0.0078125, %v833_v14 }
 0x206   : > { %v1157_v42 = vmul.f32 %v2330_v20, %v1118_v26  ;;  %v992_v41 = vmax.f32 %v960_v33, 0.0  ;;  %v912_v53 = vmul.f32 0.0078125, %v835_v27 }
 0x207   : > { %v1665_v21 = vpop.eup %1664  ;;  %v1023_v48 = vadd.f32 1e-12, %v991_v40  ;;  %v975_v54 = vsub.f32 %v911_v38, %v943_v55 }
 0x208   : > { %v1196_v58 = vadd.f32 %v2337_v17, %v1157_v42  ;;  %v1134_v0 = vmul.f32 %v1665_v21, %v1102_v39  ;;  %v1024_v37 = vadd.f32 1e-12, %v992_v41  ;;  %v976_v2 = vsub.f32 %v912_v53, %v944_v50  ;;  %v709_v52 = vpop.xlane.xlu0 %708 }
 0x209   : > { %1670 = vrsqrt.f32 %v1023_v48  ;;  %v1007_v13 = vmax.f32 %v975_v54, 0.0  ;;  %v711_v15 = vpop.xlane.xlu1 %710  ;;  %v1101_v39 = vsub.f32 %v2092_v34, %v2310_v19  ;;  %v2357_v40 = vmul.f32 0.0078125, %v709_v52 }
 0x20a   : > { %v1667_v6 = vpop.eup %1666  ;;  %1228 = vst [vmem:[%s2349_s23 + $0x8] sm:$0xff] %v1196_v58  ;;  %v1173_v18 = vmul.f32 %v2330_v20, %v1134_v0  ;;  %1672 = vrsqrt.f32 %v1024_v37  ;;  %v1008_v23 = vmax.f32 %v976_v2, 0.0  ;;  %v2360_v42 = vmul.f32 0.0078125, %v711_v15 }
 0x20b   : > { %v1117_v26 = vmul.f32 %v1667_v6, %v1085_v57  ;;  %v1039_v33 = vadd.f32 1e-12, %v1007_v13  ;;  %v929_v34 = vmul.f32 %v2357_v40, %v2357_v40  ;;  %v1087_v15 = vsub.f32 %v2115_v60, %v2316_v63 }
 0x20c   : > { %v1212_v14 = vadd.f32 %v2337_v17, %v1173_v18  ;;  %v1040_v25 = vadd.f32 1e-12, %v1008_v23  ;;  %v741_v4 = vpop.xlane.xlu0 %740  ;;  %v930_v58 = vmul.f32 %v2360_v42, %v2360_v42 }
 0x20d   : > { %v1156_v55 = vmul.f32 %v2330_v20, %v1117_v26  ;;  %1674 = vrsqrt.f32 %v1039_v33  ;;  %v743_v27 = vpop.xlane.xlu1 %742  ;;  %v2367_v19 = vmul.f32 0.0078125, %v741_v4 }
 0x20e   : > { %v1669_v38 = vpop.eup %1668  ;;  %1244 = vst [vmem:[%s2349_s23 + $0x88] sm:$0xff] %v1212_v14  ;;  %1676 = vrsqrt.f32 %v1040_v25  ;;  %v2371_v0 = vmul.f32 0.0078125, %v743_v27  ;;  %v1088_v14 = vsub.f32 %v2104_v47, %v2314_v62 }
 0x20f   : > { %v1195_v50 = vadd.f32 %v2337_v17, %v1156_v55  ;;  %v1133_v41 = vmul.f32 %v1669_v38, %v1101_v39  ;;  %v945_v6 = vmul.f32 %v2367_v19, %v2367_v19 }
 0x210   : > { %v805_v53 = vpop.xlane.xlu0 %804  ;;  %v946_v25 = vmul.f32 %v2371_v0, %v2371_v0 }
 0x211   : > { %1227 = vst [vmem:[%s2349_s23] sm:$0xff] %v1195_v50  ;;  %v1172_v21 = vmul.f32 %v2330_v20, %v1133_v41  ;;  %v807_v48 = vpop.xlane.xlu1 %806  ;;  %v897_v54 = vmul.f32 0.0078125, %v805_v53 }
 0x212   : > { %v898_v37 = vmul.f32 0.0078125, %v807_v48 }
 0x213   : > { %v1211_v2 = vadd.f32 %v2337_v17, %v1172_v21  ;;  %v961_v52 = vsub.f32 %v897_v54, %v929_v34  ;;  %v1103_v21 = vsub.f32 %v2117_v61, %v2320_v5  ;;  %v1104_v54 = vsub.f32 %v2109_v56, %v2325_v16 }
 0x214   : > { %v962_v57 = vsub.f32 %v898_v37, %v930_v58  ;;  %v837_v13 = vpop.xlane.xlu0 %836 }
 0x215   : > { %1243 = vst [vmem:[%s2349_s23 + $0x80] sm:$0xff] %v1211_v2  ;;  %v993_v18 = vmax.f32 %v961_v52, 0.0  ;;  %v839_v23 = vpop.xlane.xlu1 %838  ;;  %v913_v26 = vmul.f32 0.0078125, %v837_v13 }
 0x216   : > { %v1671_v33 = vpop.eup %1670  ;;  %v994_v4 = vmax.f32 %v962_v57, 0.0  ;;  %v914_v39 = vmul.f32 0.0078125, %v839_v23 }
 0x217   : > { %v1673_v55 = vpop.eup %1672  ;;  %v1119_v27 = vmul.f32 %v1671_v33, %v1087_v15  ;;  %v1025_v38 = vadd.f32 1e-12, %v993_v18  ;;  %v977_v50 = vsub.f32 %v913_v26, %v945_v6 }
 0x218   : > { %v1120_v60 = vmul.f32 %v1673_v55, %v1088_v14  ;;  %v1026_v63 = vadd.f32 1e-12, %v994_v4  ;;  %v978_v41 = vsub.f32 %v914_v39, %v946_v25  ;;  %v713_v53 = vpop.xlane.xlu0 %712 }
 0x219   : > { %v1158_v34 = vmul.f32 %v2330_v20, %v1119_v27  ;;  %1678 = vrsqrt.f32 %v1025_v38  ;;  %v1009_v47 = vmax.f32 %v977_v50, 0.0  ;;  %v715_v62 = vpop.xlane.xlu1 %714  ;;  %v2393_v56 = vmul.f32 0.0078125, %v713_v53 }
 0x21a   : > { %v1675_v48 = vpop.eup %1674  ;;  %v1159_v58 = vmul.f32 %v2330_v20, %v1120_v60  ;;  %1680 = vrsqrt.f32 %v1026_v63  ;;  %v1010_v37 = vmax.f32 %v978_v41, 0.0  ;;  %v2397_v26 = vmul.f32 0.0078125, %v715_v62 }
 0x21b   : > { %v1677_v2 = vpop.eup %1676  ;;  %v1197_v52 = vadd.f32 %v2337_v17, %v1158_v34  ;;  %v1135_v57 = vmul.f32 %v1675_v48, %v1103_v21  ;;  %v1041_v61 = vadd.f32 1e-12, %v1009_v47  ;;  %v931_v4 = vmul.f32 %v2393_v56, %v2393_v56 }
 0x21c   : > { %v1198_v5 = vadd.f32 %v2337_v17, %v1159_v58  ;;  %v1136_v13 = vmul.f32 %v1677_v2, %v1104_v54  ;;  %v1042_v15 = vadd.f32 1e-12, %v1010_v37  ;;  %v745_v6 = vpop.xlane.xlu0 %744  ;;  %v932_v38 = vmul.f32 %v2397_v26, %v2397_v26 }
 0x21d   : > { %1229 = vst [vmem:[%s2349_s23 + $0x10] sm:$0xff] %v1197_v52  ;;  %v1174_v18 = vmul.f32 %v2330_v20, %v1135_v57  ;;  %1682 = vrsqrt.f32 %v1041_v61  ;;  %v747_v16 = vpop.xlane.xlu1 %746  ;;  %v2404_v39 = vmul.f32 0.0078125, %v745_v6  ;;  %v1089_v21 = vsub.f32 %v2139_v22, %v2357_v40 }
 0x21e   : > { %1230 = vst [vmem:[%s2349_s23 + $0x18] sm:$0xff] %v1198_v5  ;;  %v1175_v23 = vmul.f32 %v2330_v20, %v1136_v13  ;;  %1684 = vrsqrt.f32 %v1042_v15  ;;  %v2409_v50 = vmul.f32 0.0078125, %v747_v16  ;;  %v1090_v58 = vsub.f32 %v2142_v28, %v2360_v42 }
 0x21f   : > { %v1213_v33 = vadd.f32 %v2337_v17, %v1174_v18  ;;  %v947_v34 = vmul.f32 %v2404_v39, %v2404_v39  ;;  %v1105_v18 = vsub.f32 %v2147_v31, %v2367_v19 }
 0x220   : > { %v1214_v14 = vadd.f32 %v2337_v17, %v1175_v23  ;;  %v809_v25 = vpop.xlane.xlu0 %808  ;;  %v948_v37 = vmul.f32 %v2409_v50, %v2409_v50 }
 0x221   : > { %1245 = vst [vmem:[%s2349_s23 + $0x90] sm:$0xff] %v1213_v33  ;;  %v811_v55 = vpop.xlane.xlu1 %810  ;;  %v899_v27 = vmul.f32 0.0078125, %v809_v25  ;;  %v1106_v33 = vsub.f32 %v2150_v35, %v2371_v0 }
 0x222   : > { %1246 = vst [vmem:[%s2349_s23 + $0x98] sm:$0xff] %v1214_v14  ;;  %v900_v60 = vmul.f32 0.0078125, %v811_v55 }
 0x223   : > { %v963_v63 = vsub.f32 %v899_v27, %v931_v4 }
 0x224   : > { %v964_v41 = vsub.f32 %v900_v60, %v932_v38  ;;  %v841_v53 = vpop.xlane.xlu0 %840 }
 0x225   : > { %v995_v47 = vmax.f32 %v963_v63, 0.0  ;;  %v843_v62 = vpop.xlane.xlu1 %842  ;;  %v915_v48 = vmul.f32 0.0078125, %v841_v53 }
 0x226   : > { %v1679_v54 = vpop.eup %1678  ;;  %v996_v2 = vmax.f32 %v964_v41, 0.0  ;;  %v916_v52 = vmul.f32 0.0078125, %v843_v62 }
 0x227   : > { %v1681_v57 = vpop.eup %1680  ;;  %v1121_v61 = vmul.f32 %v1679_v54, %v1089_v21  ;;  %v1027_v5 = vadd.f32 1e-12, %v995_v47  ;;  %v979_v13 = vsub.f32 %v915_v48, %v947_v34 }
 0x228   : > { %v1122_v22 = vmul.f32 %v1681_v57, %v1090_v58  ;;  %v1028_v40 = vadd.f32 1e-12, %v996_v2  ;;  %v980_v15 = vsub.f32 %v916_v52, %v948_v37  ;;  %v717_v6 = vpop.xlane.xlu0 %716 }
 0x229   : > { %v1160_v16 = vmul.f32 %v2330_v20, %v1121_v61  ;;  %1686 = vrsqrt.f32 %v1027_v5  ;;  %v1011_v28 = vmax.f32 %v979_v13, 0.0  ;;  %v719_v42 = vpop.xlane.xlu1 %718  ;;  %v2429_v35 = vmul.f32 0.0078125, %v717_v6 }
 0x22a   : > { %v1683_v23 = vpop.eup %1682  ;;  %v1161_v14 = vmul.f32 %v2330_v20, %v1122_v22  ;;  %1688 = vrsqrt.f32 %v1028_v40  ;;  %v1012_v25 = vmax.f32 %v980_v15, 0.0  ;;  %v2433_v21 = vmul.f32 0.0078125, %v719_v42 }
 0x22b   : > { %v1685_v4 = vpop.eup %1684  ;;  %v1199_v55 = vadd.f32 %v2337_v17, %v1160_v16  ;;  %v1137_v27 = vmul.f32 %v1683_v23, %v1105_v18  ;;  %v1043_v31 = vadd.f32 1e-12, %v1011_v28  ;;  %v933_v48 = vmul.f32 %v2429_v35, %v2429_v35 }
 0x22c   : > { %v1200_v19 = vadd.f32 %v2337_v17, %v1161_v14  ;;  %v1138_v38 = vmul.f32 %v1685_v4, %v1106_v33  ;;  %v1044_v60 = vadd.f32 1e-12, %v1012_v25  ;;  %v749_v63 = vpop.xlane.xlu0 %748  ;;  %v934_v2 = vmul.f32 %v2433_v21, %v2433_v21 }
 0x22d   : > { %1231 = vst [vmem:[%s2349_s23 + $0x20] sm:$0xff] %v1199_v55  ;;  %v1176_v41 = vmul.f32 %v2330_v20, %v1137_v27  ;;  %1690 = vrsqrt.f32 %v1043_v31  ;;  %v751_v0 = vpop.xlane.xlu1 %750  ;;  %v2440_v54 = vmul.f32 0.0078125, %v749_v63  ;;  %v1091_v22 = vsub.f32 %v2171_v59, %v2393_v56 }
 0x22e   : > { %1232 = vst [vmem:[%s2349_s23 + $0x28] sm:$0xff] %v1200_v19  ;;  %v1177_v53 = vmul.f32 %v2330_v20, %v1138_v38  ;;  %1692 = vrsqrt.f32 %v1044_v60  ;;  %v2445_v52 = vmul.f32 0.0078125, %v751_v0  ;;  %v1092_v28 = vsub.f32 %v2174_v3, %v2397_v26 }
 0x22f   : > { %v1215_v34 = vadd.f32 %v2337_v17, %v1176_v41  ;;  %v949_v40 = vmul.f32 %v2440_v54, %v2440_v54  ;;  %v1107_v19 = vsub.f32 %v2179_v7, %v2404_v39  ;;  %v1108_v63 = vsub.f32 %v2182_v9, %v2409_v50 }
 0x230   : > { %v1216_v47 = vadd.f32 %v2337_v17, %v1177_v53  ;;  %v813_v62 = vpop.xlane.xlu0 %812  ;;  %v950_v42 = vmul.f32 %v2445_v52, %v2445_v52 }
 0x231   : > { %1247 = vst [vmem:[%s2349_s23 + $0xa0] sm:$0xff] %v1215_v34  ;;  %v815_v58 = vpop.xlane.xlu1 %814  ;;  %v901_v37 = vmul.f32 0.0078125, %v813_v62 }
 0x232   : > { %1248 = vst [vmem:[%s2349_s23 + $0xa8] sm:$0xff] %v1216_v47  ;;  %v902_v57 = vmul.f32 0.0078125, %v815_v58 }
 0x233   : > { %v965_v61 = vsub.f32 %v901_v37, %v933_v48 }
 0x234   : > { %v966_v5 = vsub.f32 %v902_v57, %v934_v2  ;;  %v845_v13 = vpop.xlane.xlu0 %844 }
 0x235   : > { %v997_v15 = vmax.f32 %v965_v61, 0.0  ;;  %v847_v6 = vpop.xlane.xlu1 %846  ;;  %v917_v18 = vmul.f32 0.0078125, %v845_v13 }
 0x236   : > { %v1687_v16 = vpop.eup %1686  ;;  %v998_v23 = vmax.f32 %v966_v5, 0.0  ;;  %v918_v33 = vmul.f32 0.0078125, %v847_v6 }
 0x237   : > { %v1689_v14 = vpop.eup %1688  ;;  %v1123_v25 = vmul.f32 %v1687_v16, %v1091_v22  ;;  %v1029_v4 = vadd.f32 1e-12, %v997_v15  ;;  %v981_v55 = vsub.f32 %v917_v18, %v949_v40 }
 0x238   : > { %v1124_v59 = vmul.f32 %v1689_v14, %v1092_v28  ;;  %v1030_v56 = vadd.f32 1e-12, %v998_v23  ;;  %v982_v27 = vsub.f32 %v918_v33, %v950_v42  ;;  %v721_v31 = vpop.xlane.xlu0 %720  ;;  %v1093_v14 = vsub.f32 %v2203_v32, %v2429_v35 }
 0x239   : > { %v1162_v38 = vmul.f32 %v2330_v20, %v1123_v25  ;;  %1694 = vrsqrt.f32 %v1029_v4  ;;  %v1013_v3 = vmax.f32 %v981_v55, 0.0  ;;  %v723_v26 = vpop.xlane.xlu1 %722  ;;  %v2465_v9 = vmul.f32 0.0078125, %v721_v31 }
 0x23a   : > { %v1691_v60 = vpop.eup %1690  ;;  %v1163_v41 = vmul.f32 %v2330_v20, %v1124_v59  ;;  %1696 = vrsqrt.f32 %v1030_v56  ;;  %v1014_v0 = vmax.f32 %v982_v27, 0.0  ;;  %v2469_v57 = vmul.f32 0.0078125, %v723_v26 }
 0x23b   : > { %v1693_v53 = vpop.eup %1692  ;;  %v1201_v34 = vadd.f32 %v2337_v17, %v1162_v38  ;;  %v1139_v47 = vmul.f32 %v1691_v60, %v1107_v19  ;;  %v1045_v7 = vadd.f32 1e-12, %v1013_v3  ;;  %v935_v22 = vmul.f32 %v2465_v9, %v2465_v9 }
 0x23c   : > { %v1202_v39 = vadd.f32 %v2337_v17, %v1163_v41  ;;  %v1140_v62 = vmul.f32 %v1693_v53, %v1108_v63  ;;  %v1046_v48 = vadd.f32 1e-12, %v1014_v0  ;;  %v753_v58 = vpop.xlane.xlu0 %752  ;;  %v936_v18 = vmul.f32 %v2469_v57, %v2469_v57 }
 0x23d   : > { %1233 = vst [vmem:[%s2349_s23 + $0x30] sm:$0xff] %v1201_v34  ;;  %v1178_v37 = vmul.f32 %v2330_v20, %v1139_v47  ;;  %1698 = vrsqrt.f32 %v1045_v7  ;;  %v755_v50 = vpop.xlane.xlu1 %754  ;;  %v2476_v40 = vmul.f32 0.0078125, %v753_v58  ;;  %v1094_v27 = vsub.f32 %v2206_v44, %v2433_v21 }
 0x23e   : > { %1234 = vst [vmem:[%s2349_s23 + $0x38] sm:$0xff] %v1202_v39  ;;  %v1179_v2 = vmul.f32 %v2330_v20, %v1140_v62  ;;  %1700 = vrsqrt.f32 %v1046_v48  ;;  %v2481_v16 = vmul.f32 0.0078125, %v755_v50  ;;  %v1109_v53 = vsub.f32 %v2211_v49, %v2440_v54 }
 0x23f   : > { %v1217_v61 = vadd.f32 %v2337_v17, %v1178_v37  ;;  %v951_v25 = vmul.f32 %v2476_v40, %v2476_v40  ;;  %v1110_v7 = vsub.f32 %v2214_v51, %v2445_v52 }
 0x240   : > { %v1218_v5 = vadd.f32 %v2337_v17, %v1179_v2  ;;  %v817_v13 = vpop.xlane.xlu0 %816  ;;  %v952_v31 = vmul.f32 %v2481_v16, %v2481_v16 }
 0x241   : > { %1249 = vst [vmem:[%s2349_s23 + $0xb0] sm:$0xff] %v1217_v61  ;;  %v819_v15 = vpop.xlane.xlu1 %818  ;;  %v903_v6 = vmul.f32 0.0078125, %v817_v13 }
 0x242   : > { %1250 = vst [vmem:[%s2349_s23 + $0xb8] sm:$0xff] %v1218_v5  ;;  %v904_v28 = vmul.f32 0.0078125, %v819_v15 }
 0x243   : > { %v967_v42 = vsub.f32 %v903_v6, %v935_v22 }
 0x244   : > { %v968_v23 = vsub.f32 %v904_v28, %v936_v18  ;;  %v849_v33 = vpop.xlane.xlu0 %848 }
 0x245   : > { %v999_v4 = vmax.f32 %v967_v42, 0.0  ;;  %v851_v55 = vpop.xlane.xlu1 %850  ;;  %v919_v59 = vmul.f32 0.0078125, %v849_v33 }
 0x246   : > { %v1695_v56 = vpop.eup %1694  ;;  %v1000_v19 = vmax.f32 %v968_v23, 0.0  ;;  %v920_v38 = vmul.f32 0.0078125, %v851_v55 }
 0x247   : > { %v1697_v3 = vpop.eup %1696  ;;  %v1125_v26 = vmul.f32 %v1695_v56, %v1093_v14  ;;  %v1031_v60 = vadd.f32 1e-12, %v999_v4  ;;  %v983_v63 = vsub.f32 %v919_v59, %v951_v25 }
 0x248   : > { %v1126_v32 = vmul.f32 %v1697_v3, %v1094_v27  ;;  %v1032_v35 = vadd.f32 1e-12, %v1000_v19  ;;  %v984_v41 = vsub.f32 %v920_v38, %v952_v31  ;;  %v725_v0 = vpop.xlane.xlu0 %724  ;;  %v1095_v27 = vsub.f32 %v2235_v1, %v2465_v9 }
 0x249   : > { %v1164_v34 = vmul.f32 %v2330_v20, %v1125_v26  ;;  %1702 = vrsqrt.f32 %v1031_v60  ;;  %v1015_v44 = vmax.f32 %v983_v63, 0.0  ;;  %v727_v21 = vpop.xlane.xlu1 %726  ;;  %v2501_v51 = vmul.f32 0.0078125, %v725_v0 }
 0x24a   : > { %v1699_v47 = vpop.eup %1698  ;;  %v1165_v39 = vmul.f32 %v2330_v20, %v1126_v32  ;;  %1704 = vrsqrt.f32 %v1032_v35  ;;  %v1016_v62 = vmax.f32 %v984_v41, 0.0  ;;  %v2505_v22 = vmul.f32 0.0078125, %v727_v21 }
 0x24b   : > { %v1701_v48 = vpop.eup %1700  ;;  %v1203_v58 = vadd.f32 %v2337_v17, %v1164_v34  ;;  %v1141_v37 = vmul.f32 %v1699_v47, %v1109_v53  ;;  %v1047_v49 = vadd.f32 1e-12, %v1015_v44  ;;  %v937_v28 = vmul.f32 %v2501_v51, %v2501_v51 }
 0x24c   : > { %v1204_v54 = vadd.f32 %v2337_v17, %v1165_v39  ;;  %v1142_v50 = vmul.f32 %v1701_v48, %v1110_v7  ;;  %v1048_v2 = vadd.f32 1e-12, %v1016_v62  ;;  %v757_v61 = vpop.xlane.xlu0 %756  ;;  %v938_v14 = vmul.f32 %v2505_v22, %v2505_v22 }
 0x24d   : > { %1235 = vst [vmem:[%s2349_s23 + $0x40] sm:$0xff] %v1203_v58  ;;  %v1180_v5 = vmul.f32 %v2330_v20, %v1141_v37  ;;  %1706 = vrsqrt.f32 %v1047_v49  ;;  %v759_v52 = vpop.xlane.xlu1 %758  ;;  %v2512_v42 = vmul.f32 0.0078125, %v757_v61  ;;  %v1096_v60 = vsub.f32 %v2238_v24, %v2469_v57 }
 0x24e   : > { %1236 = vst [vmem:[%s2349_s23 + $0x48] sm:$0xff] %v1204_v54  ;;  %v1181_v13 = vmul.f32 %v2330_v20, %v1142_v50  ;;  %1708 = vrsqrt.f32 %v1048_v2  ;;  %v2517_v25 = vmul.f32 0.0078125, %v759_v52  ;;  %v1111_v47 = vsub.f32 %v2243_v29, %v2476_v40 }
 0x24f   : > { %v1219_v15 = vadd.f32 %v2337_v17, %v1180_v5  ;;  %v953_v31 = vmul.f32 %v2512_v42, %v2512_v42  ;;  %v1112_v62 = vsub.f32 %v2246_v36, %v2481_v16 }
 0x250   : > { %v1220_v6 = vadd.f32 %v2337_v17, %v1181_v13  ;;  %v821_v18 = vpop.xlane.xlu0 %820  ;;  %v954_v63 = vmul.f32 %v2517_v25, %v2517_v25 }
 0x251   : > { %1251 = vst [vmem:[%s2349_s23 + $0xc0] sm:$0xff] %v1219_v15  ;;  %v823_v23 = vpop.xlane.xlu1 %822  ;;  %v905_v33 = vmul.f32 0.0078125, %v821_v18 }
 0x252   : > { %1252 = vst [vmem:[%s2349_s23 + $0xc8] sm:$0xff] %v1220_v6  ;;  %v906_v4 = vmul.f32 0.0078125, %v823_v23 }
 0x253   : > { %v969_v55 = vsub.f32 %v905_v33, %v937_v28 }
 0x254   : > { %v970_v59 = vsub.f32 %v906_v4, %v938_v14  ;;  %v853_v56 = vpop.xlane.xlu0 %852 }
 0x255   : > { %v1001_v19 = vmax.f32 %v969_v55, 0.0  ;;  %v855_v38 = vpop.xlane.xlu1 %854  ;;  %v921_v3 = vmul.f32 0.0078125, %v853_v56 }
 0x256   : > { %v1703_v26 = vpop.eup %1702  ;;  %v1002_v32 = vmax.f32 %v970_v59, 0.0  ;;  %v922_v35 = vmul.f32 0.0078125, %v855_v38 }
 0x257   : > { %v1705_v41 = vpop.eup %1704  ;;  %v1127_v0 = vmul.f32 %v1703_v26, %v1095_v27  ;;  %v1033_v53 = vadd.f32 1e-12, %v1001_v19  ;;  %v985_v34 = vsub.f32 %v921_v3, %v953_v31  ;;  %v1097_v19 = vsub.f32 %v2261_v46, %v2501_v51 }
 0x258   : > { %v1128_v1 = vmul.f32 %v1705_v41, %v1096_v60  ;;  %v1034_v9 = vadd.f32 1e-12, %v1002_v32  ;;  %v986_v44 = vsub.f32 %v922_v35, %v954_v63  ;;  %v729_v21 = vpop.xlane.xlu0 %728  ;;  %v1098_v32 = vsub.f32 %v2264_v8, %v2505_v22 }
 0x259   : > { %v1166_v7 = vmul.f32 %v2330_v20, %v1127_v0  ;;  %1710 = vrsqrt.f32 %v1033_v53  ;;  %v1017_v24 = vmax.f32 %v985_v34, 0.0  ;;  %v731_v57 = vpop.xlane.xlu1 %730  ;;  %v2537_v36 = vmul.f32 0.0078125, %v729_v21 }
 0x25a   : > { %v1707_v39 = vpop.eup %1706  ;;  %v1167_v48 = vmul.f32 %v2330_v20, %v1128_v1  ;;  %1712 = vrsqrt.f32 %v1034_v9  ;;  %v1018_v58 = vmax.f32 %v986_v44, 0.0  ;;  %v2541_v13 = vmul.f32 0.0078125, %v731_v57 }
 0x25b   : > { %v1709_v37 = vpop.eup %1708  ;;  %v1205_v49 = vadd.f32 %v2337_v17, %v1166_v7  ;;  %v1143_v54 = vmul.f32 %v1707_v39, %v1111_v47  ;;  %v1049_v29 = vadd.f32 1e-12, %v1017_v24  ;;  %v939_v28 = vmul.f32 %v2537_v36, %v2537_v36 }
 0x25c   : > { %v1206_v40 = vadd.f32 %v2337_v17, %v1167_v48  ;;  %v1144_v50 = vmul.f32 %v1709_v37, %v1112_v62  ;;  %v1050_v2 = vadd.f32 1e-12, %v1018_v58  ;;  %v761_v61 = vpop.xlane.xlu0 %760  ;;  %v940_v4 = vmul.f32 %v2541_v13, %v2541_v13 }
 0x25d   : > { %1237 = vst [vmem:[%s2349_s23 + $0x50] sm:$0xff] %v1205_v49  ;;  %v1182_v5 = vmul.f32 %v2330_v20, %v1143_v54  ;;  %1714 = vrsqrt.f32 %v1049_v29  ;;  %v763_v16 = vpop.xlane.xlu1 %762  ;;  %v2548_v23 = vmul.f32 0.0078125, %v761_v61  ;;  %v1113_v21 = vsub.f32 %v2268_v11, %v2512_v42 }
 0x25e   : > { %1238 = vst [vmem:[%s2349_s23 + $0x58] sm:$0xff] %v1206_v40  ;;  %v1183_v52 = vmul.f32 %v2330_v20, %v1144_v50  ;;  %1716 = vrsqrt.f32 %v1050_v2  ;;  %v2553_v55 = vmul.f32 0.0078125, %v763_v16  ;;  %v1114_v7 = vsub.f32 %v2270_v12, %v2517_v25 }
 0x25f   : > { %v1221_v15 = vadd.f32 %v2337_v17, %v1182_v5  ;;  %v955_v38 = vmul.f32 %v2548_v23, %v2548_v23  ;;  %v1099_v29 = vsub.f32 %v2282_v30, %v2537_v36  ;;  %v1100_v50 = vsub.f32 %v2284_v43, %v2541_v13 }
 0x260   : > { %v1222_v6 = vadd.f32 %v2337_v17, %v1183_v52  ;;  %v825_v18 = vpop.xlane.xlu0 %824  ;;  %v956_v35 = vmul.f32 %v2553_v55, %v2553_v55  ;;  %v1115_v16 = vsub.f32 %v2288_v10, %v2548_v23  ;;  %v1116_v30 = vsub.f32 %v2290_v45, %v2553_v55 }
 0x261   : > { %1253 = vst [vmem:[%s2349_s23 + $0xd0] sm:$0xff] %v1221_v15  ;;  %v827_v33 = vpop.xlane.xlu1 %826  ;;  %v907_v14 = vmul.f32 0.0078125, %v825_v18 }
 0x262   : > { %1254 = vst [vmem:[%s2349_s23 + $0xd8] sm:$0xff] %v1222_v6  ;;  %v908_v59 = vmul.f32 0.0078125, %v827_v33 }
 0x263   : > { %v971_v56 = vsub.f32 %v907_v14, %v939_v28 }
 0x264   : > { %v972_v27 = vsub.f32 %v908_v59, %v940_v4  ;;  %v857_v31 = vpop.xlane.xlu0 %856 }
 0x265   : > { %v1003_v3 = vmax.f32 %v971_v56, 0.0  ;;  %v859_v26 = vpop.xlane.xlu1 %858  ;;  %v923_v60 = vmul.f32 0.0078125, %v857_v31 }
 0x266   : > { %v1711_v63 = vpop.eup %1710  ;;  %v1004_v41 = vmax.f32 %v972_v27, 0.0  ;;  %v924_v0 = vmul.f32 0.0078125, %v859_v26 }
 0x267   : > { %v1713_v53 = vpop.eup %1712  ;;  %v1129_v34 = vmul.f32 %v1711_v63, %v1097_v19  ;;  %v1035_v1 = vadd.f32 1e-12, %v1003_v3  ;;  %v987_v9 = vsub.f32 %v923_v60, %v955_v38 }
 0x268   : > { %v1130_v46 = vmul.f32 %v1713_v53, %v1098_v32  ;;  %v1036_v51 = vadd.f32 1e-12, %v1004_v41  ;;  %v988_v44 = vsub.f32 %v924_v0, %v956_v35 }
 0x269   : > { %v1168_v47 = vmul.f32 %v2330_v20, %v1129_v34  ;;  %1718 = vrsqrt.f32 %v1035_v1  ;;  %v1019_v8 = vmax.f32 %v987_v9, 0.0 }
 0x26a   : > { %v1715_v22 = vpop.eup %1714  ;;  %v1169_v24 = vmul.f32 %v2330_v20, %v1130_v46  ;;  %1720 = vrsqrt.f32 %v1036_v51  ;;  %v1020_v57 = vmax.f32 %v988_v44, 0.0 }
 0x26b   : > { %v1717_v39 = vpop.eup %1716  ;;  %v1207_v62 = vadd.f32 %v2337_v17, %v1168_v47  ;;  %v1145_v11 = vmul.f32 %v1715_v22, %v1113_v21  ;;  %v1051_v42 = vadd.f32 1e-12, %v1019_v8 }
 0x26c   : > { %v1208_v48 = vadd.f32 %v2337_v17, %v1169_v24  ;;  %v1146_v58 = vmul.f32 %v1717_v39, %v1114_v7  ;;  %v1052_v37 = vadd.f32 1e-12, %v1020_v57 }
 0x26d   : > { %1239 = vst [vmem:[%s2349_s23 + $0x60] sm:$0xff] %v1207_v62  ;;  %v1184_v49 = vmul.f32 %v2330_v20, %v1145_v11  ;;  %1722 = vrsqrt.f32 %v1051_v42 }
 0x26e   : > { %1240 = vst [vmem:[%s2349_s23 + $0x68] sm:$0xff] %v1208_v48  ;;  %v1185_v12 = vmul.f32 %v2330_v20, %v1146_v58  ;;  %1724 = vrsqrt.f32 %v1052_v37 }
 0x26f   : > { %v1223_v25 = vadd.f32 %v2337_v17, %v1184_v49 }
 0x270   : > { %v1224_v54 = vadd.f32 %v2337_v17, %v1185_v12 }
 0x271   : > { %1255 = vst [vmem:[%s2349_s23 + $0xe0] sm:$0xff] %v1223_v25 }
 0x272   : > { %1256 = vst [vmem:[%s2349_s23 + $0xe8] sm:$0xff] %v1224_v54 }
 0x276   : > { %v1719_v40 = vpop.eup %1718 }
 0x277   : > { %v1721_v2 = vpop.eup %1720  ;;  %v1131_v61 = vmul.f32 %v1719_v40, %v1099_v29 }
 0x278   : > { %v1132_v5 = vmul.f32 %v1721_v2, %v1100_v50 }
 0x279   : > { %v1170_v52 = vmul.f32 %v2330_v20, %v1131_v61 }
 0x27a   : > { %v1723_v15 = vpop.eup %1722  ;;  %v1171_v36 = vmul.f32 %v2330_v20, %v1132_v5 }
 0x27b   : > { %v1725_v6 = vpop.eup %1724  ;;  %v1209_v43 = vadd.f32 %v2337_v17, %v1170_v52  ;;  %v1147_v13 = vmul.f32 %v1723_v15, %v1115_v16 }
 0x27c   : > { %v1210_v18 = vadd.f32 %v2337_v17, %v1171_v36  ;;  %v1148_v28 = vmul.f32 %v1725_v6, %v1116_v30 }
 0x27d   : > { %1241 = vst [vmem:[%s2349_s23 + $0x70] sm:$0xff] %v1209_v43  ;;  %v1186_v10 = vmul.f32 %v2330_v20, %v1147_v13 }
 0x27e   : > { %1242 = vst [vmem:[%s2349_s23 + $0x78] sm:$0xff] %v1210_v18  ;;  %v1187_v45 = vmul.f32 %v2330_v20, %v1148_v28 }
 0x27f   : > { %v1225_v23 = vadd.f32 %v2337_v17, %v1186_v10 }
 0x280   : > { %v1226_v33 = vadd.f32 %v2337_v17, %v1187_v45 }
 0x281   : > { %1257 = vst [vmem:[%s2349_s23 + $0xf0] sm:$0xff] %v1225_v23 }
 0x282   : > { %1258 = vst [vmem:[%s2349_s23 + $0xf8] sm:$0xff] %v1226_v33 }
 0x283   : > { %1793 = shalt.err (!%p1790_p0)
}
 0x284   : > { %s1794_s26 = scalar_lea.hbm %s2601_s11, 4096  ;;  %s1798_s6 = scalar_lea.hbm %s2654_s5, 8192 }
 0x285   : > { %p1795_p5 = scmp.ne.s32.totalorder %s2601_s11, %s1794_s26  ;;  %p1799_p4 = scmp.lt.s32.totalorder %s2601_s11, %s2654_s5 }
 0x286   : > { %p1800_p6 = scmp.lt.s32.totalorder %s1798_s6, %s1794_s26 }
 0x287   : > { %p1796_p2 = pnand %p1795_p5, %p2672_p11 }
 0x288   : > { %p1801_p8 = por %p1800_p6, %p1799_p4 }
 0x289   : > { %p1797_p1 = pneg %p1796_p2 }
 0x28b   : > { %p1802_p3 = pnand %p1801_p8, %p1797_p1 }
 0x28d   : > { %1805 = shalt.err (!%p1802_p3)
}
 0x28e   : > { %s1855_s27 = smov 128   ;;  %s1856_s28 = smov 8  }
 0x28f   : > { %1543 = dma.vmem_to_hbm [thread:$0]  (%p2672_p11), %s2603_s15, 4096, %s2601_s11, %s1260_s22, %s1855_s27, %s1855_s27, %s1856_s28  }
 0x290 PF: > { %s1288_s12 = sand.u32 1, %s1836_s18   ;;  %p2673_p7 = scmp.ne.s32.totalorder %s2661_s25, 0 }
 0x291   : > { %p2674_p9 = scmp.ge.s32.totalorder %s1848_s21, 2  ;;  %s1289_s9 = scalar_lea.sflag [#allocation4], %s1288_s12 }
 0x293   : > { %p1554_p10 = pnand %p2674_p9, %p2673_p7 }
 0x295   : > { %p1555_p12 = pneg %p1554_p10 }
 0x297   : > { %1831 = dma.done.wait (%p1555_p12), %s1289_s9, 4096  }
 0x298   : > { %1833 = vsyncadd (%p1555_p12), %s1289_s9, 4294963200  ;;  %p19_p13 = scmp.ge.s32.totalorder %s1941_s30, 4   ;;  %s2675_s18 = smov %s1840_s19 }
 0x299   : > { %s2676_s19 = smov %s1844_s20  ;;  %s2677_s20 = smov %s1961_s13 }
 0x29a   : > { %s2678_s21 = smov %s1941_s30  ;;  %21 = sbr.rel (!%p19_p13) target bundleno = 6 (0x6), region = 89 }
 0x29f   :  { %1294 = vsyncpa [#allocation3], 1 }
 0x2a0   :  { %1296 = vsyncpa [#allocation3 + $0x1], 1 }
 0x2a1   :  { %1297 = vsyncpa [#allocation6], 1 }
 0x2a2   :  { %1298 = vsyncpa [#allocation4], 1 }
 0x2a3   :  { %1300 = vsyncpa [#allocation4 + $0x1], 1 }

</bundles_post_ra>
